<compile_context>
chip_gen: v6e
topology: v6e:2x2x1
jax: 0.10.0
libtpu: 0.0.40
codegen_flags: <defaults>
</compile_context>

<pallas_src>
import functools

import jax
import jax.numpy as jnp
from jax.experimental import pallas as pl
from jax.experimental.pallas import tpu as pltpu

EPS = 1e-5
LANES = 128          # channel padding target: one full lane tile
VMEM_LIMIT = 32 * 1024 * 1024   # fits v7x's 64 MiB with headroom


def _conv_stats_kernel(xm_ref, xp_ref, xn_ref, w_ref, b_ref, sc_ref, sh_ref,
                       y_ref, st_ref, *, TH, H, W, Cp, apply_input_act):
    """One (batch, row-strip) grid step: 3x3 conv (optionally with the previous
    stage's BatchNorm+ReLU folded into the input read) producing the pre-BN
    activation strip plus per-strip BN partial statistics.

    xm_ref : (1, TH, W, Cp)  row strip of the channel-padded NHWC input
    xp_ref : (1, 1,  W, Cp)  row just above the strip (clamped; masked at h==0)
    xn_ref : (1, 1,  W, Cp)  row just below the strip (clamped; masked at last)
    w_ref  : (9*Cp, Cp)      bf16 fused conv weights, K ordered (tap, cin)
    b_ref  : (1, Cp)         f32 conv bias
    sc_ref, sh_ref : (1, Cp) folded BN scale/shift of the previous stage
    y_ref  : (1, TH, W, Cp)  pre-BN conv output strip (f32)
    st_ref : (1, 1, 2, Cp)   [sum, centered sum-of-squares] over this strip
    """
    h = pl.program_id(1)

    # ---- assemble the (TH+2, W, Cp) haloed window ---------------------------
    win = jnp.concatenate([xp_ref[0], xm_ref[0], xn_ref[0]], axis=0)

    # previous stage's BatchNorm + ReLU, folded to a per-channel affine,
    # applied on the fly to the stored pre-BN activations.
    if apply_input_act:
        win = jnp.maximum(win * sc_ref[...].reshape(1, 1, Cp)
                          + sh_ref[...].reshape(1, 1, Cp), 0.0)

    # rows outside the image (conv zero padding / clamped halo loads) -> 0
    row = jax.lax.broadcasted_iota(jnp.int32, (TH + 2, 1, 1), 0) + h * TH - 1
    win = jnp.where(jnp.logical_and(row >= 0, row < H), win, 0.0)

    # conv zero padding along W, built in VMEM only (never stored to HBM)
    zcol = jnp.zeros((TH + 2, 1, Cp), jnp.float32)
    win = jnp.concatenate([zcol, win, zcol], axis=1)            # (TH+2, W+2, Cp)

    # ---- im2col once, ONE fused MXU matmul (bf16 operands, f32 accumulate) --
    taps = [win[kh:kh + TH, kw:kw + W, :]
            for kh in range(3) for kw in range(3)]
    patch = jnp.concatenate(taps, axis=-1).reshape(TH * W, 9 * Cp)
    acc = jnp.dot(patch.astype(jnp.bfloat16), w_ref[...],
                  preferred_element_type=jnp.float32)
    acc = acc + b_ref[...]                                      # (TH*W, Cp)

    y_ref[...] = acc.reshape(1, TH, W, Cp)

    # ---- per-strip BatchNorm partials (mean-centered: no cancellation) ------
    cnt = TH * W
    ssum = jnp.sum(acc, axis=0, keepdims=True)                  # (1, Cp)
    sm2 = jnp.sum((acc - ssum / cnt) ** 2, axis=0, keepdims=True)
    st_ref[...] = jnp.concatenate([ssum, sm2], axis=0).reshape(1, 1, 2, Cp)


def _bn_relu_kernel(y_ref, sc_ref, sh_ref, o_ref, *, Cp):
    sc = sc_ref[...].reshape(1, 1, 1, Cp)
    sh = sh_ref[...].reshape(1, 1, 1, Cp)
    o_ref[...] = jnp.maximum(y_ref[...] * sc + sh, 0.0)


def _conv_stage(x, w, b, scale, shift, *, apply_input_act, TH):
    """Gridded conv stage: returns (pre-BN activations, per-strip BN partials)."""
    N, H, W, Cp = x.shape
    n_h = H // TH

    strip = pl.BlockSpec((1, TH, W, Cp), lambda n, h: (n, h, 0, 0))
    # 1-row halo above / below the strip, clamped at the image boundary; the
    # kernel masks the out-of-image rows to zero, so no padded copy in HBM.
    row_above = pl.BlockSpec(
        (1, 1, W, Cp), lambda n, h: (n, jnp.maximum(h * TH - 1, 0), 0, 0))
    row_below = pl.BlockSpec(
        (1, 1, W, Cp), lambda n, h: (n, jnp.minimum((h + 1) * TH, H - 1), 0, 0))
    replicated = lambda shape: pl.BlockSpec(shape, lambda n, h: (0,) * len(shape))

    kern = functools.partial(_conv_stats_kernel, TH=TH, H=H, W=W, Cp=Cp,
                             apply_input_act=apply_input_act)
    y, stats = pl.pallas_call(
        kern,
        grid=(N, n_h),
        in_specs=[strip, row_above, row_below,
                  replicated(w.shape), replicated(b.shape),
                  replicated(scale.shape), replicated(shift.shape)],
        out_specs=[strip, pl.BlockSpec((1, 1, 2, Cp), lambda n, h: (n, h, 0, 0))],
        out_shape=[jax.ShapeDtypeStruct((N, H, W, Cp), jnp.float32),
                   jax.ShapeDtypeStruct((N, n_h, 2, Cp), jnp.float32)],
        compiler_params=pltpu.CompilerParams(
            # every grid step writes disjoint blocks -> megacore friendly
            dimension_semantics=("parallel", "parallel"),
            vmem_limit_bytes=VMEM_LIMIT),
    )(x, x, x, w, b, scale, shift)
    return y, stats


def _bn_fold(stats, gamma_p, beta_p, count_per_block):
    """Combine per-strip (sum, centered SS) into global BN scale/shift using
    Chan's parallel-variance formula (numerically stable in f32)."""
    Cp = stats.shape[-1]
    s = stats[:, :, 0, :].reshape(-1, Cp)
    m2 = stats[:, :, 1, :].reshape(-1, Cp)
    total = s.shape[0] * count_per_block
    mean = jnp.sum(s, axis=0) / total
    block_mean = s / count_per_block
    m2_tot = jnp.sum(m2, axis=0) + count_per_block * jnp.sum(
        (block_mean - mean) ** 2, axis=0)
    var = m2_tot / total
    scale = gamma_p.reshape(-1) * jax.lax.rsqrt(var + EPS)
    shift = beta_p.reshape(-1) - mean * scale
    return scale.reshape(1, Cp), shift.reshape(1, Cp)


@functools.partial(jax.jit, static_argnames=("tile_h",))
def inconv_forward(x_nchw, params, *, tile_h=8):
    """x_nchw: (N, Cin, H, W) float32 -> (N, Cout, H, W) float32."""
    N, Cin, H, W = x_nchw.shape
    Cout = params["w1"].shape[-1]
    Cp = LANES
    TH = tile_h if H % tile_h == 0 else H
    n_h = H // TH
    cnt = TH * W                     # elements per strip per channel

    # NCHW -> NHWC with channels zero-padded to a dense 128-lane tile.
    # TODO(synk): fold this transpose/channel-pad into the first conv kernel
    # (per-channel DMA) to drop one extra HBM round trip of the input.
    x = jnp.transpose(x_nchw.astype(jnp.float32), (0, 2, 3, 1))
    x = jnp.pad(x, ((0, 0), (0, 0), (0, 0), (0, Cp - Cin)))

    def pack_w(w):       # (9, Ci, Co) -> (9*Cp, Cp) bf16, K ordered (tap, cin)
        ci, co = w.shape[1], w.shape[2]
        wp = jnp.pad(w, ((0, 0), (0, Cp - ci), (0, Cp - co)))
        return wp.reshape(9 * Cp, Cp).astype(jnp.bfloat16)

    def pack_v(v):       # (1, C) -> (1, Cp) f32 (zero-padded lanes)
        return jnp.pad(v.astype(jnp.float32), ((0, 0), (0, Cp - v.shape[1])))

    w1, w2 = pack_w(params["w1"]), pack_w(params["w2"])
    b1, b2 = pack_v(params["b1"]), pack_v(params["b2"])
    g1, g2 = pack_v(params["g1"]), pack_v(params["g2"])
    be1, be2 = pack_v(params["be1"]), pack_v(params["be2"])

    ident = jnp.zeros((1, Cp), jnp.float32)   # placeholders (unused by conv1)

    # conv1 -> pre-BN activations + per-strip BN1 partials
    y1, st1 = _conv_stage(x, w1, b1, ident, ident,
                          apply_input_act=False, TH=TH)
    sc1, sh1 = _bn_fold(st1, g1, be1, cnt)

    # (BN1 + ReLU folded into the input read) -> conv2 -> BN2 partials
    y2, st2 = _conv_stage(y1, w2, b2, sc1, sh1,
                          apply_input_act=True, TH=TH)
    sc2, sh2 = _bn_fold(st2, g2, be2, cnt)

    # final BN2 + ReLU, gridded/pipelined the same way
    strip = pl.BlockSpec((1, TH, W, Cp), lambda n, h: (n, h, 0, 0))
    rep = pl.BlockSpec((1, Cp), lambda n, h: (0, 0))
    out_p = pl.pallas_call(
        functools.partial(_bn_relu_kernel, Cp=Cp),
        grid=(N, n_h),
        in_specs=[strip, rep, rep],
        out_specs=strip,
        out_shape=jax.ShapeDtypeStruct((N, H, W, Cp), jnp.float32),
        compiler_params=pltpu.CompilerParams(
            dimension_semantics=("parallel", "parallel"),
            vmem_limit_bytes=VMEM_LIMIT),
    )(y2, sc2, sh2)

    # drop the channel padding, back to NCHW
    return jnp.transpose(out_p[:, :, :, :Cout], (0, 3, 1, 2))


def _reference_forward(x_nchw, params):
    """Plain-JAX (XLA conv) reference, f32 throughout."""
    Cout = params["w1"].shape[-1]

    def conv(x, w_flat, b):
        cin = w_flat.shape[1]
        w = jnp.transpose(w_flat.reshape(3, 3, cin, Cout), (3, 2, 0, 1))
        y = jax.lax.conv_general_dilated(
            x, w, window_strides=(1, 1), padding=((1, 1), (1, 1)),
            dimension_numbers=("NCHW", "OIHW", "NCHW"))
        return y + b.reshape(1, Cout, 1, 1)

    def bn_relu(y, g, be):
        mean = jnp.mean(y, axis=(0, 2, 3), keepdims=True)
        var = jnp.mean((y - mean) ** 2, axis=(0, 2, 3), keepdims=True)
        y = (y - mean) * jax.lax.rsqrt(var + EPS)
        y = y * g.reshape(1, Cout, 1, 1) + be.reshape(1, Cout, 1, 1)
        return jnp.maximum(y, 0.0)

    y = bn_relu(conv(x_nchw, params["w1"], params["b1"]),
                params["g1"], params["be1"])
    y = bn_relu(conv(y, params["w2"], params["b2"]),
                params["g2"], params["be2"])
    return y


def make_params(key, in_ch, out_ch):
    ks = jax.random.split(key, 6)
    return {
        "w1": 0.1 * jax.random.normal(ks[0], (9, in_ch, out_ch), jnp.float32),
        "b1": 0.1 * jax.random.normal(ks[1], (1, out_ch), jnp.float32),
        "g1": 1.0 + 0.1 * jax.random.normal(ks[2], (1, out_ch), jnp.float32),
        "be1": 0.1 * jax.random.normal(ks[3], (1, out_ch), jnp.float32),
        "w2": 0.1 * jax.random.normal(ks[4], (9, out_ch, out_ch), jnp.float32),
        "b2": 0.1 * jax.random.normal(ks[5], (1, out_ch), jnp.float32),
        "g2": jnp.ones((1, out_ch), jnp.float32),
        "be2": jnp.zeros((1, out_ch), jnp.float32),
    }


if __name__ == "__main__":
    key = jax.random.PRNGKey(0)
    kx, kp = jax.random.split(key)

    N, Cin, Cout, H, W = 2, 4, 8, 16, 16
    x = jax.random.normal(kx, (N, Cin, H, W), jnp.float32)
    params = make_params(kp, Cin, Cout)

    out = jax.block_until_ready(inconv_forward(x, params))
    ref = jax.block_until_ready(_reference_forward(x, params))

    assert out.shape == (N, Cout, H, W)
    err = float(jnp.max(jnp.abs(out - ref)))
    # MXU operands are bf16 (per v6e/v7x guidance); accumulation, BN statistics
    # and normalization stay in f32, so only conv rounding differs from the
    # f32 reference.
    assert err < 3e-2, err
    print("KERNEL_OK")
</pallas_src>

<mosaic_0001>
module attributes {stable_mosaic.version = 11 : i64} {
  func.func @_conv_stats_kernel(%arg0: i32, %arg1: i32, %arg2: memref<1x8x16x128xf32, #tpu.memory_space<vmem>>, %arg3: memref<1x1x16x128xf32, #tpu.memory_space<vmem>>, %arg4: memref<1x1x16x128xf32, #tpu.memory_space<vmem>>, %arg5: memref<1152x128xbf16, #tpu.memory_space<vmem>>, %arg6: memref<1x128xf32, #tpu.memory_space<vmem>>, %arg7: memref<1x128xf32, #tpu.memory_space<vmem>>, %arg8: memref<1x128xf32, #tpu.memory_space<vmem>>, %arg9: memref<1x8x16x128xf32, #tpu.memory_space<vmem>>, %arg10: memref<1x1x2x128xf32, #tpu.memory_space<vmem>>) attributes {dimension_semantics = [#tpu.dimension_semantics<parallel>, #tpu.dimension_semantics<parallel>], iteration_bounds = array<i64: 2, 2>, scalar_prefetch = 0 : i64, scratch_operands = 0 : i64, tpu.core_type = #tpu.core_type<tc>, window_params = [{transform_indices = @transform_0, window_bounds = array<i64: 1, 8, 16, 128>}, {transform_indices = @transform_1, window_bounds = array<i64: 1, 1, 16, 128>}, {transform_indices = @transform_2, window_bounds = array<i64: 1, 1, 16, 128>}, {pipeline_mode = #tpu.pipeline_mode<synchronous>, transform_indices = @transform_3, window_bounds = array<i64: 1152, 128>}, {pipeline_mode = #tpu.pipeline_mode<synchronous>, transform_indices = @transform_4, window_bounds = array<i64: 1, 128>}, {pipeline_mode = #tpu.pipeline_mode<synchronous>, transform_indices = @transform_5, window_bounds = array<i64: 1, 128>}, {pipeline_mode = #tpu.pipeline_mode<synchronous>, transform_indices = @transform_6, window_bounds = array<i64: 1, 128>}, {transform_indices = @transform_7, window_bounds = array<i64: 1, 8, 16, 128>}, {transform_indices = @transform_8, window_bounds = array<i64: 1, 1, 2, 128>}]} {
    %c0 = arith.constant 0 : index
    %c0_0 = arith.constant 0 : index
    %c0_1 = arith.constant 0 : index
    %c0_2 = arith.constant 0 : index
    %0 = vector.load %arg3[%c0, %c0_0, %c0_1, %c0_2] : memref<1x1x16x128xf32, #tpu.memory_space<vmem>>, vector<1x1x16x128xf32>
    %1 = vector.shape_cast %0 : vector<1x1x16x128xf32> to vector<1x16x128xf32>
    %c0_3 = arith.constant 0 : index
    %c0_4 = arith.constant 0 : index
    %c0_5 = arith.constant 0 : index
    %c0_6 = arith.constant 0 : index
    %2 = vector.load %arg2[%c0_3, %c0_4, %c0_5, %c0_6] : memref<1x8x16x128xf32, #tpu.memory_space<vmem>>, vector<1x8x16x128xf32>
    %3 = vector.shape_cast %2 : vector<1x8x16x128xf32> to vector<8x16x128xf32>
    %c0_7 = arith.constant 0 : index
    %c0_8 = arith.constant 0 : index
    %c0_9 = arith.constant 0 : index
    %c0_10 = arith.constant 0 : index
    %4 = vector.load %arg4[%c0_7, %c0_8, %c0_9, %c0_10] : memref<1x1x16x128xf32, #tpu.memory_space<vmem>>, vector<1x1x16x128xf32>
    %5 = vector.shape_cast %4 : vector<1x1x16x128xf32> to vector<1x16x128xf32>
    %6 = tpu.concatenate %1, %3, %5 in 0 : vector<1x16x128xf32>, vector<8x16x128xf32>, vector<1x16x128xf32> -> vector<10x16x128xf32>
    %7 = tpu.iota {dimensions = array<i32: 0>} : vector<10x1x1xi32>
    %c8_i32 = arith.constant 8 : i32
    %8 = arith.muli %arg1, %c8_i32 : i32
    %9 = vector.broadcast %8 : i32 to vector<10x1x1xi32>
    %10 = arith.addi %7, %9 : vector<10x1x1xi32>
    %c1_i32 = arith.constant 1 : i32
    %11 = vector.broadcast %c1_i32 : i32 to vector<10x1x1xi32>
    %12 = arith.subi %10, %11 : vector<10x1x1xi32>
    %c0_i32 = arith.constant 0 : i32
    %13 = vector.broadcast %c0_i32 : i32 to vector<10x1x1xi32>
    %14 = arith.cmpi sge, %12, %13 : vector<10x1x1xi32>
    %c16_i32 = arith.constant 16 : i32
    %15 = vector.broadcast %c16_i32 : i32 to vector<10x1x1xi32>
    %16 = arith.cmpi slt, %12, %15 : vector<10x1x1xi32>
    %17 = arith.andi %14, %16 : vector<10x1x1xi1>
    %cst = arith.constant 0.000000e+00 : f32
    %18 = vector.shape_cast %17 : vector<10x1x1xi1> to vector<10x1x1xi1>
    %19 = vector.broadcast %18 : vector<10x1x1xi1> to vector<10x16x128xi1>
    %20 = vector.broadcast %cst : f32 to vector<10x16x128xf32>
    %21 = arith.select %19, %6, %20 : vector<10x16x128xi1>, vector<10x16x128xf32>
    %cst_11 = arith.constant 0.000000e+00 : f32
    %22 = vector.broadcast %cst_11 : f32 to vector<10x1x128xf32>
    %23 = tpu.concatenate %22, %21, %22 in 1 : vector<10x1x128xf32>, vector<10x16x128xf32>, vector<10x1x128xf32> -> vector<10x18x128xf32>
    %24 = vector.extract_strided_slice %23 {offsets = [0, 0, 0], sizes = [8, 16, 128], strides = [1, 1, 1]} : vector<10x18x128xf32> to vector<8x16x128xf32>
    %25 = vector.extract_strided_slice %23 {offsets = [0, 1, 0], sizes = [8, 16, 128], strides = [1, 1, 1]} : vector<10x18x128xf32> to vector<8x16x128xf32>
    %26 = vector.extract_strided_slice %23 {offsets = [0, 2, 0], sizes = [8, 16, 128], strides = [1, 1, 1]} : vector<10x18x128xf32> to vector<8x16x128xf32>
    %27 = vector.extract_strided_slice %23 {offsets = [1, 0, 0], sizes = [8, 16, 128], strides = [1, 1, 1]} : vector<10x18x128xf32> to vector<8x16x128xf32>
    %28 = vector.extract_strided_slice %23 {offsets = [1, 1, 0], sizes = [8, 16, 128], strides = [1, 1, 1]} : vector<10x18x128xf32> to vector<8x16x128xf32>
    %29 = vector.extract_strided_slice %23 {offsets = [1, 2, 0], sizes = [8, 16, 128], strides = [1, 1, 1]} : vector<10x18x128xf32> to vector<8x16x128xf32>
    %30 = vector.extract_strided_slice %23 {offsets = [2, 0, 0], sizes = [8, 16, 128], strides = [1, 1, 1]} : vector<10x18x128xf32> to vector<8x16x128xf32>
    %31 = vector.extract_strided_slice %23 {offsets = [2, 1, 0], sizes = [8, 16, 128], strides = [1, 1, 1]} : vector<10x18x128xf32> to vector<8x16x128xf32>
    %32 = vector.extract_strided_slice %23 {offsets = [2, 2, 0], sizes = [8, 16, 128], strides = [1, 1, 1]} : vector<10x18x128xf32> to vector<8x16x128xf32>
    %33 = tpu.concatenate %24, %25, %26, %27, %28, %29, %30, %31, %32 in 2 : vector<8x16x128xf32>, vector<8x16x128xf32>, vector<8x16x128xf32>, vector<8x16x128xf32>, vector<8x16x128xf32>, vector<8x16x128xf32>, vector<8x16x128xf32>, vector<8x16x128xf32>, vector<8x16x128xf32> -> vector<8x16x1152xf32>
    %34 = vector.shape_cast %33 : vector<8x16x1152xf32> to vector<128x1152xf32>
    %35 = arith.truncf %34 : vector<128x1152xf32> to vector<128x1152xbf16>
    %c0_12 = arith.constant 0 : index
    %c0_13 = arith.constant 0 : index
    %36 = vector.load %arg5[%c0_12, %c0_13] : memref<1152x128xbf16, #tpu.memory_space<vmem>>, vector<1152x128xbf16>
    %cst_14 = arith.constant dense<0.000000e+00> : vector<128x128xf32>
    %37 = tpu.matmul %35, %36, %cst_14 {dimension_numbers = #tpu.dot_dimension_numbers<[1], [0], [0], [1], [0, 0, 1, 1], [], []>} : vector<128x1152xbf16>, vector<1152x128xbf16>, vector<128x128xf32> -> vector<128x128xf32>
    %c0_15 = arith.constant 0 : index
    %c0_16 = arith.constant 0 : index
    %38 = vector.load %arg6[%c0_15, %c0_16] : memref<1x128xf32, #tpu.memory_space<vmem>>, vector<1x128xf32>
    %39 = vector.broadcast %38 : vector<1x128xf32> to vector<128x128xf32>
    %40 = arith.addf %37, %39 : vector<128x128xf32>
    %41 = vector.shape_cast %40 : vector<128x128xf32> to vector<1x8x16x128xf32>
    %c0_17 = arith.constant 0 : index
    %c0_18 = arith.constant 0 : index
    %c0_19 = arith.constant 0 : index
    %c0_20 = arith.constant 0 : index
    %42 = vector.load %arg9[%c0_17, %c0_18, %c0_19, %c0_20] : memref<1x8x16x128xf32, #tpu.memory_space<vmem>>, vector<1x8x16x128xf32>
    tpu.vector_store %arg9[%c0_17, %c0_18, %c0_19, %c0_20], %41 {strides = array<i32>} : memref<1x8x16x128xf32, #tpu.memory_space<vmem>>, vector<1x8x16x128xf32>,
    %cst_21 = arith.constant dense<0.000000e+00> : vector<128xf32>
    %43 = vector.multi_reduction <add>, %40, %cst_21 [0] : vector<128x128xf32> to vector<128xf32>
    %44 = vector.shape_cast %43 : vector<128xf32> to vector<1x128xf32>
    %cst_22 = arith.constant 1.280000e+02 : f32
    %45 = vector.broadcast %cst_22 : f32 to vector<1x128xf32>
    %46 = arith.divf %44, %45 : vector<1x128xf32>
    %47 = vector.broadcast %46 : vector<1x128xf32> to vector<128x128xf32>
    %48 = arith.subf %40, %47 : vector<128x128xf32>
    %49 = arith.mulf %48, %48 : vector<128x128xf32>
    %cst_23 = arith.constant dense<0.000000e+00> : vector<128xf32>
    %50 = vector.multi_reduction <add>, %49, %cst_23 [0] : vector<128x128xf32> to vector<128xf32>
    %51 = vector.shape_cast %50 : vector<128xf32> to vector<1x128xf32>
    %52 = tpu.concatenate %44, %51 in 0 : vector<1x128xf32>, vector<1x128xf32> -> vector<2x128xf32>
    %53 = vector.shape_cast %52 : vector<2x128xf32> to vector<1x1x2x128xf32>
    %c0_24 = arith.constant 0 : index
    %c0_25 = arith.constant 0 : index
    %c0_26 = arith.constant 0 : index
    %c0_27 = arith.constant 0 : index
    %54 = vector.load %arg10[%c0_24, %c0_25, %c0_26, %c0_27] : memref<1x1x2x128xf32, #tpu.memory_space<vmem>>, vector<1x1x2x128xf32>
    tpu.vector_store %arg10[%c0_24, %c0_25, %c0_26, %c0_27], %53 {strides = array<i32>} : memref<1x1x2x128xf32, #tpu.memory_space<vmem>>, vector<1x1x2x128xf32>,
    return
  }
  func.func @transform_0(%arg0: i32, %arg1: i32) -> (i32, i32, i32, i32) {
    %c0_i32 = arith.constant 0 : i32
    %c0_i32_0 = arith.constant 0 : i32
    %c0_i32_1 = arith.constant 0 : i32
    return %arg0, %arg1, %c0_i32, %c0_i32_0 : i32, i32, i32, i32
  }
  func.func @transform_1(%arg0: i32, %arg1: i32) -> (i32, i32, i32, i32) {
    %c8_i32 = arith.constant 8 : i32
    %0 = arith.muli %arg1, %c8_i32 : i32
    %c1_i32 = arith.constant 1 : i32
    %1 = arith.subi %0, %c1_i32 : i32
    %c0_i32 = arith.constant 0 : i32
    %2 = arith.maxsi %1, %c0_i32 : i32
    %c0_i32_0 = arith.constant 0 : i32
    %c0_i32_1 = arith.constant 0 : i32
    %c0_i32_2 = arith.constant 0 : i32
    return %arg0, %2, %c0_i32_0, %c0_i32_1 : i32, i32, i32, i32
  }
  func.func @transform_2(%arg0: i32, %arg1: i32) -> (i32, i32, i32, i32) {
    %c1_i32 = arith.constant 1 : i32
    %0 = arith.addi %arg1, %c1_i32 : i32
    %c8_i32 = arith.constant 8 : i32
    %1 = arith.muli %0, %c8_i32 : i32
    %c15_i32 = arith.constant 15 : i32
    %2 = arith.minsi %1, %c15_i32 : i32
    %c0_i32 = arith.constant 0 : i32
    %c0_i32_0 = arith.constant 0 : i32
    %c0_i32_1 = arith.constant 0 : i32
    return %arg0, %2, %c0_i32, %c0_i32_0 : i32, i32, i32, i32
  }
  func.func @transform_3(%arg0: i32, %arg1: i32) -> (i32, i32) {
    %c0_i32 = arith.constant 0 : i32
    %c0_i32_0 = arith.constant 0 : i32
    %c0_i32_1 = arith.constant 0 : i32
    return %c0_i32, %c0_i32_0 : i32, i32
  }
  func.func @transform_4(%arg0: i32, %arg1: i32) -> (i32, i32) {
    %c0_i32 = arith.constant 0 : i32
    %c0_i32_0 = arith.constant 0 : i32
    %c0_i32_1 = arith.constant 0 : i32
    return %c0_i32, %c0_i32_0 : i32, i32
  }
  func.func @transform_5(%arg0: i32, %arg1: i32) -> (i32, i32) {
    %c0_i32 = arith.constant 0 : i32
    %c0_i32_0 = arith.constant 0 : i32
    %c0_i32_1 = arith.constant 0 : i32
    return %c0_i32, %c0_i32_0 : i32, i32
  }
  func.func @transform_6(%arg0: i32, %arg1: i32) -> (i32, i32) {
    %c0_i32 = arith.constant 0 : i32
    %c0_i32_0 = arith.constant 0 : i32
    %c0_i32_1 = arith.constant 0 : i32
    return %c0_i32, %c0_i32_0 : i32, i32
  }
  func.func @transform_7(%arg0: i32, %arg1: i32) -> (i32, i32, i32, i32) {
    %c0_i32 = arith.constant 0 : i32
    %c0_i32_0 = arith.constant 0 : i32
    %c0_i32_1 = arith.constant 0 : i32
    return %arg0, %arg1, %c0_i32, %c0_i32_0 : i32, i32, i32, i32
  }
  func.func @transform_8(%arg0: i32, %arg1: i32) -> (i32, i32, i32, i32) {
    %c0_i32 = arith.constant 0 : i32
    %c0_i32_0 = arith.constant 0 : i32
    %c0_i32_1 = arith.constant 0 : i32
    return %arg0, %arg1, %c0_i32, %c0_i32_0 : i32, i32, i32, i32
  }
}

module attributes {stable_mosaic.version = 11 : i64} {
  func.func @_conv_stats_kernel(%arg0: i32, %arg1: i32, %arg2: memref<1x8x16x128xf32, #tpu.memory_space<vmem>>, %arg3: memref<1x1x16x128xf32, #tpu.memory_space<vmem>>, %arg4: memref<1x1x16x128xf32, #tpu.memory_space<vmem>>, %arg5: memref<1152x128xbf16, #tpu.memory_space<vmem>>, %arg6: memref<1x128xf32, #tpu.memory_space<vmem>>, %arg7: memref<1x128xf32, #tpu.memory_space<vmem>>, %arg8: memref<1x128xf32, #tpu.memory_space<vmem>>, %arg9: memref<1x8x16x128xf32, #tpu.memory_space<vmem>>, %arg10: memref<1x1x2x128xf32, #tpu.memory_space<vmem>>) attributes {dimension_semantics = [#tpu.dimension_semantics<parallel>, #tpu.dimension_semantics<parallel>], iteration_bounds = array<i64: 2, 2>, scalar_prefetch = 0 : i64, scratch_operands = 0 : i64, tpu.core_type = #tpu.core_type<tc>, window_params = [{transform_indices = @transform_0, window_bounds = array<i64: 1, 8, 16, 128>}, {transform_indices = @transform_1, window_bounds = array<i64: 1, 1, 16, 128>}, {transform_indices = @transform_2, window_bounds = array<i64: 1, 1, 16, 128>}, {pipeline_mode = #tpu.pipeline_mode<synchronous>, transform_indices = @transform_3, window_bounds = array<i64: 1152, 128>}, {pipeline_mode = #tpu.pipeline_mode<synchronous>, transform_indices = @transform_4, window_bounds = array<i64: 1, 128>}, {pipeline_mode = #tpu.pipeline_mode<synchronous>, transform_indices = @transform_5, window_bounds = array<i64: 1, 128>}, {pipeline_mode = #tpu.pipeline_mode<synchronous>, transform_indices = @transform_6, window_bounds = array<i64: 1, 128>}, {transform_indices = @transform_7, window_bounds = array<i64: 1, 8, 16, 128>}, {transform_indices = @transform_8, window_bounds = array<i64: 1, 1, 2, 128>}]} {
    %c0 = arith.constant 0 : index
    %c0_0 = arith.constant 0 : index
    %c0_1 = arith.constant 0 : index
    %c0_2 = arith.constant 0 : index
    %0 = vector.load %arg3[%c0, %c0_0, %c0_1, %c0_2] : memref<1x1x16x128xf32, #tpu.memory_space<vmem>>, vector<1x1x16x128xf32>
    %1 = vector.shape_cast %0 : vector<1x1x16x128xf32> to vector<1x16x128xf32>
    %c0_3 = arith.constant 0 : index
    %c0_4 = arith.constant 0 : index
    %c0_5 = arith.constant 0 : index
    %c0_6 = arith.constant 0 : index
    %2 = vector.load %arg2[%c0_3, %c0_4, %c0_5, %c0_6] : memref<1x8x16x128xf32, #tpu.memory_space<vmem>>, vector<1x8x16x128xf32>
    %3 = vector.shape_cast %2 : vector<1x8x16x128xf32> to vector<8x16x128xf32>
    %c0_7 = arith.constant 0 : index
    %c0_8 = arith.constant 0 : index
    %c0_9 = arith.constant 0 : index
    %c0_10 = arith.constant 0 : index
    %4 = vector.load %arg4[%c0_7, %c0_8, %c0_9, %c0_10] : memref<1x1x16x128xf32, #tpu.memory_space<vmem>>, vector<1x1x16x128xf32>
    %5 = vector.shape_cast %4 : vector<1x1x16x128xf32> to vector<1x16x128xf32>
    %6 = tpu.concatenate %1, %3, %5 in 0 : vector<1x16x128xf32>, vector<8x16x128xf32>, vector<1x16x128xf32> -> vector<10x16x128xf32>
    %c0_11 = arith.constant 0 : index
    %c0_12 = arith.constant 0 : index
    %7 = vector.load %arg7[%c0_11, %c0_12] : memref<1x128xf32, #tpu.memory_space<vmem>>, vector<1x128xf32>
    %8 = vector.shape_cast %7 : vector<1x128xf32> to vector<1x1x128xf32>
    %9 = vector.broadcast %8 : vector<1x1x128xf32> to vector<10x16x128xf32>
    %10 = arith.mulf %6, %9 : vector<10x16x128xf32>
    %c0_13 = arith.constant 0 : index
    %c0_14 = arith.constant 0 : index
    %11 = vector.load %arg8[%c0_13, %c0_14] : memref<1x128xf32, #tpu.memory_space<vmem>>, vector<1x128xf32>
    %12 = vector.shape_cast %11 : vector<1x128xf32> to vector<1x1x128xf32>
    %13 = vector.broadcast %12 : vector<1x1x128xf32> to vector<10x16x128xf32>
    %14 = arith.addf %10, %13 : vector<10x16x128xf32>
    %cst = arith.constant 0.000000e+00 : f32
    %15 = vector.broadcast %cst : f32 to vector<10x16x128xf32>
    %16 = arith.maximumf %14, %15 : vector<10x16x128xf32>
    %17 = tpu.iota {dimensions = array<i32: 0>} : vector<10x1x1xi32>
    %c8_i32 = arith.constant 8 : i32
    %18 = arith.muli %arg1, %c8_i32 : i32
    %19 = vector.broadcast %18 : i32 to vector<10x1x1xi32>
    %20 = arith.addi %17, %19 : vector<10x1x1xi32>
    %c1_i32 = arith.constant 1 : i32
    %21 = vector.broadcast %c1_i32 : i32 to vector<10x1x1xi32>
    %22 = arith.subi %20, %21 : vector<10x1x1xi32>
    %c0_i32 = arith.constant 0 : i32
    %23 = vector.broadcast %c0_i32 : i32 to vector<10x1x1xi32>
    %24 = arith.cmpi sge, %22, %23 : vector<10x1x1xi32>
    %c16_i32 = arith.constant 16 : i32
    %25 = vector.broadcast %c16_i32 : i32 to vector<10x1x1xi32>
    %26 = arith.cmpi slt, %22, %25 : vector<10x1x1xi32>
    %27 = arith.andi %24, %26 : vector<10x1x1xi1>
    %cst_15 = arith.constant 0.000000e+00 : f32
    %28 = vector.shape_cast %27 : vector<10x1x1xi1> to vector<10x1x1xi1>
    %29 = vector.broadcast %28 : vector<10x1x1xi1> to vector<10x16x128xi1>
    %30 = vector.broadcast %cst_15 : f32 to vector<10x16x128xf32>
    %31 = arith.select %29, %16, %30 : vector<10x16x128xi1>, vector<10x16x128xf32>
    %cst_16 = arith.constant 0.000000e+00 : f32
    %32 = vector.broadcast %cst_16 : f32 to vector<10x1x128xf32>
    %33 = tpu.concatenate %32, %31, %32 in 1 : vector<10x1x128xf32>, vector<10x16x128xf32>, vector<10x1x128xf32> -> vector<10x18x128xf32>
    %34 = vector.extract_strided_slice %33 {offsets = [0, 0, 0], sizes = [8, 16, 128], strides = [1, 1, 1]} : vector<10x18x128xf32> to vector<8x16x128xf32>
    %35 = vector.extract_strided_slice %33 {offsets = [0, 1, 0], sizes = [8, 16, 128], strides = [1, 1, 1]} : vector<10x18x128xf32> to vector<8x16x128xf32>
    %36 = vector.extract_strided_slice %33 {offsets = [0, 2, 0], sizes = [8, 16, 128], strides = [1, 1, 1]} : vector<10x18x128xf32> to vector<8x16x128xf32>
    %37 = vector.extract_strided_slice %33 {offsets = [1, 0, 0], sizes = [8, 16, 128], strides = [1, 1, 1]} : vector<10x18x128xf32> to vector<8x16x128xf32>
    %38 = vector.extract_strided_slice %33 {offsets = [1, 1, 0], sizes = [8, 16, 128], strides = [1, 1, 1]} : vector<10x18x128xf32> to vector<8x16x128xf32>
    %39 = vector.extract_strided_slice %33 {offsets = [1, 2, 0], sizes = [8, 16, 128], strides = [1, 1, 1]} : vector<10x18x128xf32> to vector<8x16x128xf32>
    %40 = vector.extract_strided_slice %33 {offsets = [2, 0, 0], sizes = [8, 16, 128], strides = [1, 1, 1]} : vector<10x18x128xf32> to vector<8x16x128xf32>
    %41 = vector.extract_strided_slice %33 {offsets = [2, 1, 0], sizes = [8, 16, 128], strides = [1, 1, 1]} : vector<10x18x128xf32> to vector<8x16x128xf32>
    %42 = vector.extract_strided_slice %33 {offsets = [2, 2, 0], sizes = [8, 16, 128], strides = [1, 1, 1]} : vector<10x18x128xf32> to vector<8x16x128xf32>
    %43 = tpu.concatenate %34, %35, %36, %37, %38, %39, %40, %41, %42 in 2 : vector<8x16x128xf32>, vector<8x16x128xf32>, vector<8x16x128xf32>, vector<8x16x128xf32>, vector<8x16x128xf32>, vector<8x16x128xf32>, vector<8x16x128xf32>, vector<8x16x128xf32>, vector<8x16x128xf32> -> vector<8x16x1152xf32>
    %44 = vector.shape_cast %43 : vector<8x16x1152xf32> to vector<128x1152xf32>
    %45 = arith.truncf %44 : vector<128x1152xf32> to vector<128x1152xbf16>
    %c0_17 = arith.constant 0 : index
    %c0_18 = arith.constant 0 : index
    %46 = vector.load %arg5[%c0_17, %c0_18] : memref<1152x128xbf16, #tpu.memory_space<vmem>>, vector<1152x128xbf16>
    %cst_19 = arith.constant dense<0.000000e+00> : vector<128x128xf32>
    %47 = tpu.matmul %45, %46, %cst_19 {dimension_numbers = #tpu.dot_dimension_numbers<[1], [0], [0], [1], [0, 0, 1, 1], [], []>} : vector<128x1152xbf16>, vector<1152x128xbf16>, vector<128x128xf32> -> vector<128x128xf32>
    %c0_20 = arith.constant 0 : index
    %c0_21 = arith.constant 0 : index
    %48 = vector.load %arg6[%c0_20, %c0_21] : memref<1x128xf32, #tpu.memory_space<vmem>>, vector<1x128xf32>
    %49 = vector.broadcast %48 : vector<1x128xf32> to vector<128x128xf32>
    %50 = arith.addf %47, %49 : vector<128x128xf32>
    %51 = vector.shape_cast %50 : vector<128x128xf32> to vector<1x8x16x128xf32>
    %c0_22 = arith.constant 0 : index
    %c0_23 = arith.constant 0 : index
    %c0_24 = arith.constant 0 : index
    %c0_25 = arith.constant 0 : index
    %52 = vector.load %arg9[%c0_22, %c0_23, %c0_24, %c0_25] : memref<1x8x16x128xf32, #tpu.memory_space<vmem>>, vector<1x8x16x128xf32>
    tpu.vector_store %arg9[%c0_22, %c0_23, %c0_24, %c0_25], %51 {strides = array<i32>} : memref<1x8x16x128xf32, #tpu.memory_space<vmem>>, vector<1x8x16x128xf32>,
    %cst_26 = arith.constant dense<0.000000e+00> : vector<128xf32>
    %53 = vector.multi_reduction <add>, %50, %cst_26 [0] : vector<128x128xf32> to vector<128xf32>
    %54 = vector.shape_cast %53 : vector<128xf32> to vector<1x128xf32>
    %cst_27 = arith.constant 1.280000e+02 : f32
    %55 = vector.broadcast %cst_27 : f32 to vector<1x128xf32>
    %56 = arith.divf %54, %55 : vector<1x128xf32>
    %57 = vector.broadcast %56 : vector<1x128xf32> to vector<128x128xf32>
    %58 = arith.subf %50, %57 : vector<128x128xf32>
    %59 = arith.mulf %58, %58 : vector<128x128xf32>
    %cst_28 = arith.constant dense<0.000000e+00> : vector<128xf32>
    %60 = vector.multi_reduction <add>, %59, %cst_28 [0] : vector<128x128xf32> to vector<128xf32>
    %61 = vector.shape_cast %60 : vector<128xf32> to vector<1x128xf32>
    %62 = tpu.concatenate %54, %61 in 0 : vector<1x128xf32>, vector<1x128xf32> -> vector<2x128xf32>
    %63 = vector.shape_cast %62 : vector<2x128xf32> to vector<1x1x2x128xf32>
    %c0_29 = arith.constant 0 : index
    %c0_30 = arith.constant 0 : index
    %c0_31 = arith.constant 0 : index
    %c0_32 = arith.constant 0 : index
    %64 = vector.load %arg10[%c0_29, %c0_30, %c0_31, %c0_32] : memref<1x1x2x128xf32, #tpu.memory_space<vmem>>, vector<1x1x2x128xf32>
    tpu.vector_store %arg10[%c0_29, %c0_30, %c0_31, %c0_32], %63 {strides = array<i32>} : memref<1x1x2x128xf32, #tpu.memory_space<vmem>>, vector<1x1x2x128xf32>,
    return
  }
  func.func @transform_0(%arg0: i32, %arg1: i32) -> (i32, i32, i32, i32) {
    %c0_i32 = arith.constant 0 : i32
    %c0_i32_0 = arith.constant 0 : i32
    %c0_i32_1 = arith.constant 0 : i32
    return %arg0, %arg1, %c0_i32, %c0_i32_0 : i32, i32, i32, i32
  }
  func.func @transform_1(%arg0: i32, %arg1: i32) -> (i32, i32, i32, i32) {
    %c8_i32 = arith.constant 8 : i32
    %0 = arith.muli %arg1, %c8_i32 : i32
    %c1_i32 = arith.constant 1 : i32
    %1 = arith.subi %0, %c1_i32 : i32
    %c0_i32 = arith.constant 0 : i32
    %2 = arith.maxsi %1, %c0_i32 : i32
    %c0_i32_0 = arith.constant 0 : i32
    %c0_i32_1 = arith.constant 0 : i32
    %c0_i32_2 = arith.constant 0 : i32
    return %arg0, %2, %c0_i32_0, %c0_i32_1 : i32, i32, i32, i32
  }
  func.func @transform_2(%arg0: i32, %arg1: i32) -> (i32, i32, i32, i32) {
    %c1_i32 = arith.constant 1 : i32
    %0 = arith.addi %arg1, %c1_i32 : i32
    %c8_i32 = arith.constant 8 : i32
    %1 = arith.muli %0, %c8_i32 : i32
    %c15_i32 = arith.constant 15 : i32
    %2 = arith.minsi %1, %c15_i32 : i32
    %c0_i32 = arith.constant 0 : i32
    %c0_i32_0 = arith.constant 0 : i32
    %c0_i32_1 = arith.constant 0 : i32
    return %arg0, %2, %c0_i32, %c0_i32_0 : i32, i32, i32, i32
  }
  func.func @transform_3(%arg0: i32, %arg1: i32) -> (i32, i32) {
    %c0_i32 = arith.constant 0 : i32
    %c0_i32_0 = arith.constant 0 : i32
    %c0_i32_1 = arith.constant 0 : i32
    return %c0_i32, %c0_i32_0 : i32, i32
  }
  func.func @transform_4(%arg0: i32, %arg1: i32) -> (i32, i32) {
    %c0_i32 = arith.constant 0 : i32
    %c0_i32_0 = arith.constant 0 : i32
    %c0_i32_1 = arith.constant 0 : i32
    return %c0_i32, %c0_i32_0 : i32, i32
  }
  func.func @transform_5(%arg0: i32, %arg1: i32) -> (i32, i32) {
    %c0_i32 = arith.constant 0 : i32
    %c0_i32_0 = arith.constant 0 : i32
    %c0_i32_1 = arith.constant 0 : i32
    return %c0_i32, %c0_i32_0 : i32, i32
  }
  func.func @transform_6(%arg0: i32, %arg1: i32) -> (i32, i32) {
    %c0_i32 = arith.constant 0 : i32
    %c0_i32_0 = arith.constant 0 : i32
    %c0_i32_1 = arith.constant 0 : i32
    return %c0_i32, %c0_i32_0 : i32, i32
  }
  func.func @transform_7(%arg0: i32, %arg1: i32) -> (i32, i32, i32, i32) {
    %c0_i32 = arith.constant 0 : i32
    %c0_i32_0 = arith.constant 0 : i32
    %c0_i32_1 = arith.constant 0 : i32
    return %arg0, %arg1, %c0_i32, %c0_i32_0 : i32, i32, i32, i32
  }
  func.func @transform_8(%arg0: i32, %arg1: i32) -> (i32, i32, i32, i32) {
    %c0_i32 = arith.constant 0 : i32
    %c0_i32_0 = arith.constant 0 : i32
    %c0_i32_1 = arith.constant 0 : i32
    return %arg0, %arg1, %c0_i32, %c0_i32_0 : i32, i32, i32, i32
  }
}

module attributes {stable_mosaic.version = 11 : i64} {
  func.func @_bn_relu_kernel(%arg0: i32, %arg1: i32, %arg2: memref<1x8x16x128xf32, #tpu.memory_space<vmem>>, %arg3: memref<1x128xf32, #tpu.memory_space<vmem>>, %arg4: memref<1x128xf32, #tpu.memory_space<vmem>>, %arg5: memref<1x8x16x128xf32, #tpu.memory_space<vmem>>) attributes {dimension_semantics = [#tpu.dimension_semantics<parallel>, #tpu.dimension_semantics<parallel>], iteration_bounds = array<i64: 2, 2>, scalar_prefetch = 0 : i64, scratch_operands = 0 : i64, tpu.core_type = #tpu.core_type<tc>, window_params = [{transform_indices = @transform_0, window_bounds = array<i64: 1, 8, 16, 128>}, {pipeline_mode = #tpu.pipeline_mode<synchronous>, transform_indices = @transform_1, window_bounds = array<i64: 1, 128>}, {pipeline_mode = #tpu.pipeline_mode<synchronous>, transform_indices = @transform_2, window_bounds = array<i64: 1, 128>}, {transform_indices = @transform_3, window_bounds = array<i64: 1, 8, 16, 128>}]} {
    %c0 = arith.constant 0 : index
    %c0_0 = arith.constant 0 : index
    %0 = vector.load %arg3[%c0, %c0_0] : memref<1x128xf32, #tpu.memory_space<vmem>>, vector<1x128xf32>
    %1 = vector.shape_cast %0 : vector<1x128xf32> to vector<1x1x1x128xf32>
    %c0_1 = arith.constant 0 : index
    %c0_2 = arith.constant 0 : index
    %2 = vector.load %arg4[%c0_1, %c0_2] : memref<1x128xf32, #tpu.memory_space<vmem>>, vector<1x128xf32>
    %3 = vector.shape_cast %2 : vector<1x128xf32> to vector<1x1x1x128xf32>
    %c0_3 = arith.constant 0 : index
    %c0_4 = arith.constant 0 : index
    %c0_5 = arith.constant 0 : index
    %c0_6 = arith.constant 0 : index
    %4 = vector.load %arg2[%c0_3, %c0_4, %c0_5, %c0_6] : memref<1x8x16x128xf32, #tpu.memory_space<vmem>>, vector<1x8x16x128xf32>
    %5 = vector.broadcast %1 : vector<1x1x1x128xf32> to vector<1x8x16x128xf32>
    %6 = arith.mulf %4, %5 : vector<1x8x16x128xf32>
    %7 = vector.broadcast %3 : vector<1x1x1x128xf32> to vector<1x8x16x128xf32>
    %8 = arith.addf %6, %7 : vector<1x8x16x128xf32>
    %cst = arith.constant 0.000000e+00 : f32
    %9 = vector.broadcast %cst : f32 to vector<1x8x16x128xf32>
    %10 = arith.maximumf %8, %9 : vector<1x8x16x128xf32>
    %c0_7 = arith.constant 0 : index
    %c0_8 = arith.constant 0 : index
    %c0_9 = arith.constant 0 : index
    %c0_10 = arith.constant 0 : index
    %11 = vector.load %arg5[%c0_7, %c0_8, %c0_9, %c0_10] : memref<1x8x16x128xf32, #tpu.memory_space<vmem>>, vector<1x8x16x128xf32>
    tpu.vector_store %arg5[%c0_7, %c0_8, %c0_9, %c0_10], %10 {strides = array<i32>} : memref<1x8x16x128xf32, #tpu.memory_space<vmem>>, vector<1x8x16x128xf32>,
    return
  }
  func.func @transform_0(%arg0: i32, %arg1: i32) -> (i32, i32, i32, i32) {
    %c0_i32 = arith.constant 0 : i32
    %c0_i32_0 = arith.constant 0 : i32
    %c0_i32_1 = arith.constant 0 : i32
    return %arg0, %arg1, %c0_i32, %c0_i32_0 : i32, i32, i32, i32
  }
  func.func @transform_1(%arg0: i32, %arg1: i32) -> (i32, i32) {
    %c0_i32 = arith.constant 0 : i32
    %c0_i32_0 = arith.constant 0 : i32
    %c0_i32_1 = arith.constant 0 : i32
    return %c0_i32, %c0_i32_0 : i32, i32
  }
  func.func @transform_2(%arg0: i32, %arg1: i32) -> (i32, i32) {
    %c0_i32 = arith.constant 0 : i32
    %c0_i32_0 = arith.constant 0 : i32
    %c0_i32_1 = arith.constant 0 : i32
    return %c0_i32, %c0_i32_0 : i32, i32
  }
  func.func @transform_3(%arg0: i32, %arg1: i32) -> (i32, i32, i32, i32) {
    %c0_i32 = arith.constant 0 : i32
    %c0_i32_0 = arith.constant 0 : i32
    %c0_i32_1 = arith.constant 0 : i32
    return %arg0, %arg1, %c0_i32, %c0_i32_0 : i32, i32, i32, i32
  }
}

</mosaic_0001>

<bundles_post_ra>
// kernel: inconv_forward.5
= control target key start
LH: loop header
LB: loop body
LE: loop exit
PB: predicated region body
PF: predicated region fallthrough
CT: control target
= control target key end

     0   :  { %s525_s12 = smov 0   ;;  %s527_s13 = smov 0   ;;  %s654_s0 = inlined_call_operand.vmem [shape: f32[2,16,16,128], index: 0, kind: input, shape index: {}]   ;;  %s655_s1 = inlined_call_operand.vmem [shape: f32[1,128], index: 1, kind: input, shape index: {}]   ;;  %s656_s2 = inlined_call_operand.vmem [shape: f32[1,128], index: 2, kind: input, shape index: {}]   ;;  %s657_s3 = inlined_call_operand.vmem [shape: f32[2,16,16,128], index: 3, kind: output, shape index: {}]  }
   0x1   :  { %s529_s14 = smov 0   ;;  %s531_s15 = smov 0  }
   0x2   :  { %s533_s16 = smov 0  }
   0x3 LB: > { %s22_s17 = sadd.s32 1, %s495_s14  ;;  %s25_s18 = sadd.s32 1, %s499_s15  ;;  %s503_s16 = sphi %s533_s16, %s13_s16   ;;  %s499_s15 = sphi %s531_s15, %s661_s15   ;;  %s495_s14 = sphi %s529_s14, %s660_s14   ;;  %s491_s13 = sphi %s527_s13, %s659_s13   ;;  %s487_s12 = sphi %s525_s12, %s658_s12  }
   0x4   : > { %p23_p0 = scmp.ge.s32.totalorder %s22_s17, 2  ;;  %p412_p1 = scmp.ge.s32.totalorder %s503_s16, 1 }
   0x5   : > { %p159_p2 = scmp.lt.s32.totalorder %s503_s16, 5 }
   0x6   : > { %s663_s17 = smov (%p23_p0, %s22_s17), 0  ;;  %s665_s18 = smov (!%p23_p0, %s25_s18), %s499_s15 }
   0x7   : > { %p160_p3 = pnand %p412_p1, %p159_p2  ;;  %p27_p4 = scmp.ge.s32.totalorder %s665_s18, 2 }
   0x8   : > { %s413_s19 = sshll.u32 (!%p160_p3), %s487_s12, 3  ;;  %p194_p5 = scmp.lt.s32.totalorder (!%p160_p3), %s491_s13, 1 }
   0x9   : > { %s667_s18 = smov (%p27_p4, %s665_s18), 0  ;;  %163 = sbr.rel (%p160_p3) target bundleno = 37 (0x25), region = 32 }
   0xa   : > { %p196_p6 = scmp.lt.s32.totalorder (!%p160_p3), %s413_s19, 15 }
   0xe   : > { %s669_s13 = smov (!%p194_p5, %s491_s13), 1  ;;  %s671_s19 = smov (!%p196_p6, %s413_s19), 15  ;;  %v558_v0 = vld [vmem:[%s655_s1] ss:$0 sm:$0xff] }
   0xf   : > { %s415_s20 = sshll.u32 %s669_s13, 5  ;;  %s414_s21 = sshll.u32 %s671_s19, 1  ;;  %v568_v1 = vld [vmem:[%s656_s2] ss:$0 sm:$0xff] }
  0x10   : > { %s200_s22 = sadd.s32 %s415_s20, %s414_s21 }
  0x11   : > { %s416_s23 = sshll.u32 %s200_s22, 3 }
  0x12   : > { %s563_s28 = scalar_lea.vmem %s654_s0, %s416_s23  ;;  %s591_s6 = scalar_lea.vmem %s657_s3, %s416_s23 }
  0x13   : > { %v217_v2 = vld [vmem:[%s563_s28] sm:$0xff]  ;;  %v218_v3 = vld [vmem:[%s563_s28 + $0x8] sm:$0xff]  ;;  %v219_v4 = vld [vmem:[%s563_s28 + $0x10] sm:$0xff] }
  0x14   : > { %v239_v5 = vmul.f32 %v558_v0, %v217_v2  ;;  %v240_v6 = vmul.f32 %v558_v0, %v218_v3  ;;  %v241_v7 = vmul.f32 %v558_v0, %v219_v4  ;;  %v220_v8 = vld [vmem:[%s563_s28 + $0x18] sm:$0xff]  ;;  %v221_v9 = vld [vmem:[%s563_s28 + $0x20] sm:$0xff]  ;;  %v222_v10 = vld [vmem:[%s563_s28 + $0x28] sm:$0xff] }
  0x15   : > { %v242_v11 = vmul.f32 %v558_v0, %v220_v8  ;;  %v243_v12 = vmul.f32 %v558_v0, %v221_v9  ;;  %v244_v13 = vmul.f32 %v558_v0, %v222_v10  ;;  %v223_v14 = vld [vmem:[%s563_s28 + $0x30] sm:$0xff]  ;;  %v224_v15 = vld [vmem:[%s563_s28 + $0x38] sm:$0xff]  ;;  %v225_v24 = vld [vmem:[%s563_s28 + $0x40] sm:$0xff] }
  0x16   : > { %v261_v16 = vadd.f32 %v568_v1, %v239_v5  ;;  %v262_v17 = vadd.f32 %v568_v1, %v240_v6  ;;  %v263_v18 = vadd.f32 %v568_v1, %v241_v7  ;;  %v245_v19 = vmul.f32 %v558_v0, %v223_v14  ;;  %v226_v25 = vld [vmem:[%s563_s28 + $0x48] sm:$0xff]  ;;  %v227_v26 = vld [vmem:[%s563_s28 + $0x50] sm:$0xff]  ;;  %v228_v31 = vld [vmem:[%s563_s28 + $0x58] sm:$0xff] }
  0x17   : > { %v264_v20 = vadd.f32 %v568_v1, %v242_v11  ;;  %v265_v21 = vadd.f32 %v568_v1, %v243_v12  ;;  %v266_v22 = vadd.f32 %v568_v1, %v244_v13  ;;  %v246_v23 = vmul.f32 %v558_v0, %v224_v15  ;;  %v229_v32 = vld [vmem:[%s563_s28 + $0x60] sm:$0xff]  ;;  %v230_v33 = vld [vmem:[%s563_s28 + $0x68] sm:$0xff]  ;;  %v231_v38 = vld [vmem:[%s563_s28 + $0x70] sm:$0xff] }
  0x18   : > { %v277_v27 = vmax.f32 %v261_v16, 0.0  ;;  %v278_v28 = vmax.f32 %v262_v17, 0.0  ;;  %v279_v29 = vmax.f32 %v263_v18, 0.0  ;;  %v267_v30 = vadd.f32 %v568_v1, %v245_v19  ;;  %v232_v43 = vld [vmem:[%s563_s28 + $0x78] sm:$0xff] }
  0x19   : > { %v280_v34 = vmax.f32 %v264_v20, 0.0  ;;  %v281_v35 = vmax.f32 %v265_v21, 0.0  ;;  %v282_v36 = vmax.f32 %v266_v22, 0.0  ;;  %v268_v37 = vadd.f32 %v568_v1, %v246_v23 }
  0x1a   : > { %293 = vst [vmem:[%s591_s6] sm:$0xff] %v277_v27  ;;  %294 = vst [vmem:[%s591_s6 + $0x8] sm:$0xff] %v278_v28  ;;  %v283_v39 = vmax.f32 %v267_v30, 0.0  ;;  %v247_v40 = vmul.f32 %v558_v0, %v225_v24  ;;  %v248_v41 = vmul.f32 %v558_v0, %v226_v25  ;;  %v249_v42 = vmul.f32 %v558_v0, %v227_v26 }
  0x1b   : > { %295 = vst [vmem:[%s591_s6 + $0x10] sm:$0xff] %v279_v29  ;;  %296 = vst [vmem:[%s591_s6 + $0x18] sm:$0xff] %v280_v34  ;;  %v284_v44 = vmax.f32 %v268_v37, 0.0  ;;  %v250_v45 = vmul.f32 %v558_v0, %v228_v31  ;;  %v251_v46 = vmul.f32 %v558_v0, %v229_v32  ;;  %v252_v47 = vmul.f32 %v558_v0, %v230_v33 }
  0x1c   : > { %297 = vst [vmem:[%s591_s6 + $0x20] sm:$0xff] %v281_v35  ;;  %298 = vst [vmem:[%s591_s6 + $0x28] sm:$0xff] %v282_v36  ;;  %v269_v48 = vadd.f32 %v568_v1, %v247_v40  ;;  %v270_v49 = vadd.f32 %v568_v1, %v248_v41  ;;  %v271_v50 = vadd.f32 %v568_v1, %v249_v42 }
  0x1d   : > { %299 = vst [vmem:[%s591_s6 + $0x30] sm:$0xff] %v283_v39  ;;  %v253_v51 = vmul.f32 %v558_v0, %v231_v38  ;;  %300 = vst [vmem:[%s591_s6 + $0x38] sm:$0xff] %v284_v44  ;;  %v272_v52 = vadd.f32 %v568_v1, %v250_v45  ;;  %v273_v53 = vadd.f32 %v568_v1, %v251_v46 }
  0x1e   : > { %v274_v54 = vadd.f32 %v568_v1, %v252_v47  ;;  %v254_v55 = vmul.f32 %v558_v0, %v232_v43  ;;  %v285_v56 = vmax.f32 %v269_v48, 0.0  ;;  %v286_v57 = vmax.f32 %v270_v49, 0.0 }
  0x1f   : > { %v287_v58 = vmax.f32 %v271_v50, 0.0  ;;  %v275_v59 = vadd.f32 %v568_v1, %v253_v51  ;;  %v288_v60 = vmax.f32 %v272_v52, 0.0  ;;  %v289_v61 = vmax.f32 %v273_v53, 0.0 }
  0x20   : > { %v290_v62 = vmax.f32 %v274_v54, 0.0  ;;  %v276_v63 = vadd.f32 %v568_v1, %v254_v55  ;;  %301 = vst [vmem:[%s591_s6 + $0x40] sm:$0xff] %v285_v56  ;;  %302 = vst [vmem:[%s591_s6 + $0x48] sm:$0xff] %v286_v57 }
  0x21   : > { %303 = vst [vmem:[%s591_s6 + $0x50] sm:$0xff] %v287_v58  ;;  %v291_v2 = vmax.f32 %v275_v59, 0.0  ;;  %304 = vst [vmem:[%s591_s6 + $0x58] sm:$0xff] %v288_v60 }
  0x22   : > { %305 = vst [vmem:[%s591_s6 + $0x60] sm:$0xff] %v289_v61  ;;  %306 = vst [vmem:[%s591_s6 + $0x68] sm:$0xff] %v290_v62  ;;  %v292_v0 = vmax.f32 %v276_v63, 0.0 }
  0x23   : > { %307 = vst [vmem:[%s591_s6 + $0x70] sm:$0xff] %v291_v2 }
  0x24   : > { %308 = vst [vmem:[%s591_s6 + $0x78] sm:$0xff] %v292_v0 }
  0x25 PF: > { %s13_s16 = sadd.s32 1, %s503_s16   ;;  %s658_s12 = smov %s495_s14 }
  0x26   : > { %p10_p7 = scmp.ge.s32.totalorder %s13_s16, 6   ;;  %s659_s13 = smov %s499_s15 }
  0x27   : > { %s660_s14 = smov %s663_s17  ;;  %s661_s15 = smov %s667_s18 }
  0x28   :  { %12 = sbr.rel (!%p10_p7) target bundleno = 3 (0x3), region = 62 }

// kernel: inconv_forward.3
= control target key start
LH: loop header
LB: loop body
LE: loop exit
PB: predicated region body
PF: predicated region fallthrough
CT: control target
= control target key end

     0   :  { %s2994_s27 = smov 0   ;;  %s2996_s28 = smov 0   ;;  %s3915_s0 = inlined_call_operand.vmem [shape: f32[2,16,16,128], index: 0, kind: input, shape index: {}, may-alias: {0,1,2}]   ;;  %s3916_s1 = inlined_call_operand.vmem [shape: f32[2,16,16,128], index: 1, kind: input, shape index: {}, may-alias: {0,1,2}]   ;;  %s3917_s2 = inlined_call_operand.vmem [shape: f32[2,16,16,128], index: 2, kind: input, shape index: {}, may-alias: {0,1,2}]   ;;  %s3918_s3 = inlined_call_operand.vmem [shape: bf16[1152,128], index: 3, kind: input, shape index: {}]   ;;  %s3919_s4 = inlined_call_operand.vmem [shape: f32[1,128], index: 4, kind: input, shape index: {}]   ;;  %s3920_s5 = inlined_call_operand.vmem [shape: f32[1,128], index: 5, kind: input, shape index: {}, may-alias: {5,6}]   ;;  %s3921_s6 = inlined_call_operand.vmem [shape: f32[1,128], index: 6, kind: input, shape index: {}, may-alias: {5,6}]   ;;  %s3922_s7 = inlined_call_operand.vmem [shape: f32[2,16,16,128], index: 7, kind: output, shape index: {0}]   ;;  %s3923_s8 = inlined_call_operand.vmem [shape: f32[2,2,2,128], index: 8, kind: output, shape index: {1}]  }
   0x1   :  { %s2998_s29 = smov 0   ;;  %s3000_s30 = smov 0  }
   0x2   :  { %s3002_s9 = smov 0  }
   0x3 LB: > { %s28_s5 = sadd.s32 1, %s2938_s29  ;;  %s31_s6 = sadd.s32 1, %s2942_s30  ;;  %s2946_s9 = sphi %s3002_s9, %s19_s9   ;;  %s2942_s30 = sphi %s3000_s30, %s3978_s30   ;;  %s2938_s29 = sphi %s2998_s29, %s3977_s29   ;;  %s2934_s28 = sphi %s2996_s28, %s3976_s28   ;;  %s2930_s27 = sphi %s2994_s27, %s3975_s27  }
   0x4   : > { %p29_p0 = scmp.ge.s32.totalorder %s28_s5, 2  ;;  %p2258_p1 = scmp.ge.s32.totalorder %s2946_s9, 1 }
   0x5   : > { %p353_p2 = scmp.lt.s32.totalorder %s2946_s9, 5 }
   0x6   : > { %s3980_s5 = smov (%p29_p0, %s28_s5), 0  ;;  %s3982_s6 = smov (!%p29_p0, %s31_s6), %s2942_s30 }
   0x7   : > { %p354_p3 = pnand %p2258_p1, %p353_p2  ;;  %p33_p4 = scmp.ge.s32.totalorder %s3982_s6, 2 }
   0x9   : > { %s3984_s6 = smov (%p33_p4, %s3982_s6), 0  ;;  %357 = sbr.rel (%p354_p3) target bundleno = 471 (0x1d7), region = 48 }
   0xe   : > { %v2836_v0 = vld [vmem:[%s3918_s3 + $0x78] sm:$0xff]   ;;  %s3041_s18 = sshll.u32 %s2930_s27, 3  ;;  %v2840_v4 = vld [vmem:[%s3918_s3 + $0x70] sm:$0xff]   ;;  %p432_p5 = scmp.lt.s32.totalorder %s2934_s28, 1  ;;  %v2844_v8 = vld [vmem:[%s3918_s3 + $0x68] sm:$0xff]   ;;  %vm625_vm2 = vcmask 1040384  }
   0xf   : > { %v2837_v1 = vld [vmem:[%s3918_s3 + $0xf8] sm:$0xff]   ;;  %2475 = vmatprep.subr.bf16.mxu0 %v2836_v0  ;;  %v2841_v5 = vld [vmem:[%s3918_s3 + $0xf0] sm:$0xff]   ;;  %p434_p6 = scmp.lt.s32.totalorder %s3041_s18, 15  ;;  %s2264_s10 = sadd.s32 4294967295, %s3041_s18  ;;  %v2845_v9 = vld [vmem:[%s3918_s3 + $0xe8] sm:$0xff]   ;;  %v3098_v18 = vstv %s3041_s18  ;;  %vm722_vm5 = vcmask 1046528  }
  0x10   : > { %v2838_v2 = vld [vmem:[%s3918_s3 + $0x38] sm:$0xff]   ;;  %2539 = vmatprep.subr.bf16.mxu1 %v2837_v1  ;;  %v2842_v6 = vld [vmem:[%s3918_s3 + $0x30] sm:$0xff]   ;;  %s3986_s28 = smov (!%p432_p5, %s2934_s28), 1  ;;  %p444_p7 = scmp.gt.s32.totalorder %s2264_s10, 0  ;;  %v2846_v10 = vld [vmem:[%s3918_s3 + $0x28] sm:$0xff]   ;;  %v2287_v22 = vadd.s32 4294967295, %v3098_v18 }
  0x11   : > { %v2839_v3 = vld [vmem:[%s3918_s3 + $0xb8] sm:$0xff]   ;;  %2476 = vmatpush3.bf16.msra.mxu0 %v2838_v2  ;;  %v2843_v7 = vld [vmem:[%s3918_s3 + $0xb0] sm:$0xff]   ;;  %p2265_p8 = scmp.lt.s32.totalorder %s2264_s10, 15  ;;  %v2847_v11 = vld [vmem:[%s3918_s3 + $0xa8] sm:$0xff]   ;;  %s3089_s13 = sshll.u32 %s3986_s28, 5  ;;  %vm536_vm3 = vcmp.ge.s32.totalorder %v3098_v18, 0 }
  0x12   : > { %2540 = vmatpush3.bf16.msra.mxu1 %v2839_v3  ;;  %2477 = vmatprep.subr.bf16.mxu0 %v2840_v4  ;;  %s3988_s10 = smov (!%p444_p7, %s2264_s10), 0  ;;  %v2848_v12 = vld [vmem:[%s3918_s3 + $0x60] sm:$0xff]   ;;  %v2852_v16 = vld [vmem:[%s3918_s3 + $0x58] sm:$0xff]   ;;  %v2856_v21 = vld [vmem:[%s3918_s3 + $0x50] sm:$0xff]   ;;  %vm535_vm0 = vcmp.ge.s32.totalorder %v2287_v22, 0  ;;  %vm545_vm1 = vcmp.lt.s32.totalorder %v2287_v22, 16 }
  0x13   : > { %2541 = vmatprep.subr.bf16.mxu1 %v2841_v5  ;;  %s435_s22 = scalar_select %p434_p6, %s3041_s18, 15  ;;  %v2849_v13 = vld [vmem:[%s3918_s3 + $0xe0] sm:$0xff]   ;;  %v2853_v17 = vld [vmem:[%s3918_s3 + $0xd8] sm:$0xff]   ;;  %v2857_v23 = vld [vmem:[%s3918_s3 + $0xd0] sm:$0xff]   ;;  %vm546_vm4 = vcmp.lt.s32.totalorder %v3098_v18, 16  ;;  %v518_v31 = vadd.s32 2, %v3098_v18 }
  0x14   : > { %s3990_s10 = smov (!%p2265_p8, %s3988_s10), 15  ;;  %v2850_v14 = vld [vmem:[%s3918_s3 + $0x20] sm:$0xff]   ;;  %v2854_v19 = vld [vmem:[%s3918_s3 + $0x18] sm:$0xff]   ;;  %v2858_v24 = vld [vmem:[%s3918_s3 + $0x10] sm:$0xff]   ;;  %v519_v33 = vadd.s32 3, %v3098_v18  ;;  %vm779_vm6 = vcmask 1045504  }
  0x15   : > { %2478 = vmatpush3.bf16.msra.mxu0 %v2842_v6  ;;  %v2851_v15 = vld [vmem:[%s3918_s3 + $0xa0] sm:$0xff]   ;;  %s2260_s16 = sshll.u32 %s435_s22, 1  ;;  %s2270_s20 = sshll.u32 %s3990_s10, 1  ;;  %v2855_v20 = vld [vmem:[%s3918_s3 + $0x98] sm:$0xff]   ;;  %v2859_v25 = vld [vmem:[%s3918_s3 + $0x90] sm:$0xff]   ;;  %v2288_v35 = vadd.s32 4294967295, %v518_v31 }
  0x16   : > { %2542 = vmatpush3.bf16.msra.mxu1 %v2843_v7  ;;  %2479 = vmatprep.subr.bf16.mxu0 %v2844_v8  ;;  %s3107_s26 = sadd.s32 %s3089_s13, %s2260_s16  ;;  %s3113_s10 = sadd.s32 %s2270_s20, %s3089_s13  ;;  %v2860_v26 = vld [vmem:[%s3918_s3 + $0x48] sm:$0xff]   ;;  %v2864_v30 = vld [vmem:[%s3918_s3 + $0x40] sm:$0xff]   ;;  %v3165_v37 = vadd.s32 4294967295, %v519_v33  ;;  %vm555_vm7 = vmand %vm535_vm0, %vm545_vm1  ;;  %v520_v40 = vadd.s32 4, %v3098_v18  ;;  %v3171_v41 = vadd.s32 5, %v3098_v18  ;;  %vm2948_vm15 = vmmov 1  }
  0x17   : > { %2543 = vmatprep.subr.bf16.mxu1 %v2845_v9  ;;  %s2262_s17 = sshll.u32 %s3107_s26, 3  ;;  %s2272_s20 = sshll.u32 %s3113_s10, 3  ;;  %v2861_v27 = vld [vmem:[%s3918_s3 + $0xc8] sm:$0xff]   ;;  %v2865_v32 = vld [vmem:[%s3918_s3 + $0xc0] sm:$0xff]   ;;  %vm537_vm8 = vcmp.ge.s32.totalorder %v2288_v35, 0  ;;  %vm547_vm9 = vcmp.lt.s32.totalorder %v2288_v35, 16  ;;  %vm556_vm10 = vmand %vm536_vm3, %vm546_vm4 }
  0x18   : > { %v2862_v28 = vld [vmem:[%s3918_s3 + $0x8] sm:$0xff]   ;;  %s454_s25 = scalar_lea.vmem %s3916_s1, %s2272_s20  ;;  %v2866_v34 = vld [vmem:[%s3918_s3] sm:$0xff]   ;;  %s3160_s14 = scalar_lea.vmem %s3915_s0, %s2262_s17  ;;  %vm538_vm11 = vcmp.ge.s32.totalorder %v3165_v37, 0  ;;  %vm548_vm12 = vcmp.lt.s32.totalorder %v3165_v37, 16  ;;  %v2868_v52 = vld [vmem:[%s3918_s3 + $0x178] sm:$0xff]   ;;  %v3184_v53 = vadd.s32 4294967295, %v520_v40 }
  0x19   : > { %2480 = vmatpush3.bf16.msra.mxu0 %v2846_v10  ;;  %v2863_v29 = vld [vmem:[%s3918_s3 + $0x88] sm:$0xff]   ;;  %v2867_v36 = vld [vmem:[%s3918_s3 + $0x80] sm:$0xff]   ;;  %vm3190_vm13 = vmneg %vm625_vm2  ;;  %s2474_s22 = sadd.s32 8, %s3041_s18  ;;  %s3811_s21 = scalar_lea.vmem %s3922_s7, %s2262_s17 }
  0x1a   : > { %2544 = vmatpush3.bf16.msra.mxu1 %v2847_v11  ;;  %2481 = vmatprep.subr.bf16.mxu0 %v2848_v12  ;;  %v496_v38 = vld [vmem:[%s454_s25] sm:$0xff]  ;;  %v497_v39 = vld [vmem:[%s454_s25 + $0x8] sm:$0xff]  ;;  %vm3196_vm14 = vmand %vm537_vm8, %vm547_vm9  ;;  %vm539_vm3 = vcmp.ge.s32.totalorder %v3184_v53, 0  ;;  %vm549_vm4 = vcmp.lt.s32.totalorder %v3184_v53, 16  ;;  %p3460_p9 = scmp.lt.s32.totalorder %s2474_s22, 15  ;;  %p489_p10 = scmp.lt.s32.totalorder %s2930_s27, 1 }
  0x1b   : > { %2545 = vmatprep.subr.bf16.mxu1 %v2849_v13  ;;  %v585_v42 = vsel %vm555_vm7, %v496_v38, 0.0  ;;  %v586_v43 = vsel %vm555_vm7, %v497_v39, 0.0  ;;  %v498_v44 = vld [vmem:[%s3160_s14] sm:$0xff]  ;;  %v499_v45 = vld [vmem:[%s3160_s14 + $0x8] sm:$0xff]  ;;  %v500_v3 = vld [vmem:[%s3160_s14 + $0x10] sm:$0xff]  ;;  %s2284_s26 = sshll.u32 %s3986_s28, 1 }
  0x1c   : > { %v626_v46 = vrot.slane %v585_v42, 7  ;;  %v627_v47 = vrot.slane %v586_v43, 7  ;;  %v587_v48 = vsel %vm556_vm10, %v498_v44, 0.0  ;;  %v588_v49 = vsel %vm556_vm10, %v499_v45, 0.0  ;;  %v501_v4 = vld [vmem:[%s3160_s14 + $0x18] sm:$0xff]  ;;  %vm3208_vm0 = vmpackc.low %vm2948_vm15, %vm3190_vm13  ;;  %v2872_v43 = vld [vmem:[%s3918_s3 + $0x168] sm:$0xff]  }
  0x1d   : > { %2482 = vmatpush3.bf16.msra.mxu0 %v2850_v14  ;;  %v629_v50 = vrot.slane %v587_v48, 7  ;;  %v630_v51 = vrot.slane %v588_v49, 7  ;;  %v2869_v13 = vld [vmem:[%s3918_s3 + $0x138] sm:$0xff]   ;;  %vm3239_vm1 = vmand %vm538_vm11, %vm548_vm12  ;;  %s3992_s22 = smov (!%p3460_p9, %s2474_s22), 15  ;;  %v3709_v9 = vld [vmem:[%s3919_s4] ss:$0 sm:$0xff] }
  0x1e   : > { %2546 = vmatpush3.bf16.msra.mxu1 %v2851_v15  ;;  %2483 = vmatprep.subr.bf16.mxu0 %v2852_v16  ;;  %v628_v54 = vsel %vm625_vm2, %v626_v46, %v627_v47  ;;  %v686_v55 = vsel %vm625_vm2, 0.0, %v626_v46  ;;  %v696_v56 = vsel %vm625_vm2, %v627_v47, 0.0  ;;  %v2873_v33 = vld [vmem:[%s3918_s3 + $0x1f8] sm:$0xff]   ;;  %vm559_vm7 = vmand %vm539_vm3, %vm549_vm4  ;;  %s3994_s22 = smov (!%p3460_p9, %s3992_s22), 15  ;;  %s3996_s27 = smov (!%p489_p10, %s2930_s27), 1 }
  0x1f   : > { %2547 = vmatprep.subr.bf16.mxu1 %v2853_v17  ;;  %v723_v58 = vrot.slane %v686_v55, 1  ;;  %v724_v59 = vrot.slane %v628_v54, 1  ;;  %v726_v60 = vrot.slane %v696_v56, 1  ;;  %v780_v61 = vrot.slane %v686_v55, 2  ;;  %v2875_v44 = vld [vmem:[%s3918_s3 + $0x1b8] sm:$0xff]   ;;  %s2277_s19 = sshll.u32 %s3994_s22, 1  ;;  %s492_s17 = sadd.s32 %s2284_s26, %s3996_s27 }
  0x20   : > { %v783_v63 = vrot.slane %v696_v56, 2  ;;  %v631_v0 = vsel %vm625_vm2, %v629_v50, %v630_v51  ;;  %v697_v1 = vsel %vm625_vm2, %v630_v51, 0.0  ;;  %v2371_v2 = vpack.c.bf16 %v628_v54, %v626_v46  ;;  %v2880_v53 = vld [vmem:[%s3918_s3 + $0x158] sm:$0xff]   ;;  %s469_s10 = sadd.s32 %s2277_s19, %s3089_s13  ;;  %s2285_s23 = sshll.u32 %s492_s17, 1 }
  0x21   : > { %2484 = vmatpush3.bf16.msra.mxu0 %v2854_v19  ;;  %v725_v5 = vsel %vm722_vm5, %v723_v58, %v724_v59  ;;  %v727_v6 = vsel %vm722_vm5, %v724_v59, %v726_v60  ;;  %v729_v7 = vrot.slane %v631_v0, 1  ;;  %v786_v8 = vrot.slane %v631_v0, 2  ;;  %v2874_v58 = vld [vmem:[%s3918_s3 + $0x128] sm:$0xff]   ;;  %v2877_v59 = vld [vmem:[%s3918_s3 + $0x1f0] sm:$0xff]   ;;  %s2279_s15 = sshll.u32 %s469_s10, 3  ;;  %s494_s11 = scalar_lea.vmem %s3923_s8, %s2285_s23 }
  0x22   : > { %2548 = vmatpush3.bf16.msra.mxu1 %v2855_v20  ;;  %2485 = vmatprep.subr.bf16.mxu0 %v2856_v21  ;;  %v869_v10 = vpack.c.bf16 %v727_v6, %v725_v5  ;;  %v3212_v11 = vpack.c.bf16 %v631_v0, %v629_v50  ;;  %v781_v12 = vrot.slane %v628_v54, 2  ;;  %v687_v14 = vsel %vm625_vm2, 0.0, %v629_v50  ;;  %v2870_v20 = vld [vmem:[%s3918_s3 + $0x170] sm:$0xff]   ;;  %v502_v21 = vld [vmem:[%s3160_s14 + $0x20] sm:$0xff]  ;;  %v505_v0 = vld [vmem:[%s3160_s14 + $0x38] sm:$0xff]  ;;  %s471_s18 = scalar_lea.vmem %s3917_s2, %s2279_s15 }
  0x23   : > { %2549 = vmatprep.subr.bf16.mxu1 %v2857_v23  ;;  %v728_v15 = vrot.slane %v687_v14, 1  ;;  %v731_v16 = vrot.slane %v697_v1, 1  ;;  %v589_v17 = vsel %vm3196_vm14, %v500_v3, 0.0  ;;  %v590_v19 = vsel %vm3196_vm14, %v501_v4, 0.0  ;;  %v2878_v5 = vld [vmem:[%s3918_s3 + $0x120] sm:$0xff]  }
  0x24   : > { %1513 = vmatprep.mubr.bf16.mxu0 %v869_v10  ;;  %2404 = vmatprep.mubr.msk.bf16.mxu1 %vm3208_vm0, %v3212_v11  ;;  %v782_v22 = vsel %vm779_vm6, %v780_v61, %v781_v12  ;;  %v784_v23 = vsel %vm779_vm6, %v781_v12, %v783_v63  ;;  %v591_v48 = vsel %vm3239_vm1, %v502_v21, 0.0  ;;  %v504_v63 = vld [vmem:[%s3160_s14 + $0x30] sm:$0xff]  ;;  %v594_v21 = vsel %vm559_vm7, %v505_v0, 0.0 }
  0x25   : > { %2486 = vmatpush3.bf16.msra.mxu0 %v2858_v24  ;;  %v632_v24 = vrot.slane %v589_v17, 7  ;;  %v732_v31 = vsel %vm722_vm5, %v729_v7, %v731_v16  ;;  %v635_v51 = vrot.slane %v591_v48, 7 }
  0x26   : > { %2550 = vmatpush3.bf16.msra.mxu1 %v2859_v25  ;;  %2487 = vmatprep.subr.bf16.mxu0 %v2860_v26  ;;  %v633_v25 = vrot.slane %v590_v19, 7  ;;  %v2871_v26 = vld [vmem:[%s3918_s3 + $0x130] sm:$0xff]   ;;  %v2291_v19 = vadd.s32 4294967295, %v3171_v41  ;;  %v2881_v41 = vld [vmem:[%s3918_s3 + $0x1e8] sm:$0xff]  }
  0x27   : > { %2551 = vmatprep.subr.bf16.mxu1 %v2861_v27  ;;  %v503_v27 = vld [vmem:[%s3160_s14 + $0x28] sm:$0xff]  ;;  %v688_v37 = vsel %vm625_vm2, 0.0, %v632_v24  ;;  %v3286_v62 = vsel %vm625_vm2, 0.0, %v635_v51 }
  0x28   : > { %v634_v35 = vsel %vm625_vm2, %v632_v24, %v633_v25  ;;  %v698_v40 = vsel %vm625_vm2, %v633_v25, 0.0  ;;  %v733_v42 = vrot.slane %v688_v37, 1  ;;  %v592_v50 = vsel %vm3239_vm1, %v503_v27, 0.0 }
  0x29   : > { %2488 = vmatpush3.bf16.msra.mxu0 %v2862_v28  ;;  %v3254_v38 = vpack.c.bf16 %v634_v35, %v632_v24  ;;  %v734_v46 = vrot.slane %v634_v35, 1  ;;  %v736_v47 = vrot.slane %v698_v40, 1  ;;  %v636_v56 = vrot.slane %v592_v50, 7 }
  0x2a   : > { %2552 = vmatpush3.bf16.msra.mxu1 %v2863_v29  ;;  %2489 = vmatprep.subr.bf16.mxu0 %v2864_v30  ;;  %v870_v29 = vpack.c.bf16 %v784_v23, %v782_v22  ;;  %v730_v30 = vsel %vm722_vm5, %v728_v15, %v729_v7  ;;  %v791_v57 = vrot.slane %v634_v35, 2  ;;  %v793_v61 = vrot.slane %v698_v40, 2  ;;  %v506_v22 = vld [vmem:[%s3160_s14 + $0x40] sm:$0xff]  ;;  %v507_v23 = vld [vmem:[%s3160_s14 + $0x48] sm:$0xff] }
  0x2b   : > { %2553 = vmatprep.subr.bf16.mxu1 %v2865_v32  ;;  %v785_v32 = vrot.slane %v687_v14, 2  ;;  %v735_v54 = vsel %vm722_vm5, %v733_v42, %v734_v46  ;;  %v737_v55 = vsel %vm722_vm5, %v734_v46, %v736_v47  ;;  %v699_v3 = vsel %vm625_vm2, %v636_v56, 0.0  ;;  %v2883_v40 = vld [vmem:[%s3918_s3 + $0x1a8] sm:$0xff]  }
  0x2c   : > { %v3283_v60 = vpack.c.bf16 %v737_v55, %v735_v54  ;;  %v738_v4 = vrot.slane %v3286_v62, 1  ;;  %v741_v10 = vrot.slane %v699_v3, 1  ;;  %v794_v12 = vsel %vm779_vm6, %v791_v57, %v793_v61  ;;  %v2884_v55 = vld [vmem:[%s3918_s3 + $0x150] sm:$0xff]  }
  0x2d   : > { %2490 = vmatpush3.bf16.msra.mxu0 %v2866_v34  ;;  %v3250_v34 = vpack.c.bf16 %v732_v31, %v730_v30  ;;  %v787_v39 = vsel %vm779_vm6, %v785_v32, %v786_v8  ;;  %v798_v17 = vrot.slane %v699_v3, 2  ;;  %v639_v25 = vrot.slane %v594_v21, 7  ;;  %v2882_v32 = vld [vmem:[%s3918_s3 + $0x118] sm:$0xff]   ;;  %v2890_v31 = vld [vmem:[%s3918_s3 + $0x108] sm:$0xff]  }
  0x2e   : > { %2554 = vmatpush3.bf16.msra.mxu1 %v2867_v36  ;;  %2603 = vmatprep.subr.bf16.mxu0 %v2868_v52  ;;  %v788_v36 = vrot.slane %v697_v1, 2  ;;  %v790_v52 = vrot.slane %v688_v37, 2  ;;  %v2876_v1 = vld [vmem:[%s3918_s3 + $0x160] sm:$0xff]   ;;  %vm540_vm8 = vcmp.ge.s32.totalorder %v2291_v19, 0  ;;  %vm550_vm9 = vcmp.lt.s32.totalorder %v2291_v19, 16  ;;  %v2889_v21 = vld [vmem:[%s3918_s3 + $0x1d8] sm:$0xff]  }
  0x2f   : > { %2667 = vmatprep.subr.bf16.mxu1 %v2873_v33  ;;  %v3341_v30 = vsel %vm625_vm2, %v639_v25, 0.0  ;;  %vm3343_vm10 = vmand %vm540_vm8, %vm550_vm9  ;;  %v522_v33 = vadd.s32 6, %v3098_v18  ;;  %v510_v19 = vld [vmem:[%s3160_s14 + $0x60] sm:$0xff] }
  0x30   : > { %2372 = vmatmul.mubr.msk.bf16.vlgmr.msra.gmra.mxu0 %vm3208_vm0, %v2371_v2  ;;  %v789_v45 = vsel %vm779_vm6, %v786_v8, %v788_v36  ;;  %v637_v2 = vsel %vm625_vm2, %v635_v51, %v636_v56  ;;  %v792_v7 = vsel %vm779_vm6, %v790_v52, %v791_v57  ;;  %v595_v42 = vsel %vm3343_vm10, %v506_v22, 0.0  ;;  %v508_v52 = vld [vmem:[%s3160_s14 + $0x50] sm:$0xff]  ;;  %v2885_v56 = vld [vmem:[%s3918_s3 + $0x1e0] sm:$0xff]  }
  0x31   : > { %2604 = vmatpush3.bf16.msra.mxu0 %v2869_v13  ;;  %1611 = vmatmul.mubr.bf16.vlgmr.msra.gmra.mxu1 %v870_v29  ;;  %v3271_v49 = vpack.c.bf16 %v789_v45, %v787_v39  ;;  %v3303_v6 = vpack.c.bf16 %v637_v2, %v635_v51  ;;  %v739_v8 = vrot.slane %v637_v2, 1  ;;  %v795_v13 = vrot.slane %v3286_v62, 2 }
  0x32   : > { %2605 = vmatprep.subr.bf16.mxu0 %v2870_v20  ;;  %1521 = vmatprep.mubr.bf16.mxu0 %v3250_v34  ;;  %v796_v14 = vrot.slane %v637_v2, 2  ;;  %v593_v20 = vsel %vm559_vm7, %v504_v63, 0.0  ;;  %v746_v39 = vrot.slane %v3341_v30, 1  ;;  %v641_v46 = vrot.slane %v595_v42, 7  ;;  %v509_v63 = vld [vmem:[%s3160_s14 + $0x58] sm:$0xff]  ;;  %v2886_v2 = vld [vmem:[%s3918_s3 + $0x110] sm:$0xff]  }
  0x33   : > { %2408 = vmatprep.mubr.msk.bf16.mxu1 %vm3208_vm0, %v3254_v38  ;;  %2668 = vmatpush3.bf16.msra.mxu1 %v2875_v44  ;;  %v740_v15 = vsel %vm722_vm5, %v738_v4, %v739_v8  ;;  %v742_v16 = vsel %vm722_vm5, %v739_v8, %v741_v10  ;;  %v638_v24 = vrot.slane %v593_v20, 7  ;;  %v2292_v54 = vadd.s32 4294967295, %v522_v33  ;;  %v2887_v8 = vld [vmem:[%s3918_s3 + $0x1a0] sm:$0xff]  }
  0x34   : > { %2669 = vmatprep.subr.bf16.mxu1 %v2877_v59  ;;  %v3329_v27 = vpack.c.bf16 %v742_v16, %v740_v15  ;;  %v797_v44 = vsel %vm779_vm6, %v795_v13, %v796_v14  ;;  %v799_v45 = vsel %vm779_vm6, %v796_v14, %v798_v17  ;;  %v523_v14 = vadd.s32 7, %v3098_v18 }
  0x35   : > { %2606 = vmatpush3.bf16.msra.mxu0 %v2871_v26  ;;  %v3327_v26 = vpack.c.bf16 %v794_v12, %v792_v7  ;;  %v3335_v28 = vsel %vm625_vm2, %v638_v24, %v639_v25  ;;  %v3338_v29 = vsel %vm625_vm2, 0.0, %v638_v24  ;;  %v3393_v61 = vpack.c.bf16 %v799_v45, %v797_v44  ;;  %v2892_v45 = vld [vmem:[%s3918_s3 + $0x1d0] sm:$0xff]  }
  0x36   : > { %2607 = vmatprep.subr.bf16.mxu0 %v2872_v43  ;;  %v3352_v35 = vpack.c.bf16 %v3335_v28, %v638_v24  ;;  %v743_v36 = vrot.slane %v3338_v29, 1  ;;  %v744_v37 = vrot.slane %v3335_v28, 1  ;;  %v596_v43 = vsel %vm3343_vm10, %v507_v23, 0.0 }
  0x37   : > { %v642_v47 = vrot.slane %v596_v43, 7  ;;  %v800_v51 = vrot.slane %v3338_v29, 2  ;;  %v801_v62 = vrot.slane %v3335_v28, 2  ;;  %vm541_vm11 = vcmp.ge.s32.totalorder %v2292_v54, 0 }
  0x38   : > { %2376 = vmatmul.mubr.msk.bf16.gmra.mxu0 %vm3208_vm0, %v3212_v11  ;;  %v2879_v11 = vld [vmem:[%s3918_s3 + $0x1b0] sm:$0xff]   ;;  %v745_v48 = vsel %vm722_vm5, %v743_v36, %v744_v37  ;;  %v747_v50 = vsel %vm722_vm5, %v744_v37, %v746_v39  ;;  %vm551_vm12 = vcmp.lt.s32.totalorder %v2292_v54, 16  ;;  %v2293_v20 = vadd.s32 4294967295, %v523_v14  ;;  %v2891_v39 = vld [vmem:[%s3918_s3 + $0x198] sm:$0xff]  }
  0x39   : > { %1529 = vmatprep.mubr.bf16.mxu0 %v3283_v60  ;;  %2608 = vmatpush3.bf16.msra.mxu0 %v2874_v58  ;;  %v3385_v57 = vsel %vm625_vm2, %v641_v46, %v642_v47  ;;  %v3388_v58 = vsel %vm625_vm2, 0.0, %v641_v46  ;;  %v3391_v59 = vsel %vm625_vm2, %v642_v47, 0.0  ;;  %v3397_v0 = vpack.c.bf16 %v747_v50, %v745_v48  ;;  %vm561_vm13 = vmand %vm541_vm11, %vm551_vm12 }
  0x3a   : > { %1619 = vmatmul.mubr.bf16.gmra.mxu1 %v3271_v49  ;;  %2609 = vmatprep.subr.bf16.mxu0 %v2876_v1  ;;  %v803_v1 = vrot.slane %v3341_v30, 2  ;;  %v3404_v3 = vpack.c.bf16 %v3385_v57, %v641_v46  ;;  %v748_v4 = vrot.slane %v3388_v58, 1  ;;  %v751_v7 = vrot.slane %v3391_v59, 1  ;;  %v511_v30 = vld [vmem:[%s3160_s14 + $0x68] sm:$0xff]  ;;  %v2893_v46 = vld [vmem:[%s3918_s3 + $0x190] sm:$0xff]  }
  0x3b   : > { %2412 = vmatprep.mubr.msk.bf16.mxu1 %vm3208_vm0, %v3303_v6  ;;  %2670 = vmatpush3.bf16.msra.mxu1 %v2879_v11  ;;  %v597_v10 = vsel %vm561_vm13, %v508_v52, 0.0  ;;  %v598_v12 = vsel %vm561_vm13, %v509_v63, 0.0  ;;  %v805_v13 = vrot.slane %v3388_v58, 2  ;;  %v2888_v11 = vld [vmem:[%s3918_s3 + $0x148] sm:$0xff]   ;;  %v802_v17 = vsel %vm779_vm6, %v800_v51, %v801_v62  ;;  %v512_v51 = vld [vmem:[%s3160_s14 + $0x70] sm:$0xff]  ;;  %v2894_v58 = vld [vmem:[%s3918_s3 + $0x140] sm:$0xff]  }
  0x3c   : > { %2671 = vmatprep.subr.bf16.mxu1 %v2881_v41  ;;  %v644_v15 = vrot.slane %v597_v10, 7  ;;  %v645_v16 = vrot.slane %v598_v12, 7  ;;  %v806_v28 = vrot.slane %v3385_v57, 2  ;;  %v808_v29 = vrot.slane %v3391_v59, 2  ;;  %v2895_v59 = vld [vmem:[%s3918_s3 + $0x1c8] sm:$0xff]  }
  0x3d   : > { %2610 = vmatpush3.bf16.msra.mxu0 %v2878_v5  ;;  %v749_v5 = vrot.slane %v3385_v57, 1  ;;  %vm542_vm14 = vcmp.ge.s32.totalorder %v2293_v20, 0  ;;  %vm552_vm15 = vcmp.lt.s32.totalorder %v2293_v20, 16  ;;  %v2898_v20 = vld [vmem:[%s3918_s3 + $0x1c0] sm:$0xff]  }
  0x3e   : > { %2611 = vmatprep.subr.bf16.mxu0 %v2880_v53  ;;  %v3431_v24 = vsel %vm625_vm2, 0.0, %v644_v15  ;;  %v3434_v25 = vsel %vm625_vm2, %v645_v16, 0.0  ;;  %v804_v53 = vsel %vm779_vm6, %v801_v62, %v803_v1  ;;  %v3441_v41 = vsel %vm625_vm2, %v644_v15, %v645_v16  ;;  %vm562_vm1 = vmand %vm542_vm14, %vm552_vm15 }
  0x3f   : > { %2672 = vmatpush3.bf16.msra.mxu1 %v2883_v40  ;;  %v750_v22 = vsel %vm722_vm5, %v748_v4, %v749_v5  ;;  %v752_v23 = vsel %vm722_vm5, %v749_v5, %v751_v7  ;;  %v754_v33 = vrot.slane %v3441_v41, 1  ;;  %v756_v37 = vrot.slane %v3434_v25, 1  ;;  %v513_v4 = vld [vmem:[%s3160_s14 + $0x78] sm:$0xff]  ;;  %v2896_v5 = vld [vmem:[%s3918_s3 + $0x100] sm:$0xff]  }
  0x40   : > { %2380 = vmatmul.mubr.msk.bf16.gmra.mxu0 %vm3208_vm0, %v3254_v38  ;;  %2673 = vmatprep.subr.bf16.mxu1 %v2885_v56  ;;  %v3451_v36 = vpack.c.bf16 %v752_v23, %v750_v22  ;;  %v524_v40 = vadd.s32 8, %v3098_v18  ;;  %v3464_v42 = vpack.c.bf16 %v804_v53, %v802_v17  ;;  %v599_v43 = vsel %vm562_vm1, %v510_v19, 0.0  ;;  %v2897_v19 = vld [vmem:[%s3918_s3 + $0x188] sm:$0xff]   ;;  %v2899_v23 = vld [vmem:[%s3918_s3 + $0x180] sm:$0xff]  }
  0x41   : > { %1537 = vmatprep.mubr.bf16.mxu0 %v3329_v27  ;;  %2612 = vmatpush3.bf16.msra.mxu0 %v2882_v32  ;;  %v753_v32 = vrot.slane %v3431_v24, 1  ;;  %v600_v44 = vsel %vm562_vm1, %v511_v30, 0.0  ;;  %v3473_v47 = vpack.c.bf16 %v3441_v41, %v644_v15  ;;  %v647_v48 = vrot.slane %v599_v43, 7 }
  0x42   : > { %1627 = vmatmul.mubr.bf16.gmra.mxu1 %v3327_v26  ;;  %2613 = vmatprep.subr.bf16.mxu0 %v2884_v55  ;;  %v648_v50 = vrot.slane %v600_v44, 7  ;;  %v2294_v52 = vadd.s32 4294967295, %v524_v40  ;;  %v807_v54 = vsel %vm779_vm6, %v805_v13, %v806_v28  ;;  %v809_v55 = vsel %vm779_vm6, %v806_v28, %v808_v29 }
  0x43   : > { %2416 = vmatprep.mubr.msk.bf16.mxu1 %vm3208_vm0, %v3352_v35  ;;  %2674 = vmatpush3.bf16.msra.mxu1 %v2887_v8  ;;  %v810_v56 = vrot.slane %v3431_v24, 2  ;;  %v3484_v57 = vsel %vm625_vm2, 0.0, %v647_v48  ;;  %v755_v62 = vsel %vm722_vm5, %v753_v32, %v754_v33  ;;  %v757_v63 = vsel %vm722_vm5, %v754_v33, %v756_v37  ;;  %v3539_v24 = vld [vmem:[%s3918_s3 + $0x238] sm:$0xff]  }
  0x44   : > { %2675 = vmatprep.subr.bf16.mxu1 %v2889_v21  ;;  %v811_v1 = vrot.slane %v3441_v41, 2  ;;  %v649_v7 = vsel %vm625_vm2, %v647_v48, %v648_v50  ;;  %v703_v8 = vsel %vm625_vm2, %v648_v50, 0.0  ;;  %vm543_vm3 = vcmp.ge.s32.totalorder %v2294_v52, 0 }
  0x45   : > { %2614 = vmatpush3.bf16.msra.mxu0 %v2886_v2  ;;  %v813_v2 = vrot.slane %v3434_v25, 2  ;;  %vm553_vm4 = vcmp.lt.s32.totalorder %v2294_v52, 16  ;;  %v758_v10 = vrot.slane %v3484_v57, 1  ;;  %v759_v12 = vrot.slane %v649_v7, 1 }
  0x46   : > { %2615 = vmatprep.subr.bf16.mxu0 %v2888_v11  ;;  %vm563_vm7 = vmand %vm543_vm3, %vm553_vm4  ;;  %v3513_v13 = vpack.c.bf16 %v757_v63, %v755_v62  ;;  %v3515_v15 = vpack.c.bf16 %v809_v55, %v807_v54  ;;  %v761_v16 = vrot.slane %v703_v8, 1  ;;  %v3525_v21 = vpack.c.bf16 %v649_v7, %v647_v48 }
  0x47   : > { %2676 = vmatpush3.bf16.msra.mxu1 %v2891_v39  ;;  %v601_v14 = vsel %vm563_vm7, %v512_v51, 0.0  ;;  %v602_v11 = vsel %vm563_vm7, %v513_v4, 0.0  ;;  %v760_v25 = vsel %vm722_vm5, %v758_v10, %v759_v12  ;;  %v812_v41 = vsel %vm779_vm6, %v810_v56, %v811_v1 }
  0x48   : > { %2384 = vmatmul.mubr.msk.bf16.gmra.mxu0 %vm3208_vm0, %v3303_v6  ;;  %2677 = vmatprep.subr.bf16.mxu1 %v2892_v45  ;;  %v3517_v17 = vrot.slane %v601_v14, 7  ;;  %v3530_v22 = vrot.slane %v602_v11, 7  ;;  %v762_v53 = vsel %vm722_vm5, %v759_v12, %v761_v16  ;;  %v814_v28 = vsel %vm779_vm6, %v811_v1, %v813_v2  ;;  %v514_v45 = vld [vmem:[%s471_s18] sm:$0xff]  ;;  %v2901_v12 = vld [vmem:[%s3918_s3 + $0x230] sm:$0xff]   ;;  %v2902_v14 = vld [vmem:[%s3918_s3 + $0x228] sm:$0xff]  }
  0x49   : > { %1545 = vmatprep.mubr.bf16.mxu0 %v3397_v0  ;;  %2616 = vmatpush3.bf16.msra.mxu0 %v2890_v31  ;;  %v3558_v30 = vpack.c.bf16 %v762_v53, %v760_v25  ;;  %v3561_v31 = vpack.c.bf16 %v814_v28, %v812_v41  ;;  %v815_v32 = vrot.slane %v3484_v57, 2  ;;  %v816_v37 = vrot.slane %v649_v7, 2 }
  0x4a   : > { %1635 = vmatmul.mubr.bf16.gmra.mxu1 %v3393_v61  ;;  %2617 = vmatprep.subr.bf16.mxu0 %v2894_v58  ;;  %v3556_v29 = vsel %vm625_vm2, %v3517_v17, %v3530_v22  ;;  %v818_v39 = vrot.slane %v703_v8, 2  ;;  %v525_v40 = vadd.s32 9, %v3098_v18  ;;  %v704_v11 = vsel %vm625_vm2, %v3530_v22, 0.0 }
  0x4b   : > { %2420 = vmatprep.mubr.msk.bf16.mxu1 %vm3208_vm0, %v3404_v3  ;;  %2678 = vmatpush3.bf16.msra.mxu1 %v2893_v46  ;;  %v3566_v33 = vpack.c.bf16 %v3556_v29, %v3517_v17  ;;  %v817_v18 = vsel %vm779_vm6, %v815_v32, %v816_v37  ;;  %v515_v46 = vld [vmem:[%s471_s18 + $0x8] sm:$0xff]  ;;  %v839_v16 = vrot.slane %v3556_v29, 1  ;;  %v846_v22 = vrot.slane %v3556_v29, 2 }
  0x4c   : > { %2679 = vmatprep.subr.bf16.mxu1 %v2895_v59  ;;  %v2295_v43 = vadd.s32 4294967295, %v525_v40  ;;  %v819_v44 = vsel %vm779_vm6, %v816_v37, %v818_v39 }
  0x4d   : > { %2618 = vmatpush3.bf16.msra.mxu0 %v2896_v5  ;;  %v3583_v51 = vpack.c.bf16 %v819_v44, %v817_v18 }
  0x4e   : > { %2747 = vmatprep.subr.bf16.mxu0 %v3539_v24  ;;  %vm544_vm8 = vcmp.ge.s32.totalorder %v2295_v43, 0  ;;  %vm554_vm9 = vcmp.lt.s32.totalorder %v2295_v43, 16 }
  0x4f   : > { %2680 = vmatpush3.bf16.msra.mxu1 %v2897_v19  ;;  %vm564_vm10 = vmand %vm544_vm8, %vm554_vm9  ;;  %v841_v19 = vrot.slane %v704_v11, 1 }
  0x50   : > { %2388 = vmatmul.mubr.msk.bf16.gmra.mxu0 %vm3208_vm0, %v3352_v35  ;;  %2681 = vmatprep.subr.bf16.mxu1 %v2898_v20  ;;  %v603_v48 = vsel %vm564_vm10, %v514_v45, 0.0  ;;  %v604_v50 = vsel %vm564_vm10, %v515_v46, 0.0 }
  0x51   : > { %1553 = vmatprep.mubr.bf16.mxu0 %v3451_v36  ;;  %v3585_v52 = vrot.slane %v603_v48, 7  ;;  %v654_v54 = vrot.slane %v604_v50, 7 }
  0x52   : > { %1643 = vmatmul.mubr.bf16.gmra.mxu1 %v3464_v42 }
  0x53   : > { %2424 = vmatprep.mubr.msk.bf16.mxu1 %vm3208_vm0, %v3473_v47  ;;  %2682 = vmatpush3.bf16.msra.mxu1 %v2899_v23  ;;  %v3592_v55 = vsel %vm625_vm2, %v3585_v52, %v654_v54  ;;  %v695_v56 = vsel %vm625_vm2, 0.0, %v3585_v52  ;;  %v705_v57 = vsel %vm625_vm2, %v654_v54, 0.0 }
  0x54   : > { %2779 = vmatprep.subr.bf16.mxu1 %v3539_v24  ;;  %v854_v58 = vrot.slane %v695_v56, 1  ;;  %v855_v59 = vrot.slane %v3592_v55, 1  ;;  %v857_v62 = vrot.slane %v705_v57, 1  ;;  %v861_v63 = vrot.slane %v695_v56, 2 }
  0x55   : > { %v862_v1 = vrot.slane %v3592_v55, 2  ;;  %v864_v2 = vrot.slane %v705_v57, 2 }
  0x56   : > { %v3603_v4 = vsel %vm722_vm5, %v854_v58, %v855_v59  ;;  %v3606_v5 = vsel %vm722_vm5, %v855_v59, %v857_v62 }
  0x57   : > { %v3611_v7 = vsel %vm779_vm6, %v861_v63, %v862_v1  ;;  %v3614_v8 = vsel %vm779_vm6, %v862_v1, %v864_v2 }
  0x58   : > { %2392 = vmatmul.mubr.msk.bf16.gmra.mxu0 %vm3208_vm0, %v3404_v3  ;;  %v897_v10 = vpack.c.bf16 %v3614_v8, %v3611_v7 }
  0x59   : > { %1561 = vmatprep.mubr.bf16.mxu0 %v3513_v13 }
  0x5a   : > { %1651 = vmatmul.mubr.bf16.gmra.mxu1 %v3515_v15 }
  0x5b   : > { %2428 = vmatprep.mubr.msk.bf16.mxu1 %vm3208_vm0, %v3525_v21 }
  0x60   : > { %2396 = vmatmul.mubr.msk.bf16.gmra.mxu0 %vm3208_vm0, %v3473_v47 }
  0x61   : > { %1569 = vmatprep.mubr.bf16.mxu0 %v3558_v30 }
  0x62   : > { %1659 = vmatmul.mubr.bf16.gmra.mxu1 %v3561_v31 }
  0x63   : > { %2432 = vmatprep.mubr.msk.bf16.mxu1 %vm3208_vm0, %v3566_v33 }
  0x68   : > { %2400 = vmatmul.mubr.msk.bf16.gmra.mxu0 %vm3208_vm0, %v3525_v21 }
  0x69   : > { %1707 = vmatprep.mubr.bf16.mxu0 %v3271_v49  ;;  %v896_v49 = vpack.c.bf16 %v3606_v5, %v3603_v4 }
  0x6a   : > { %1667 = vmatmul.mubr.bf16.gmra.mxu1 %v3583_v51 }
  0x6b   : > { %1804 = vmatprep.mubr.bf16.mxu1 %v3283_v60 }
  0x70   : > { %1708 = vmatmul.mubr.bf16.vlgmr.msra.gmra.mxu0 %v3250_v34  ;;  %v2903_v34 = vld [vmem:[%s3918_s3 + $0x220] sm:$0xff]  }
  0x71   : > { %2748 = vmatpush3.bf16.msra.mxu0 %v3539_v24  ;;  %1715 = vmatprep.mubr.bf16.mxu0 %v3327_v26 }
  0x72   : > { %2436 = vmatmul.mubr.msk.bf16.vlgmr.msra.gmra.mxu1 %vm3208_vm0, %v3254_v38  ;;  %2749 = vmatprep.subr.bf16.mxu0 %v2901_v12  ;;  %v2904_v38 = vld [vmem:[%s3918_s3 + $0x218] sm:$0xff]  }
  0x73   : > { %1812 = vmatprep.mubr.bf16.mxu1 %v3329_v27  ;;  %2787 = vmatpush3.bf16.msra.mxu1 %v3539_v24 }
  0x74   : > { %2780 = vmatprep.subr.bf16.mxu1 %v2901_v12 }
  0x75   : > { %2750 = vmatpush3.bf16.msra.mxu0 %v2901_v12 }
  0x76   : > { %2751 = vmatprep.subr.bf16.mxu0 %v2902_v14 }
  0x77   : > { %2788 = vmatpush3.bf16.msra.mxu1 %v2901_v12 }
  0x78   : > { %1716 = vmatmul.mubr.bf16.gmra.mxu0 %v3283_v60  ;;  %2781 = vmatprep.subr.bf16.mxu1 %v2902_v14  ;;  %v2905_v60 = vld [vmem:[%s3918_s3 + $0x210] sm:$0xff]  }
  0x79   : > { %1723 = vmatprep.mubr.bf16.mxu0 %v3393_v61  ;;  %2752 = vmatpush3.bf16.msra.mxu0 %v2902_v14 }
  0x7a   : > { %2440 = vmatmul.mubr.msk.bf16.gmra.mxu1 %vm3208_vm0, %v3303_v6  ;;  %2753 = vmatprep.subr.bf16.mxu0 %v2903_v34  ;;  %v2906_v6 = vld [vmem:[%s3918_s3 + $0x208] sm:$0xff]  }
  0x7b   : > { %1820 = vmatprep.mubr.bf16.mxu1 %v3397_v0  ;;  %2789 = vmatpush3.bf16.msra.mxu1 %v2902_v14 }
  0x7c   : > { %2782 = vmatprep.subr.bf16.mxu1 %v2903_v34 }
  0x7d   : > { %2754 = vmatpush3.bf16.msra.mxu0 %v2903_v34 }
  0x7e   : > { %2755 = vmatprep.subr.bf16.mxu0 %v2904_v38 }
  0x7f   : > { %2790 = vmatpush3.bf16.msra.mxu1 %v2903_v34 }
  0x80   : > { %1724 = vmatmul.mubr.bf16.gmra.mxu0 %v3329_v27  ;;  %2783 = vmatprep.subr.bf16.mxu1 %v2904_v38  ;;  %v2907_v27 = vld [vmem:[%s3918_s3 + $0x200] sm:$0xff]  }
  0x81   : > { %1731 = vmatprep.mubr.bf16.mxu0 %v3464_v42  ;;  %2756 = vmatpush3.bf16.msra.mxu0 %v2904_v38 }
  0x82   : > { %2444 = vmatmul.mubr.msk.bf16.gmra.mxu1 %vm3208_vm0, %v3352_v35  ;;  %2757 = vmatprep.subr.bf16.mxu0 %v2905_v60  ;;  %v694_v35 = vsel %vm625_vm2, 0.0, %v3517_v17  ;;  %v842_v17 = vsel %vm722_vm5, %v839_v16, %v841_v19 }
  0x83   : > { %1828 = vmatprep.mubr.bf16.mxu1 %v3451_v36  ;;  %2791 = vmatpush3.bf16.msra.mxu1 %v2904_v38  ;;  %v845_v20 = vrot.slane %v694_v35, 2 }
  0x84   : > { %2784 = vmatprep.subr.bf16.mxu1 %v2905_v60 }
  0x85   : > { %2758 = vmatpush3.bf16.msra.mxu0 %v2905_v60 }
  0x86   : > { %2759 = vmatprep.subr.bf16.mxu0 %v2906_v6 }
  0x87   : > { %2792 = vmatpush3.bf16.msra.mxu1 %v2905_v60 }
  0x88   : > { %1732 = vmatmul.mubr.bf16.gmra.mxu0 %v3397_v0  ;;  %2785 = vmatprep.subr.bf16.mxu1 %v2906_v6  ;;  %v838_v0 = vrot.slane %v694_v35, 1 }
  0x89   : > { %1739 = vmatprep.mubr.bf16.mxu0 %v3515_v15  ;;  %2760 = vmatpush3.bf16.msra.mxu0 %v2906_v6 }
  0x8a   : > { %2448 = vmatmul.mubr.msk.bf16.gmra.mxu1 %vm3208_vm0, %v3404_v3  ;;  %2761 = vmatprep.subr.bf16.mxu0 %v2907_v27  ;;  %v840_v3 = vsel %vm722_vm5, %v838_v0, %v839_v16 }
  0x8b   : > { %1836 = vmatprep.mubr.bf16.mxu1 %v3513_v13  ;;  %2793 = vmatpush3.bf16.msra.mxu1 %v2906_v6  ;;  %v893_v23 = vpack.c.bf16 %v842_v17, %v840_v3 }
  0x8c   : > { %2786 = vmatprep.subr.bf16.mxu1 %v2907_v27 }
  0x8d   : > { %2762 = vmatpush3.bf16.msra.mxu0 %v2907_v27 }
  0x8f   : > { %2794 = vmatpush3.bf16.msra.mxu1 %v2907_v27 }
  0x90   : > { %1740 = vmatmul.mubr.bf16.gmra.mxu0 %v3451_v36  ;;  %v848_v36 = vrot.slane %v704_v11, 2 }
  0x91   : > { %1747 = vmatprep.mubr.bf16.mxu0 %v3561_v31 }
  0x92   : > { %2452 = vmatmul.mubr.msk.bf16.gmra.mxu1 %vm3208_vm0, %v3473_v47  ;;  %v847_v47 = vsel %vm779_vm6, %v845_v20, %v846_v22  ;;  %v849_v24 = vsel %vm779_vm6, %v846_v22, %v848_v36 }
  0x93   : > { %1844 = vmatprep.mubr.bf16.mxu1 %v3558_v30  ;;  %v894_v25 = vpack.c.bf16 %v849_v24, %v847_v47 }
  0x98   : > { %1748 = vmatmul.mubr.bf16.gmra.mxu0 %v3513_v13  ;;  %v2463_v13 = vpack.c.bf16 %v3592_v55, %v3585_v52 }
  0x99   : > { %1755 = vmatprep.mubr.bf16.mxu0 %v3583_v51 }
  0x9a   : > { %2456 = vmatmul.mubr.msk.bf16.gmra.mxu1 %vm3208_vm0, %v3525_v21 }
  0x9b   : > { %1852 = vmatprep.mubr.bf16.mxu1 %v893_v23 }
  0xa0   : > { %1756 = vmatmul.mubr.bf16.gmra.mxu0 %v3558_v30 }
  0xa1   : > { %1763 = vmatprep.mubr.bf16.mxu0 %v894_v25 }
  0xa2   : > { %2460 = vmatmul.mubr.msk.bf16.gmra.mxu1 %vm3208_vm0, %v3566_v33 }
  0xa3   : > { %1860 = vmatprep.mubr.bf16.mxu1 %v896_v49 }
  0xa8   : > { %1764 = vmatmul.mubr.bf16.gmra.mxu0 %v893_v23 }
  0xa9   : > { %2763 = vmatprep.mubr.bf16.mxu0 %v3327_v26 }
  0xaa   : > { %2464 = vmatmul.mubr.msk.bf16.gmra.mxu1 %vm3208_vm0, %v2463_v13 }
  0xab   : > { %2771 = vmatprep.mubr.bf16.mxu1 %v3561_v31 }
  0xb0   : > { %2764 = vmatmul.mubr.bf16.vlgmr.msra.gmra.mxu0 %v3393_v61 }
  0xb1   : > { %2767 = vmatprep.mubr.bf16.mxu0 %v3464_v42 }
  0xb2   : > { %2772 = vmatmul.mubr.bf16.vlgmr.msra.gmra.mxu1 %v3583_v51 }
  0xb3   : > { %2775 = vmatprep.mubr.bf16.mxu1 %v894_v25 }
  0xb8   : > { %2768 = vmatmul.mubr.bf16.gmra.mxu0 %v3515_v15 }
  0xba   : > { %2776 = vmatmul.mubr.bf16.gmra.mxu1 %v897_v10 }
  0xf0   : > { %v2491_v21 = vpop.f32.mrf.mxu0 }
  0xf1   : > { %v2555_v26 = vpop.f32.mrf.mxu1 }
  0xf2   : > { %v2492_v53 = vpop.f32.mrf.mxu0 }
  0xf3   : > { %v2493_v61 = vadd.f32 %v2492_v53, %v2491_v21  ;;  %v2556_v41 = vpop.f32.mrf.mxu1 }
  0xf4   : > { %v2494_v42 = vpop.f32.mrf.mxu0  ;;  %v2557_v29 = vadd.f32 %v2556_v41, %v2555_v26 }
  0xf5   : > { %v1516_v28 = vadd.f32 %v2493_v61, %v3709_v9  ;;  %v2558_v30 = vpop.f32.mrf.mxu1 }
  0xf6   : > { %v2495_v15 = vpop.f32.mrf.mxu0 }
  0xf7   : > { %v3712_v31 = vadd.f32 %v2557_v29, %v1516_v28  ;;  %v2496_v32 = vadd.f32 %v2495_v15, %v2494_v42  ;;  %v2559_v33 = vpop.f32.mrf.mxu1 }
  0xf8   : > { %v2497_v37 = vpop.f32.mrf.mxu0  ;;  %v2560_v40 = vadd.f32 %v2559_v33, %v2558_v30 }
  0xf9   : > { %v1519_v39 = vadd.f32 %v2496_v32, %v3709_v9 }
  0xfa   : > { %v2561_v43 = vpop.f32.mrf.mxu1  ;;  %v2498_v18 = vpop.f32.mrf.mxu0 }
  0xfb   : > { %v3715_v44 = vadd.f32 %v2560_v40, %v1519_v39  ;;  %v2499_v45 = vadd.f32 %v2498_v18, %v2497_v37 }
  0xfc   : > { %v2562_v46 = vpop.f32.mrf.mxu1  ;;  %v2500_v48 = vpop.f32.mrf.mxu0 }
  0xfd   : > { %v1524_v50 = vadd.f32 %v2499_v45, %v3709_v9  ;;  %v2563_v51 = vadd.f32 %v2562_v46, %v2561_v43 }
  0xfe   : > { %v2564_v52 = vpop.f32.mrf.mxu1  ;;  %v2501_v54 = vpop.f32.mrf.mxu0 }
  0xff   : > { %v3718_v55 = vadd.f32 %v2563_v51, %v1524_v50  ;;  %v2502_v56 = vadd.f32 %v2501_v54, %v2500_v48 }
 0x100   : > { %v2565_v57 = vpop.f32.mrf.mxu1  ;;  %v2503_v58 = vpop.f32.mrf.mxu0 }
 0x101   : > { %v1527_v59 = vadd.f32 %v2502_v56, %v3709_v9  ;;  %v2566_v62 = vadd.f32 %v2565_v57, %v2564_v52 }
 0x102   : > { %v2567_v63 = vpop.f32.mrf.mxu1  ;;  %v2504_v1 = vpop.f32.mrf.mxu0 }
 0x103   : > { %v3721_v2 = vadd.f32 %v2566_v62, %v1527_v59  ;;  %v2505_v4 = vadd.f32 %v2504_v1, %v2503_v58 }
 0x104   : > { %v2568_v5 = vpop.f32.mrf.mxu1  ;;  %v2506_v49 = vpop.f32.mrf.mxu0 }
 0x105   : > { %v1532_v7 = vadd.f32 %v2505_v4, %v3709_v9  ;;  %v2569_v8 = vadd.f32 %v2568_v5, %v2567_v63 }
 0x106   : > { %v2570_v10 = vpop.f32.mrf.mxu1  ;;  %v2507_v12 = vpop.f32.mrf.mxu0 }
 0x107   : > { %v3724_v14 = vadd.f32 %v2569_v8, %v1532_v7  ;;  %v2508_v34 = vadd.f32 %v2507_v12, %v2506_v49 }
 0x108   : > { %v2571_v38 = vpop.f32.mrf.mxu1  ;;  %v2509_v60 = vpop.f32.mrf.mxu0 }
 0x109   : > { %v1535_v6 = vadd.f32 %v2508_v34, %v3709_v9  ;;  %v2572_v27 = vadd.f32 %v2571_v38, %v2570_v10 }
 0x10a   : > { %v2573_v35 = vpop.f32.mrf.mxu1  ;;  %v2510_v11 = vpop.f32.mrf.mxu0 }
 0x10b   : > { %v3727_v0 = vadd.f32 %v2572_v27, %v1535_v6  ;;  %v2511_v16 = vadd.f32 %v2510_v11, %v2509_v60 }
 0x10c   : > { %v2574_v19 = vpop.f32.mrf.mxu1  ;;  %v2512_v3 = vpop.f32.mrf.mxu0 }
 0x10d   : > { %3935 = vst [vmem:[#allocation2_spill] sm:$0xff] %v3727_v0  ;;  %v1540_v17 = vadd.f32 %v2511_v16, %v3709_v9  ;;  %v2575_v20 = vadd.f32 %v2574_v19, %v2573_v35 }
 0x10e   : > { %v2576_v22 = vpop.f32.mrf.mxu1  ;;  %v2513_v36 = vpop.f32.mrf.mxu0 }
 0x10f   : > { %v3730_v23 = vadd.f32 %v2575_v20, %v1540_v17  ;;  %v2514_v47 = vadd.f32 %v2513_v36, %v2512_v3 }
 0x110   : > { %v2577_v24 = vpop.f32.mrf.mxu1  ;;  %v2515_v25 = vpop.f32.mrf.mxu0 }
 0x111   : > { %3936 = vst [vmem:[#allocation3_spill] sm:$0xff] %v3730_v23  ;;  %v1543_v13 = vadd.f32 %v2514_v47, %v3709_v9  ;;  %v2578_v21 = vadd.f32 %v2577_v24, %v2576_v22 }
 0x112   : > { %v2579_v26 = vpop.f32.mrf.mxu1  ;;  %v2516_v53 = vpop.f32.mrf.mxu0 }
 0x113   : > { %v3733_v61 = vadd.f32 %v2578_v21, %v1543_v13  ;;  %v2517_v41 = vadd.f32 %v2516_v53, %v2515_v25 }
 0x114   : > { %v2580_v42 = vpop.f32.mrf.mxu1  ;;  %v2518_v28 = vpop.f32.mrf.mxu0 }
 0x115   : > { %3937 = vst [vmem:[#allocation4_spill] sm:$0xff] %v3733_v61  ;;  %v1548_v29 = vadd.f32 %v2517_v41, %v3709_v9  ;;  %v2581_v30 = vadd.f32 %v2580_v42, %v2579_v26 }
 0x116   : > { %v2582_v15 = vpop.f32.mrf.mxu1  ;;  %v2519_v32 = vpop.f32.mrf.mxu0 }
 0x117   : > { %v3736_v33 = vadd.f32 %v2581_v30, %v1548_v29  ;;  %v2520_v37 = vadd.f32 %v2519_v32, %v2518_v28 }
 0x118   : > { %v2583_v39 = vpop.f32.mrf.mxu1  ;;  %v2521_v40 = vpop.f32.mrf.mxu0 }
 0x119   : > { %v1551_v43 = vadd.f32 %v2520_v37, %v3709_v9  ;;  %v2584_v18 = vadd.f32 %v2583_v39, %v2582_v15 }
 0x11a   : > { %v2585_v45 = vpop.f32.mrf.mxu1  ;;  %v2522_v46 = vpop.f32.mrf.mxu0 }
 0x11b   : > { %v3739_v48 = vadd.f32 %v2584_v18, %v1551_v43  ;;  %v2523_v50 = vadd.f32 %v2522_v46, %v2521_v40 }
 0x11c   : > { %v2586_v51 = vpop.f32.mrf.mxu1  ;;  %v2524_v52 = vpop.f32.mrf.mxu0 }
 0x11d   : > { %3938 = vst [vmem:[#allocation5_spill] sm:$0xff] %v3739_v48  ;;  %v1556_v54 = vadd.f32 %v2523_v50, %v3709_v9  ;;  %v2587_v56 = vadd.f32 %v2586_v51, %v2585_v45 }
 0x11e   : > { %v2588_v57 = vpop.f32.mrf.mxu1  ;;  %v2525_v58 = vpop.f32.mrf.mxu0 }
 0x11f   : > { %v3742_v59 = vadd.f32 %v2587_v56, %v1556_v54  ;;  %v2526_v62 = vadd.f32 %v2525_v58, %v2524_v52 }
 0x120   : > { %v2589_v63 = vpop.f32.mrf.mxu1  ;;  %v2527_v1 = vpop.f32.mrf.mxu0 }
 0x121   : > { %v1559_v4 = vadd.f32 %v2526_v62, %v3709_v9  ;;  %v2590_v5 = vadd.f32 %v2589_v63, %v2588_v57 }
 0x122   : > { %v2591_v49 = vpop.f32.mrf.mxu1  ;;  %v2528_v7 = vpop.f32.mrf.mxu0 }
 0x123   : > { %v3745_v8 = vadd.f32 %v2590_v5, %v1559_v4  ;;  %v2529_v10 = vadd.f32 %v2528_v7, %v2527_v1 }
 0x124   : > { %v2592_v12 = vpop.f32.mrf.mxu1  ;;  %v2530_v34 = vpop.f32.mrf.mxu0 }
 0x125   : > { %v1564_v38 = vadd.f32 %v2529_v10, %v3709_v9  ;;  %v2593_v60 = vadd.f32 %v2592_v12, %v2591_v49 }
 0x126   : > { %v2594_v6 = vpop.f32.mrf.mxu1  ;;  %v2531_v27 = vpop.f32.mrf.mxu0 }
 0x127   : > { %v3748_v35 = vadd.f32 %v2593_v60, %v1564_v38  ;;  %v2532_v11 = vadd.f32 %v2531_v27, %v2530_v34 }
 0x128   : > { %v2595_v16 = vpop.f32.mrf.mxu1  ;;  %v2533_v19 = vpop.f32.mrf.mxu0 }
 0x129   : > { %3939 = vst [vmem:[#allocation6_spill] sm:$0xff] %v3748_v35  ;;  %v1567_v3 = vadd.f32 %v2532_v11, %v3709_v9  ;;  %v2596_v17 = vadd.f32 %v2595_v16, %v2594_v6 }
 0x12a   : > { %v2597_v20 = vpop.f32.mrf.mxu1  ;;  %v2534_v22 = vpop.f32.mrf.mxu0 }
 0x12b   : > { %v3751_v36 = vadd.f32 %v2596_v17, %v1567_v3  ;;  %v2535_v47 = vadd.f32 %v2534_v22, %v2533_v19 }
 0x12c   : > { %v2598_v24 = vpop.f32.mrf.mxu1  ;;  %v2536_v25 = vpop.f32.mrf.mxu0 }
 0x12d   : > { %3940 = vst [vmem:[#allocation7_spill] sm:$0xff] %v3751_v36  ;;  %v1572_v13 = vadd.f32 %v2535_v47, %v3709_v9  ;;  %v2599_v21 = vadd.f32 %v2598_v24, %v2597_v20 }
 0x12e   : > { %v2600_v26 = vpop.f32.mrf.mxu1  ;;  %v2537_v53 = vpop.f32.mrf.mxu0 }
 0x12f   : > { %v3754_v41 = vadd.f32 %v2599_v21, %v1572_v13  ;;  %v2538_v42 = vadd.f32 %v2537_v53, %v2536_v25 }
 0x130   : > { %v2601_v28 = vpop.f32.mrf.mxu1  ;;  %v2619_v29 = vpop.f32.mrf.mxu0 }
 0x131   : > { %3941 = vst [vmem:[#allocation8_spill] sm:$0xff] %v3754_v41  ;;  %v1575_v30 = vadd.f32 %v2538_v42, %v3709_v9  ;;  %v2602_v15 = vadd.f32 %v2601_v28, %v2600_v26 }
 0x132   : > { %v2683_v32 = vpop.f32.mrf.mxu1  ;;  %v2620_v37 = vpop.f32.mrf.mxu0 }
 0x133   : > { %v3757_v39 = vadd.f32 %v2602_v15, %v1575_v30  ;;  %v2621_v35 = vadd.f32 %v2620_v37, %v2619_v29 }
 0x134   : > { %v2684_v40 = vpop.f32.mrf.mxu1  ;;  %v2622_v43 = vpop.f32.mrf.mxu0 }
 0x135   : > { %3942 = vst [vmem:[#allocation9_spill] sm:$0xff] %v3757_v39 }
 0x136   : > { %v2686_v18 = vpop.f32.mrf.mxu1  ;;  %v2623_v45 = vpop.f32.mrf.mxu0 }
 0x138   : > { %v2687_v46 = vpop.f32.mrf.mxu1  ;;  %v2625_v50 = vpop.f32.mrf.mxu0 }
 0x13a   : > { %v2689_v51 = vpop.f32.mrf.mxu1  ;;  %v2626_v52 = vpop.f32.mrf.mxu0 }
 0x13c   : > { %v2690_v54 = vpop.f32.mrf.mxu1  ;;  %v2628_v56 = vpop.f32.mrf.mxu0 }
 0x13e   : > { %v2692_v57 = vpop.f32.mrf.mxu1  ;;  %v2629_v58 = vpop.f32.mrf.mxu0 }
 0x140   : > { %v2693_v62 = vpop.f32.mrf.mxu1  ;;  %v2631_v63 = vpop.f32.mrf.mxu0 }
 0x142   : > { %v3759_v9 = vpop.f32.mrf.mxu1  ;;  %v2632_v1 = vpop.f32.mrf.mxu0 }
 0x144   : > { %v3761_v4 = vpop.f32.mrf.mxu1  ;;  %v3763_v5 = vpop.f32.mrf.mxu0 }
 0x146   : > { %v3765_v49 = vpop.f32.mrf.mxu1  ;;  %v3767_v7 = vpop.f32.mrf.mxu0 }
 0x147   : > { %3943 = vst [vmem:[#allocation10_spill] sm:$0xff] %v3765_v49 }
 0x148   : > { %v3769_v10 = vpop.f32.mrf.mxu1  ;;  %v2637_v12 = vpop.f32.mrf.mxu0 }
 0x149   : > { %3944 = vst [vmem:[#allocation11_spill] sm:$0xff] %v3769_v10 }
 0x14a   : > { %v3771_v34 = vpop.f32.mrf.mxu1  ;;  %v2638_v38 = vpop.f32.mrf.mxu0 }
 0x14b   : > { %3945 = vst [vmem:[#allocation12_spill] sm:$0xff] %v3771_v34  ;;  %v2685_v34 = vadd.f32 %v2684_v40, %v2683_v32 }
 0x14c   : > { %v3773_v60 = vpop.f32.mrf.mxu1  ;;  %v3775_v6 = vpop.f32.mrf.mxu0 }
 0x14d   : > { %3946 = vst [vmem:[#allocation13_spill] sm:$0xff] %v3773_v60  ;;  %v1710_v60 = vadd.f32 %v2621_v35, %v3712_v31 }
 0x14e   : > { %v3777_v27 = vpop.f32.mrf.mxu1  ;;  %v3779_v11 = vpop.f32.mrf.mxu0 }
 0x14f   : > { %3947 = vst [vmem:[#allocation14_spill] sm:$0xff] %v3777_v27  ;;  %v2627_v27 = vadd.f32 %v2626_v52, %v2625_v50  ;;  %v2694_v52 = vadd.f32 %v2693_v62, %v2692_v57  ;;  %v1807_v40 = vadd.f32 %v2685_v34, %v1710_v60 }
 0x150   : > { %v3781_v16 = vpop.f32.mrf.mxu1  ;;  %v2643_v19 = vpop.f32.mrf.mxu0 }
 0x151   : > { %3948 = vst [vmem:[#allocation15_spill] sm:$0xff] %v3781_v16  ;;  %v2624_v16 = vadd.f32 %v2623_v45, %v2622_v43  ;;  %v2691_v45 = vadd.f32 %v2690_v54, %v2689_v51 }
 0x152   : > { %v2707_v3 = vpop.f32.mrf.mxu1  ;;  %v2644_v17 = vpop.f32.mrf.mxu0 }
 0x153   : > { %v1713_v23 = vadd.f32 %v2624_v16, %v3715_v44  ;;  %v2645_v29 = vadd.f32 %v2644_v17, %v2643_v19  ;;  %v2639_v44 = vadd.f32 %v2638_v38, %v2637_v12  ;;  %v3955_v12 = vld [vmem:[#allocation3_spill] sm:$0xff]  ;;  %v3956_v38 = vld [vmem:[#allocation12_spill] sm:$0xff] }
 0x154   : > { %v2708_v20 = vpop.f32.mrf.mxu1  ;;  %v2646_v22 = vpop.f32.mrf.mxu0 }
 0x155   : > { %v1734_v34 = vadd.f32 %v2639_v44, %v3955_v12 }
 0x156   : > { %v3783_v47 = vpop.f32.mrf.mxu1  ;;  %v2647_v24 = vpop.f32.mrf.mxu0 }
 0x157   : > { %3949 = vst [vmem:[#allocation16_spill] sm:$0xff] %v3783_v47 }
 0x158   : > { %v3785_v25 = vpop.f32.mrf.mxu1  ;;  %v2649_v13 = vpop.f32.mrf.mxu0 }
 0x159   : > { %3950 = vst [vmem:[#allocation17_spill] sm:$0xff] %v3785_v25  ;;  %v2630_v25 = vadd.f32 %v2629_v58, %v2628_v56  ;;  %v2633_v56 = vadd.f32 %v2632_v1, %v2631_v63 }
 0x15a   : > { %v2713_v21 = vpop.f32.mrf.mxu1  ;;  %v2650_v26 = vpop.f32.mrf.mxu0 }
 0x15b   : > { %v1721_v50 = vadd.f32 %v2630_v25, %v3721_v2  ;;  %v1726_v51 = vadd.f32 %v2633_v56, %v3724_v14  ;;  %v2648_v2 = vadd.f32 %v2647_v24, %v2646_v22  ;;  %v3961_v22 = vld [vmem:[#allocation8_spill] sm:$0xff] }
 0x15c   : > { %v2714_v53 = vpop.f32.mrf.mxu1  ;;  %v2652_v42 = vpop.f32.mrf.mxu0 }
 0x15d   : > { %v2715_v35 = vadd.f32 %v2714_v53, %v2713_v21  ;;  %v1818_v57 = vadd.f32 %v2694_v52, %v1721_v50 }
 0x15e   : > { %v2716_v28 = vpop.f32.mrf.mxu1  ;;  %v2653_v30 = vpop.f32.mrf.mxu0  ;;  %v3959_v19 = vld [vmem:[#allocation16_spill] sm:$0xff] }
 0x15f   : > { %v2654_v32 = vadd.f32 %v2653_v30, %v2652_v42 }
 0x160   : > { %v2717_v15 = vpop.f32.mrf.mxu1  ;;  %v2655_v36 = vpop.f32.mrf.mxu0 }
 0x161   : > { %v1753_v62 = vadd.f32 %v2654_v32, %v3745_v8  ;;  %v2718_v63 = vadd.f32 %v2717_v15, %v2716_v28  ;;  %v3963_v15 = vld [vmem:[#allocation14_spill] sm:$0xff] }
 0x162   : > { %v3787_v39 = vpop.f32.mrf.mxu1  ;;  %v2656_v10 = vpop.f32.mrf.mxu0 }
 0x163   : > { %3951 = vst [vmem:[#allocation18_spill] sm:$0xff] %v3787_v39  ;;  %v2651_v39 = vadd.f32 %v2650_v26, %v2649_v13  ;;  %v2657_v60 = vadd.f32 %v2656_v10, %v2655_v36  ;;  %v3962_v26 = vld [vmem:[#allocation4_spill] sm:$0xff]  ;;  %v1850_v30 = vadd.f32 %v2718_v63, %v1753_v62  ;;  %v3973_v63 = vld [vmem:[#allocation7_spill] sm:$0xff] }
 0x164   : > { %v3789_v49 = vpop.f32.mrf.mxu1  ;;  %v3791_v0 = vpop.f32.mrf.mxu0 }
 0x165   : > { %3952 = vst [vmem:[#allocation19_spill] sm:$0xff] %v3789_v49  ;;  %3953 = vst [vmem:[#allocation20_spill] sm:$0xff] %v3791_v0  ;;  %v2688_v49 = vadd.f32 %v2687_v46, %v2686_v18  ;;  %v1718_v0 = vadd.f32 %v2627_v27, %v3718_v55  ;;  %v1750_v31 = vadd.f32 %v2651_v39, %v3742_v59 }
 0x166   : > { %v3793_v61 = vpop.f32.mrf.mxu1  ;;  %v3795_v41 = vpop.f32.mrf.mxu0  ;;  %v1742_v18 = vadd.f32 %v2645_v29, %v3736_v33  ;;  %v2709_v55 = vadd.f32 %v2708_v20, %v2707_v3  ;;  %v2697_v59 = vadd.f32 %v3761_v4, %v3759_v9  ;;  %v2636_v33 = vadd.f32 %v3767_v7, %v3763_v5  ;;  %v3957_v9 = vld [vmem:[#allocation13_spill] sm:$0xff]  ;;  %v3964_v29 = vld [vmem:[#allocation15_spill] sm:$0xff] }
 0x167   : > { %v1810_v16 = vadd.f32 %v2688_v49, %v1713_v23  ;;  %v1815_v54 = vadd.f32 %v2691_v45, %v1718_v0  ;;  %v2642_v23 = vadd.f32 %v3779_v11, %v3775_v6  ;;  %v1847_v49 = vadd.f32 %v2715_v35, %v1750_v31  ;;  %v3960_v3 = vld [vmem:[#allocation17_spill] sm:$0xff] }
 0x168   : > { %v3797_v47 = vpop.f32.mrf.mxu1  ;;  %v2661_v48 = vpop.f32.mrf.mxu0  ;;  %v2703_v4 = vadd.f32 %v3957_v9, %v3956_v38  ;;  %v1839_v6 = vadd.f32 %v2709_v55, %v1742_v18  ;;  %v2712_v8 = vadd.f32 %v3960_v3, %v3959_v19  ;;  %v1823_v21 = vadd.f32 %v2697_v59, %v1726_v51  ;;  %v3969_v55 = vld [vmem:[#allocation2_spill] sm:$0xff] }
 0x169   : > { %3954 = vst [vmem:[#allocation21_spill] sm:$0xff] %v3797_v47  ;;  %v1737_v53 = vadd.f32 %v2642_v23, %v3962_v26  ;;  %v3970_v51 = vld [vmem:[#allocation10_spill] sm:$0xff] }
 0x16a   : > { %v2725_v37 = vpop.f32.mrf.mxu1  ;;  %v2662_v43 = vpop.f32.mrf.mxu0  ;;  %v3966_v45 = vld [vmem:[#allocation18_spill] sm:$0xff]  ;;  %v1831_v18 = vadd.f32 %v2703_v4, %v1734_v34 }
 0x16b   : > { %v2663_v14 = vadd.f32 %v2662_v43, %v2661_v48  ;;  %v3958_v48 = vld [vmem:[#allocation5_spill] sm:$0xff] }
 0x16c   : > { %v2726_v58 = vpop.f32.mrf.mxu1  ;;  %v2664_v47 = vpop.f32.mrf.mxu0  ;;  %v1745_v11 = vadd.f32 %v2648_v2, %v3958_v48  ;;  %v3967_v50 = vld [vmem:[#allocation19_spill] sm:$0xff]  ;;  %v3968_v56 = vld [vmem:[#allocation20_spill] sm:$0xff] }
 0x16d   : > { %v1766_v24 = vadd.f32 %v2663_v14, %v3961_v22  ;;  %v2727_v25 = vadd.f32 %v2726_v58, %v2725_v37  ;;  %v2706_v37 = vadd.f32 %v3964_v29, %v3963_v15  ;;  %v2721_v52 = vadd.f32 %v3967_v50, %v3966_v45  ;;  %v3971_v2 = vld [vmem:[#allocation11_spill] sm:$0xff] }
 0x16e   : > { %v2728_v46 = vpop.f32.mrf.mxu1  ;;  %v2665_v27 = vpop.f32.mrf.mxu0  ;;  %v2660_v58 = vadd.f32 %v3795_v41, %v3968_v56  ;;  %v1842_v44 = vadd.f32 %v2712_v8, %v1745_v11  ;;  %v3972_v41 = vld [vmem:[#allocation9_spill] sm:$0xff] }
 0x16f   : > { %v2666_v36 = vadd.f32 %v2665_v27, %v2664_v47  ;;  %v3965_v47 = vld [vmem:[#allocation6_spill] sm:$0xff]  ;;  %v1729_v27 = vadd.f32 %v2636_v33, %v3969_v55  ;;  %v1863_v14 = vadd.f32 %v2727_v25, %v1766_v24  ;;  %v1834_v9 = vadd.f32 %v2706_v37, %v1737_v53 }
 0x170   : > { %v2729_v39 = vpop.f32.mrf.mxu1  ;;  %v2765_v0 = vpop.f32.mrf.mxu0  ;;  %v1758_v43 = vadd.f32 %v2657_v60, %v3965_v47  ;;  %v3974_v4 = vld [vmem:[#allocation21_spill] sm:$0xff] }
 0x171   : > { %v3820_v1 = vadd.f32 %v2765_v0, %v1815_v54  ;;  %v2700_v54 = vadd.f32 %v3971_v2, %v3970_v51  ;;  %v2730_v0 = vadd.f32 %v2729_v39, %v2728_v46  ;;  %v2724_v46 = vadd.f32 %v3974_v4, %v3793_v61 }
 0x172   : > { %v2773_v5 = vpop.f32.mrf.mxu1  ;;  %v1903_v7 = vpop.f32.mrf.mxu0  ;;  %v1855_v38 = vadd.f32 %v2721_v52, %v1758_v43 }
 0x173   : > { %1968 = vst [vmem:[%s3811_s21 + $0x10] sm:$0xff] %v3820_v1  ;;  %v3830_v17 = vadd.f32 %v2773_v5, %v1847_v49  ;;  %v3832_v20 = vadd.f32 %v1903_v7, %v1807_v40  ;;  %v1761_v49 = vadd.f32 %v2660_v58, %v3973_v63  ;;  %v1826_v48 = vadd.f32 %v2700_v54, %v1729_v27 }
 0x174   : > { %v1935_v10 = vpop.f32.mrf.mxu1  ;;  %v2766_v13 = vpop.f32.mrf.mxu0 }
 0x175   : > { %1976 = vst [vmem:[%s3811_s21 + $0x50] sm:$0xff] %v3830_v17  ;;  %1966 = vst [vmem:[%s3811_s21] sm:$0xff] %v3832_v20  ;;  %v3840_v42 = vadd.f32 %v1935_v10, %v1839_v6  ;;  %v3842_v28 = vadd.f32 %v2766_v13, %v1818_v57  ;;  %v1769_v57 = vadd.f32 %v2666_v36, %v3972_v41 }
 0x176   : > { %v2774_v31 = vpop.f32.mrf.mxu1  ;;  %v1906_v35 = vpop.f32.mrf.mxu0  ;;  %v1858_v10 = vadd.f32 %v2724_v46, %v1761_v49 }
 0x177   : > { %1974 = vst [vmem:[%s3811_s21 + $0x40] sm:$0xff] %v3840_v42  ;;  %1969 = vst [vmem:[%s3811_s21 + $0x18] sm:$0xff] %v3842_v28  ;;  %v3855_v32 = vadd.f32 %v2774_v31, %v1850_v30  ;;  %v3857_v40 = vadd.f32 %v1906_v35, %v1810_v16  ;;  %v1866_v61 = vadd.f32 %v2730_v0, %v1769_v57 }
 0x178   : > { %v1938_v59 = vpop.f32.mrf.mxu1  ;;  %v2769_v23 = vpop.f32.mrf.mxu0 }
 0x179   : > { %1977 = vst [vmem:[%s3811_s21 + $0x58] sm:$0xff] %v3855_v32  ;;  %1967 = vst [vmem:[%s3811_s21 + $0x8] sm:$0xff] %v3857_v40  ;;  %v1982_v16 = vadd.f32 %v3857_v40, %v3832_v20  ;;  %v1939_v62 = vadd.f32 %v1938_v59, %v1842_v44  ;;  %v1928_v33 = vadd.f32 %v2769_v23, %v1831_v18 }
 0x17a   : > { %v2777_v12 = vpop.f32.mrf.mxu1  ;;  %v1919_v34 = vpop.f32.mrf.mxu0 }
 0x17b   : > { %v1983_v39 = vadd.f32 %v1982_v16, %v3820_v1  ;;  %1975 = vst [vmem:[%s3811_s21 + $0x48] sm:$0xff] %v1939_v62  ;;  %1972 = vst [vmem:[%s3811_s21 + $0x30] sm:$0xff] %v1928_v33  ;;  %v1960_v60 = vadd.f32 %v2777_v12, %v1863_v14  ;;  %v1920_v5 = vadd.f32 %v1919_v34, %v1823_v21 }
 0x17c   : > { %v1951_v7 = vpop.f32.mrf.mxu1  ;;  %v2770_v6 = vpop.f32.mrf.mxu0 }
 0x17d   : > { %1980 = vst [vmem:[%s3811_s21 + $0x70] sm:$0xff] %v1960_v60  ;;  %1970 = vst [vmem:[%s3811_s21 + $0x20] sm:$0xff] %v1920_v5  ;;  %v1984_v11 = vadd.f32 %v1983_v39, %v3842_v28  ;;  %v1952_v19 = vadd.f32 %v1951_v7, %v1855_v38  ;;  %v1931_v3 = vadd.f32 %v2770_v6, %v1834_v9 }
 0x17e   : > { %v2778_v8 = vpop.f32.mrf.mxu1  ;;  %v1922_v22 = vpop.f32.mrf.mxu0 }
 0x17f   : > { %v1985_v24 = vadd.f32 %v1984_v11, %v1920_v5  ;;  %1978 = vst [vmem:[%s3811_s21 + $0x60] sm:$0xff] %v1952_v19  ;;  %1973 = vst [vmem:[%s3811_s21 + $0x38] sm:$0xff] %v1931_v3  ;;  %v1963_v25 = vadd.f32 %v2778_v8, %v1866_v61  ;;  %v1923_v36 = vadd.f32 %v1922_v22, %v1826_v48 }
 0x180   : > { %v1954_v13 = vpop.f32.mrf.mxu1 }
 0x181   : > { %1981 = vst [vmem:[%s3811_s21 + $0x78] sm:$0xff] %v1963_v25  ;;  %1971 = vst [vmem:[%s3811_s21 + $0x28] sm:$0xff] %v1923_v36  ;;  %v1986_v21 = vadd.f32 %v1985_v24, %v1923_v36  ;;  %v1955_v26 = vadd.f32 %v1954_v13, %v1858_v10 }
 0x183   : > { %v1987_v53 = vadd.f32 %v1986_v21, %v1928_v33  ;;  %1979 = vst [vmem:[%s3811_s21 + $0x68] sm:$0xff] %v1955_v26 }
 0x185   : > { %v1988_v30 = vadd.f32 %v1987_v53, %v1931_v3 }
 0x187   : > { %v1989_v15 = vadd.f32 %v1988_v30, %v3840_v42 }
 0x189   : > { %v1990_v29 = vadd.f32 %v1989_v15, %v1939_v62 }
 0x18b   : > { %v1991_v37 = vadd.f32 %v1990_v29, %v3830_v17 }
 0x18d   : > { %v1992_v47 = vadd.f32 %v1991_v37, %v3855_v32 }
 0x18f   : > { %v1993_v43 = vadd.f32 %v1992_v47, %v1952_v19 }
 0x191   : > { %v1994_v45 = vadd.f32 %v1993_v43, %v1955_v26 }
 0x193   : > { %v1995_v50 = vadd.f32 %v1994_v45, %v1960_v60 }
 0x195   : > { %v1996_v52 = vadd.f32 %v1995_v50, %v1963_v25 }
 0x197   : > { %v1997_v56 = vrot.slane %v1996_v52, 4 }
 0x199   : > { %v1998_v58 = vadd.f32 %v1997_v56, %v1996_v52 }
 0x19b   : > { %v1999_v31 = vrot.slane %v1998_v58, 2 }
 0x19d   : > { %v2000_v35 = vadd.f32 %v1999_v31, %v1998_v58 }
 0x19f   : > { %v2001_v44 = vrot.slane %v2000_v35, 1 }
 0x1a1   : > { %v2002_v18 = vadd.f32 %v2001_v44, %v2000_v35 }
 0x1a3   : > { %v2004_v55 = vmul.f32 0.0078125, %v2002_v18 }
 0x1a5   : > { %v2005_v27 = vsub.f32 %v3832_v20, %v2004_v55  ;;  %v2006_v51 = vsub.f32 %v3857_v40, %v2004_v55  ;;  %v2007_v2 = vsub.f32 %v3820_v1, %v2004_v55  ;;  %v2008_v54 = vsub.f32 %v3842_v28, %v2004_v55 }
 0x1a6   : > { %v2009_v41 = vsub.f32 %v1920_v5, %v2004_v55  ;;  %v2010_v57 = vsub.f32 %v1923_v36, %v2004_v55  ;;  %v2011_v59 = vsub.f32 %v1928_v33, %v2004_v55  ;;  %v2012_v23 = vsub.f32 %v1931_v3, %v2004_v55 }
 0x1a7   : > { %v2013_v14 = vsub.f32 %v3840_v42, %v2004_v55  ;;  %v2014_v0 = vsub.f32 %v1939_v62, %v2004_v55  ;;  %v2015_v16 = vsub.f32 %v3830_v17, %v2004_v55  ;;  %v2016_v63 = vsub.f32 %v3855_v32, %v2004_v55 }
 0x1a8   : > { %v2017_v49 = vsub.f32 %v1952_v19, %v2004_v55  ;;  %v2018_v12 = vsub.f32 %v1955_v26, %v2004_v55  ;;  %v2019_v20 = vsub.f32 %v1960_v60, %v2004_v55  ;;  %v2020_v34 = vsub.f32 %v1963_v25, %v2004_v55 }
 0x1a9   : > { %v2021_v40 = vmul.f32 %v2005_v27, %v2005_v27  ;;  %v2022_v38 = vmul.f32 %v2006_v51, %v2006_v51  ;;  %v2023_v1 = vmul.f32 %v2007_v2, %v2007_v2  ;;  %v2024_v28 = vmul.f32 %v2008_v54, %v2008_v54 }
 0x1aa   : > { %v2025_v46 = vmul.f32 %v2009_v41, %v2009_v41  ;;  %v2026_v39 = vmul.f32 %v2010_v57, %v2010_v57  ;;  %v2027_v42 = vmul.f32 %v2011_v59, %v2011_v59  ;;  %v2028_v7 = vmul.f32 %v2012_v23, %v2012_v23 }
 0x1ab   : > { %v2037_v9 = vadd.f32 %v2022_v38, %v2021_v40  ;;  %v2029_v32 = vmul.f32 %v2013_v14, %v2013_v14  ;;  %v2030_v48 = vmul.f32 %v2014_v0, %v2014_v0  ;;  %v2031_v11 = vmul.f32 %v2015_v16, %v2015_v16 }
 0x1ac   : > { %v2032_v3 = vmul.f32 %v2016_v63, %v2016_v63  ;;  %v2033_v8 = vmul.f32 %v2017_v49, %v2017_v49  ;;  %v2034_v24 = vmul.f32 %v2018_v12, %v2018_v12  ;;  %v2035_v36 = vmul.f32 %v2019_v20, %v2019_v20 }
 0x1ad   : > { %v2038_v4 = vadd.f32 %v2037_v9, %v2023_v1  ;;  %v2036_v13 = vmul.f32 %v2020_v34, %v2020_v34 }
 0x1af   : > { %v2039_v33 = vadd.f32 %v2038_v4, %v2024_v28 }
 0x1b1   : > { %v2040_v5 = vadd.f32 %v2039_v33, %v2025_v46 }
 0x1b3   : > { %v2041_v62 = vadd.f32 %v2040_v5, %v2026_v39 }
 0x1b5   : > { %v2042_v17 = vadd.f32 %v2041_v62, %v2027_v42 }
 0x1b7   : > { %v2043_v6 = vadd.f32 %v2042_v17, %v2028_v7 }
 0x1b9   : > { %v2044_v60 = vadd.f32 %v2043_v6, %v2029_v32 }
 0x1bb   : > { %v2045_v19 = vadd.f32 %v2044_v60, %v2030_v48 }
 0x1bd   : > { %v2046_v61 = vadd.f32 %v2045_v19, %v2031_v11 }
 0x1bf   : > { %v2047_v22 = vadd.f32 %v2046_v61, %v2032_v3 }
 0x1c1   : > { %v2048_v25 = vadd.f32 %v2047_v22, %v2033_v8 }
 0x1c3   : > { %v2049_v10 = vadd.f32 %v2048_v25, %v2034_v24 }
 0x1c5   : > { %v2050_v21 = vadd.f32 %v2049_v10, %v2035_v36 }
 0x1c7   : > { %v2051_v26 = vadd.f32 %v2050_v21, %v2036_v13 }
 0x1c9   : > { %v2052_v53 = vrot.slane %v2051_v26, 4 }
 0x1cb   : > { %v2053_v30 = vadd.f32 %v2052_v53, %v2051_v26 }
 0x1cd   : > { %v2054_v15 = vrot.slane %v2053_v30, 2 }
 0x1cf   : > { %v2055_v29 = vadd.f32 %v2054_v15, %v2053_v30 }
 0x1d1   : > { %v2056_v37 = vrot.slane %v2055_v29, 1 }
 0x1d3   : > { %v2057_v47 = vadd.f32 %v2056_v37, %v2055_v29 }
 0x1d5   : > { %v2058_v43 = vsel %vm625_vm2, %v2002_v18, %v2057_v47 }
 0x1d6   : > { %2059 = vst [vmem:[%s494_s11] sm:$0x3] %v2058_v43 }
 0x1d7 PF: > { %s19_s9 = sadd.s32 1, %s2946_s9   ;;  %s3975_s27 = smov %s2938_s29 }
 0x1d8   : > { %p16_p11 = scmp.ge.s32.totalorder %s19_s9, 6   ;;  %s3976_s28 = smov %s2942_s30 }
 0x1d9   : > { %s3977_s29 = smov %s3980_s5  ;;  %s3978_s30 = smov %s3984_s6 }
 0x1da   :  { %18 = sbr.rel (!%p16_p11) target bundleno = 3 (0x3), region = 96 }

// kernel: inconv_forward.4
= control target key start
LH: loop header
LB: loop body
LE: loop exit
PB: predicated region body
PF: predicated region fallthrough
CT: control target
= control target key end

     0   :  { %s3070_s27 = smov 0   ;;  %s3072_s28 = smov 0   ;;  %s4067_s0 = inlined_call_operand.vmem [shape: f32[2,16,16,128], index: 0, kind: input, shape index: {}, may-alias: {0,1,2}]   ;;  %s4068_s1 = inlined_call_operand.vmem [shape: f32[2,16,16,128], index: 1, kind: input, shape index: {}, may-alias: {0,1,2}]   ;;  %s4069_s2 = inlined_call_operand.vmem [shape: f32[2,16,16,128], index: 2, kind: input, shape index: {}, may-alias: {0,1,2}]   ;;  %s4070_s3 = inlined_call_operand.vmem [shape: bf16[1152,128], index: 3, kind: input, shape index: {}]   ;;  %s4071_s4 = inlined_call_operand.vmem [shape: f32[1,128], index: 4, kind: input, shape index: {}]   ;;  %s4072_s5 = inlined_call_operand.vmem [shape: f32[1,128], index: 5, kind: input, shape index: {}]   ;;  %s4073_s6 = inlined_call_operand.vmem [shape: f32[1,128], index: 6, kind: input, shape index: {}]   ;;  %s4074_s7 = inlined_call_operand.vmem [shape: f32[2,16,16,128], index: 7, kind: output, shape index: {0}]   ;;  %s4075_s8 = inlined_call_operand.vmem [shape: f32[2,2,2,128], index: 8, kind: output, shape index: {1}]  }
   0x1   :  { %s3074_s29 = smov 0   ;;  %s3076_s30 = smov 0  }
   0x2   :  { %s3078_s9 = smov 0  }
   0x3 LB: > { %s28_s10 = sadd.s32 1, %s3014_s29  ;;  %s31_s11 = sadd.s32 1, %s3018_s30  ;;  %s3022_s9 = sphi %s3078_s9, %s19_s9   ;;  %s3018_s30 = sphi %s3076_s30, %s4138_s30   ;;  %s3014_s29 = sphi %s3074_s29, %s4137_s29   ;;  %s3010_s28 = sphi %s3072_s28, %s4136_s28   ;;  %s3006_s27 = sphi %s3070_s27, %s4135_s27  }
   0x4   : > { %p29_p0 = scmp.ge.s32.totalorder %s28_s10, 2  ;;  %p2332_p1 = scmp.ge.s32.totalorder %s3022_s9, 1 }
   0x5   : > { %p353_p2 = scmp.lt.s32.totalorder %s3022_s9, 5 }
   0x6   : > { %s4140_s10 = smov (%p29_p0, %s28_s10), 0  ;;  %s4142_s11 = smov (!%p29_p0, %s31_s11), %s3018_s30 }
   0x7   : > { %p354_p3 = pnand %p2332_p1, %p353_p2  ;;  %p33_p4 = scmp.ge.s32.totalorder %s4142_s11, 2 }
   0x9   : > { %s4144_s11 = smov (%p33_p4, %s4142_s11), 0  ;;  %357 = sbr.rel (%p354_p3) target bundleno = 471 (0x1d7), region = 48 }
   0xa   : > { %4076 = sst [smem:[#allocation2_spill]] %s4144_s11 }
   0xe   : > { %v2912_v0 = vld [vmem:[%s4070_s3 + $0x78] sm:$0xff]   ;;  %v2916_v4 = vld [vmem:[%s4070_s3 + $0x70] sm:$0xff]   ;;  %s3120_s22 = sshll.u32 %s3006_s27, 3  ;;  %v2920_v8 = vld [vmem:[%s4070_s3 + $0x68] sm:$0xff]   ;;  %p432_p5 = scmp.lt.s32.totalorder %s3010_s28, 1  ;;  %vm699_vm2 = vcmask 1040384  }
   0xf   : > { %v2913_v1 = vld [vmem:[%s4070_s3 + $0xf8] sm:$0xff]   ;;  %2551 = vmatprep.subr.bf16.mxu0 %v2912_v0  ;;  %v2917_v5 = vld [vmem:[%s4070_s3 + $0xf0] sm:$0xff]   ;;  %s2338_s14 = sadd.s32 4294967295, %s3120_s22  ;;  %v2921_v9 = vld [vmem:[%s4070_s3 + $0xe8] sm:$0xff]   ;;  %p434_p7 = scmp.lt.s32.totalorder %s3120_s22, 15  ;;  %v3193_v23 = vstv %s3120_s22  ;;  %vm796_vm5 = vcmask 1046528  }
  0x10   : > { %v2914_v2 = vld [vmem:[%s4070_s3 + $0x38] sm:$0xff]   ;;  %2615 = vmatprep.subr.bf16.mxu1 %v2913_v1  ;;  %v2918_v6 = vld [vmem:[%s4070_s3 + $0x30] sm:$0xff]   ;;  %p444_p6 = scmp.gt.s32.totalorder %s2338_s14, 0  ;;  %v2922_v10 = vld [vmem:[%s4070_s3 + $0x28] sm:$0xff]   ;;  %p2339_p8 = scmp.lt.s32.totalorder %s2338_s14, 15  ;;  %v2363_v27 = vadd.s32 4294967295, %v3193_v23 }
  0x11   : > { %v2915_v3 = vld [vmem:[%s4070_s3 + $0xb8] sm:$0xff]   ;;  %2552 = vmatpush3.bf16.msra.mxu0 %v2914_v2  ;;  %v2919_v7 = vld [vmem:[%s4070_s3 + $0xb0] sm:$0xff]   ;;  %v2923_v11 = vld [vmem:[%s4070_s3 + $0xa8] sm:$0xff]   ;;  %s435_s17 = scalar_select %p434_p7, %s3120_s22, 15  ;;  %v592_v30 = vadd.s32 2, %v3193_v23  ;;  %v593_v34 = vadd.s32 3, %v3193_v23 }
  0x12   : > { %2616 = vmatpush3.bf16.msra.mxu1 %v2915_v3  ;;  %2553 = vmatprep.subr.bf16.mxu0 %v2916_v4  ;;  %v2924_v12 = vld [vmem:[%s4070_s3 + $0x60] sm:$0xff]   ;;  %s445_s26 = scalar_select %p444_p6, %s2338_s14, 0  ;;  %v2928_v16 = vld [vmem:[%s4070_s3 + $0x58] sm:$0xff]   ;;  %v2932_v20 = vld [vmem:[%s4070_s3 + $0x50] sm:$0xff]   ;;  %vm609_vm0 = vcmp.ge.s32.totalorder %v2363_v27, 0  ;;  %vm619_vm1 = vcmp.lt.s32.totalorder %v2363_v27, 16 }
  0x13   : > { %2617 = vmatprep.subr.bf16.mxu1 %v2917_v5  ;;  %v2925_v13 = vld [vmem:[%s4070_s3 + $0xe0] sm:$0xff]   ;;  %s4146_s28 = smov (!%p432_p5, %s3010_s28), 1  ;;  %v2929_v17 = vld [vmem:[%s4070_s3 + $0xd8] sm:$0xff]   ;;  %s2334_s13 = sshll.u32 %s435_s17, 1  ;;  %v2933_v21 = vld [vmem:[%s4070_s3 + $0xd0] sm:$0xff]   ;;  %v3237_v36 = vadd.s32 4294967295, %v592_v30 }
  0x14   : > { %v2926_v14 = vld [vmem:[%s4070_s3 + $0x20] sm:$0xff]   ;;  %s4148_s26 = smov (!%p2339_p8, %s445_s26), 15  ;;  %v2930_v18 = vld [vmem:[%s4070_s3 + $0x18] sm:$0xff]   ;;  %s3178_s18 = sshll.u32 %s4146_s28, 5  ;;  %v2934_v22 = vld [vmem:[%s4070_s3 + $0x10] sm:$0xff]   ;;  %vm610_vm3 = vcmp.ge.s32.totalorder %v3193_v23, 0 }
  0x15   : > { %2554 = vmatpush3.bf16.msra.mxu0 %v2918_v6  ;;  %v2927_v15 = vld [vmem:[%s4070_s3 + $0xa0] sm:$0xff]   ;;  %v2931_v19 = vld [vmem:[%s4070_s3 + $0x98] sm:$0xff]   ;;  %s2344_s20 = sshll.u32 %s4148_s26, 1  ;;  %s3187_s17 = sadd.s32 %s3178_s18, %s2334_s13  ;;  %v2935_v24 = vld [vmem:[%s4070_s3 + $0x90] sm:$0xff]   ;;  %vm620_vm4 = vcmp.lt.s32.totalorder %v3193_v23, 16  ;;  %v3256_v46 = vadd.s32 4294967295, %v593_v34 }
  0x16   : > { %2618 = vmatpush3.bf16.msra.mxu1 %v2919_v7  ;;  %2555 = vmatprep.subr.bf16.mxu0 %v2920_v8  ;;  %s452_s26 = sadd.s32 %s2344_s20, %s3178_s18  ;;  %v2936_v25 = vld [vmem:[%s4070_s3 + $0x48] sm:$0xff]   ;;  %s2336_s13 = sshll.u32 %s3187_s17, 3  ;;  %v2940_v31 = vld [vmem:[%s4070_s3 + $0x40] sm:$0xff]   ;;  %v594_v47 = vadd.s32 4, %v3193_v23  ;;  %v2944_v51 = vld [vmem:[%s4070_s3 + $0x178] sm:$0xff]   ;;  %vm611_vm6 = vcmp.ge.s32.totalorder %v3237_v36, 0 }
  0x17   : > { %2619 = vmatprep.subr.bf16.mxu1 %v2921_v9  ;;  %v2937_v26 = vld [vmem:[%s4070_s3 + $0xc8] sm:$0xff]   ;;  %s2346_s20 = sshll.u32 %s452_s26, 3  ;;  %v2941_v32 = vld [vmem:[%s4070_s3 + $0xc0] sm:$0xff]   ;;  %s3231_s15 = scalar_lea.vmem %s4067_s0, %s2336_s13  ;;  %vm3268_vm7 = vmand %vm609_vm0, %vm619_vm1  ;;  %vm621_vm8 = vcmp.lt.s32.totalorder %v3237_v36, 16  ;;  %v595_v54 = vadd.s32 5, %v3193_v23  ;;  %vm853_vm10 = vcmask 1045504  }
  0x18   : > { %v2938_v28 = vld [vmem:[%s4070_s3 + $0x8] sm:$0xff]   ;;  %s454_s26 = scalar_lea.vmem %s4068_s1, %s2346_s20  ;;  %v2942_v33 = vld [vmem:[%s4070_s3] sm:$0xff]   ;;  %vm3280_vm9 = vmand %vm610_vm3, %vm620_vm4  ;;  %v3287_v61 = vadd.s32 6, %v3193_v23  ;;  %v3291_v1 = vadd.s32 4294967295, %v594_v47  ;;  %v3298_v5 = vadd.s32 7, %v3193_v23  ;;  %s2550_s24 = sadd.s32 8, %s3120_s22 }
  0x19   : > { %2556 = vmatpush3.bf16.msra.mxu0 %v2922_v10  ;;  %v2939_v29 = vld [vmem:[%s4070_s3 + $0x88] sm:$0xff]   ;;  %v2943_v35 = vld [vmem:[%s4070_s3 + $0x80] sm:$0xff]   ;;  %v500_v59 = vld [vmem:[%s3231_s15 + $0x10] sm:$0xff]  ;;  %v3302_v9 = vadd.s32 4294967295, %v595_v54  ;;  %vm612_vm12 = vcmp.ge.s32.totalorder %v3256_v46, 0  ;;  %vm622_vm13 = vcmp.lt.s32.totalorder %v3256_v46, 16  ;;  %s3963_s14 = scalar_lea.vmem %s4074_s7, %s2336_s13 }
  0x1a   : > { %2620 = vmatpush3.bf16.msra.mxu1 %v2923_v11  ;;  %2557 = vmatprep.subr.bf16.mxu0 %v2924_v12  ;;  %v496_v37 = vld [vmem:[%s454_s26] sm:$0xff]  ;;  %v497_v38 = vld [vmem:[%s454_s26 + $0x8] sm:$0xff]  ;;  %v501_v60 = vld [vmem:[%s3231_s15 + $0x18] sm:$0xff]  ;;  %vm613_vm14 = vcmp.ge.s32.totalorder %v3291_v1, 0  ;;  %vm623_vm15 = vcmp.lt.s32.totalorder %v3291_v1, 16  ;;  %vm3024_vm0 = vmmov 1  }
  0x1b   : > { %2621 = vmatprep.subr.bf16.mxu1 %v2925_v13  ;;  %v3242_v39 = vld [vmem:[%s4072_s5] ss:$0 sm:$0xff]  ;;  %v499_v44 = vld [vmem:[%s3231_s15 + $0x8] sm:$0xff]  ;;  %vm3312_vm11 = vmneg %vm699_vm2  ;;  %p3403_p9 = scmp.lt.s32.totalorder %s2550_s24, 15  ;;  %p489_p10 = scmp.lt.s32.totalorder %s3006_s27, 1 }
  0x1c   : > { %v523_v40 = vmul.f32 %v3242_v39, %v496_v37  ;;  %v524_v41 = vmul.f32 %v3242_v39, %v497_v38  ;;  %v3249_v42 = vld [vmem:[%s4073_s6] ss:$0 sm:$0xff]  ;;  %v526_v50 = vmul.f32 %v3242_v39, %v499_v44  ;;  %v527_v63 = vmul.f32 %v3242_v39, %v500_v59  ;;  %vm3333_vm1 = vmpackc.low %vm3024_vm0, %vm3312_vm11  ;;  %s2358_s17 = sshll.u32 %s4146_s28, 1 }
  0x1d   : > { %2558 = vmatpush3.bf16.msra.mxu0 %v2926_v14  ;;  %v498_v43 = vld [vmem:[%s3231_s15] sm:$0xff]  ;;  %v528_v0 = vmul.f32 %v3242_v39, %v501_v60  ;;  %vm3347_vm3 = vmand %vm611_vm6, %vm621_vm8  ;;  %vm624_vm8 = vcmp.lt.s32.totalorder %v3302_v9, 16  ;;  %s4150_s24 = smov (!%p3403_p9, %s2550_s24), 15  ;;  %s4152_s27 = smov (!%p489_p10, %s3006_s27), 1 }
  0x1e   : > { %2622 = vmatpush3.bf16.msra.mxu1 %v2927_v15  ;;  %2559 = vmatprep.subr.bf16.mxu0 %v2928_v16  ;;  %v525_v45 = vmul.f32 %v3242_v39, %v498_v43  ;;  %v550_v48 = vadd.f32 %v3249_v42, %v523_v40  ;;  %v551_v49 = vadd.f32 %v3249_v42, %v524_v41  ;;  %v502_v44 = vld [vmem:[%s3231_s15 + $0x20] sm:$0xff]  ;;  %vm3414_vm4 = vmand %vm612_vm12, %vm622_vm13  ;;  %v2957_v43 = vld [vmem:[%s4070_s3 + $0x1e8] sm:$0xff]   ;;  %s466_s12 = scalar_select %p3403_p9, %s4150_s24, 15 }
  0x1f   : > { %2623 = vmatprep.subr.bf16.mxu1 %v2929_v17  ;;  %v553_v57 = vadd.f32 %v3249_v42, %v526_v50  ;;  %v554_v12 = vadd.f32 %v3249_v42, %v527_v63  ;;  %v555_v13 = vadd.f32 %v3249_v42, %v528_v0  ;;  %v503_v50 = vld [vmem:[%s3231_s15 + $0x28] sm:$0xff]  ;;  %v2953_v63 = vld [vmem:[%s4070_s3 + $0x1f0] sm:$0xff]   ;;  %vm3426_vm6 = vmand %vm613_vm14, %vm623_vm15  ;;  %s492_s13 = sadd.s32 %s2358_s17, %s4152_s27 }
  0x20   : > { %v552_v53 = vadd.f32 %v3249_v42, %v525_v45  ;;  %v570_v55 = vmax.f32 %v550_v48, 0.0  ;;  %v571_v56 = vmax.f32 %v551_v49, 0.0  ;;  %v2954_v1 = vld [vmem:[%s4070_s3 + $0x120] sm:$0xff]   ;;  %s2359_s20 = sshll.u32 %s492_s13, 1 }
  0x21   : > { %2560 = vmatpush3.bf16.msra.mxu0 %v2930_v18  ;;  %v573_v4 = vmax.f32 %v553_v57, 0.0  ;;  %v574_v48 = vmax.f32 %v554_v12, 0.0  ;;  %v575_v49 = vmax.f32 %v555_v13, 0.0  ;;  %v505_v57 = vld [vmem:[%s3231_s15 + $0x38] sm:$0xff]  ;;  %v3861_v34 = vld [vmem:[%s4071_s4] ss:$0 sm:$0xff] }
  0x22   : > { %2624 = vmatpush3.bf16.msra.mxu1 %v2931_v19  ;;  %2561 = vmatprep.subr.bf16.mxu0 %v2932_v20  ;;  %v572_v62 = vmax.f32 %v552_v53, 0.0  ;;  %v659_v2 = vsel %vm3268_vm7, %v570_v55, 0.0  ;;  %v660_v3 = vsel %vm3268_vm7, %v571_v56, 0.0  ;;  %v2947_v55 = vld [vmem:[%s4070_s3 + $0x130] sm:$0xff]   ;;  %vm614_vm7 = vcmp.ge.s32.totalorder %v3302_v9, 0 }
  0x23   : > { %2625 = vmatprep.subr.bf16.mxu1 %v2933_v21  ;;  %v700_v6 = vrot.slane %v659_v2, 7  ;;  %v701_v7 = vrot.slane %v660_v3, 7  ;;  %v662_v10 = vsel %vm3280_vm9, %v573_v4, 0.0  ;;  %v504_v56 = vld [vmem:[%s3231_s15 + $0x30] sm:$0xff]  ;;  %v664_v2 = vsel %vm3347_vm3, %v575_v49, 0.0  ;;  %v507_v49 = vld [vmem:[%s3231_s15 + $0x48] sm:$0xff] }
  0x24   : > { %v661_v8 = vsel %vm3280_vm9, %v572_v62, 0.0  ;;  %v704_v17 = vrot.slane %v662_v10, 7  ;;  %v663_v62 = vsel %vm3347_vm3, %v574_v48, 0.0  ;;  %v530_v10 = vmul.f32 %v3242_v39, %v503_v50  ;;  %vm3534_vm9 = vmand %vm614_vm7, %vm624_vm8 }
  0x25   : > { %2562 = vmatpush3.bf16.msra.mxu0 %v2934_v22  ;;  %v703_v11 = vrot.slane %v661_v8, 7  ;;  %v702_v14 = vsel %vm699_vm2, %v700_v6, %v701_v7  ;;  %v760_v15 = vsel %vm699_vm2, 0.0, %v700_v6  ;;  %v770_v16 = vsel %vm699_vm2, %v701_v7, 0.0 }
  0x26   : > { %2626 = vmatpush3.bf16.msra.mxu1 %v2935_v24  ;;  %2563 = vmatprep.subr.bf16.mxu0 %v2936_v25  ;;  %v797_v19 = vrot.slane %v760_v15, 1  ;;  %v798_v20 = vrot.slane %v702_v14, 1  ;;  %v800_v21 = vrot.slane %v770_v16, 1  ;;  %v854_v22 = vrot.slane %v760_v15, 2 }
  0x27   : > { %2627 = vmatprep.subr.bf16.mxu1 %v2937_v26  ;;  %v857_v24 = vrot.slane %v770_v16, 2  ;;  %v705_v25 = vsel %vm699_vm2, %v703_v11, %v704_v17  ;;  %v771_v26 = vsel %vm699_vm2, %v704_v17, 0.0  ;;  %v2447_v27 = vpack.c.bf16 %v702_v14, %v700_v6  ;;  %v2955_v16 = vld [vmem:[%s4070_s3 + $0x1b0] sm:$0xff]  }
  0x28   : > { %v799_v30 = vsel %vm796_vm5, %v797_v19, %v798_v20  ;;  %v3340_v38 = vpack.c.bf16 %v705_v25, %v703_v11  ;;  %v855_v40 = vrot.slane %v702_v14, 2  ;;  %v761_v41 = vsel %vm699_vm2, 0.0, %v703_v11  ;;  %v2948_v11 = vld [vmem:[%s4070_s3 + $0x168] sm:$0xff]  }
  0x29   : > { %2564 = vmatpush3.bf16.msra.mxu0 %v2938_v28  ;;  %v2945_v28 = vld [vmem:[%s4070_s3 + $0x138] sm:$0xff]   ;;  %v802_v45 = vrot.slane %v761_v41, 1  ;;  %v805_v47 = vrot.slane %v771_v26, 1  ;;  %v859_v53 = vrot.slane %v761_v41, 2  ;;  %v862_v54 = vrot.slane %v771_v26, 2 }
  0x2a   : > { %2628 = vmatpush3.bf16.msra.mxu1 %v2939_v29  ;;  %2565 = vmatprep.subr.bf16.mxu0 %v2940_v31  ;;  %v2949_v29 = vld [vmem:[%s4070_s3 + $0x1f8] sm:$0xff]   ;;  %v801_v31 = vsel %vm796_vm5, %v798_v20, %v800_v21  ;;  %v856_v36 = vsel %vm853_vm10, %v854_v22, %v855_v40  ;;  %v858_v52 = vsel %vm853_vm10, %v855_v40, %v857_v24  ;;  %v706_v3 = vrot.slane %v663_v62, 7  ;;  %v2950_v21 = vld [vmem:[%s4070_s3 + $0x128] sm:$0xff]  }
  0x2b   : > { %2629 = vmatprep.subr.bf16.mxu1 %v2941_v32  ;;  %v803_v32 = vrot.slane %v705_v25, 1  ;;  %v943_v37 = vpack.c.bf16 %v801_v31, %v799_v30  ;;  %2480 = vmatprep.mubr.msk.bf16.mxu1 %vm3333_vm1, %v3340_v38  ;;  %v944_v58 = vpack.c.bf16 %v858_v52, %v856_v36  ;;  %v707_v6 = vrot.slane %v664_v2, 7  ;;  %v2959_v52 = vld [vmem:[%s4070_s3 + $0x1a8] sm:$0xff]   ;;  %v2958_v62 = vld [vmem:[%s4070_s3 + $0x118] sm:$0xff]   ;;  %v2961_v2 = vld [vmem:[%s4070_s3 + $0x1e0] sm:$0xff]  }
  0x2c   : > { %v529_v8 = vmul.f32 %v3242_v39, %v502_v44  ;;  %v762_v13 = vsel %vm699_vm2, 0.0, %v706_v3  ;;  %v531_v14 = vmul.f32 %v3242_v39, %v504_v56  ;;  %v532_v15 = vmul.f32 %v3242_v39, %v505_v57 }
  0x2d   : > { %2566 = vmatpush3.bf16.msra.mxu0 %v2942_v33  ;;  %v860_v33 = vrot.slane %v705_v25, 2  ;;  %1587 = vmatprep.mubr.bf16.mxu0 %v943_v37  ;;  %v804_v59 = vsel %vm796_vm5, %v802_v45, %v803_v32  ;;  %v806_v60 = vsel %vm796_vm5, %v803_v32, %v805_v47  ;;  %v708_v17 = vsel %vm699_vm2, %v706_v3, %v707_v6 }
  0x2e   : > { %2630 = vmatpush3.bf16.msra.mxu1 %v2943_v35  ;;  %2679 = vmatprep.subr.bf16.mxu0 %v2944_v51  ;;  %v2946_v35 = vld [vmem:[%s4070_s3 + $0x170] sm:$0xff]   ;;  %v2951_v51 = vld [vmem:[%s4070_s3 + $0x1b8] sm:$0xff]   ;;  %v3375_v0 = vpack.c.bf16 %v806_v60, %v804_v59  ;;  %v772_v18 = vsel %vm699_vm2, %v707_v6, 0.0  ;;  %v807_v19 = vrot.slane %v762_v13, 1  ;;  %v556_v20 = vadd.f32 %v3249_v42, %v529_v8 }
  0x2f   : > { %2743 = vmatprep.subr.bf16.mxu1 %v2949_v29  ;;  %v861_v4 = vsel %vm853_vm10, %v859_v53, %v860_v33  ;;  %v863_v7 = vsel %vm853_vm10, %v860_v33, %v862_v54  ;;  %v3407_v22 = vpack.c.bf16 %v708_v17, %v706_v3  ;;  %v808_v24 = vrot.slane %v708_v17, 1  ;;  %v506_v29 = vld [vmem:[%s3231_s15 + $0x40] sm:$0xff]  ;;  %v508_v53 = vld [vmem:[%s3231_s15 + $0x50] sm:$0xff]  ;;  %v509_v8 = vld [vmem:[%s3231_s15 + $0x58] sm:$0xff] }
  0x30   : > { %2448 = vmatmul.mubr.msk.bf16.vlgmr.msra.gmra.mxu0 %vm3333_vm1, %v2447_v27  ;;  %v3387_v12 = vpack.c.bf16 %v863_v7, %v861_v4  ;;  %v810_v25 = vrot.slane %v772_v18, 1  ;;  %v557_v26 = vadd.f32 %v3249_v42, %v530_v10  ;;  %v576_v30 = vmax.f32 %v556_v20, 0.0 }
  0x31   : > { %2680 = vmatpush3.bf16.msra.mxu0 %v2945_v28  ;;  %1685 = vmatmul.mubr.bf16.vlgmr.msra.gmra.mxu1 %v944_v58  ;;  %v2952_v28 = vld [vmem:[%s4070_s3 + $0x160] sm:$0xff]   ;;  %v864_v31 = vrot.slane %v762_v13, 2  ;;  %v865_v32 = vrot.slane %v708_v17, 2  ;;  %v867_v33 = vrot.slane %v772_v18, 2  ;;  %v558_v41 = vadd.f32 %v3249_v42, %v531_v14 }
  0x32   : > { %2681 = vmatprep.subr.bf16.mxu0 %v2946_v35  ;;  %1595 = vmatprep.mubr.bf16.mxu0 %v3375_v0  ;;  %v809_v35 = vsel %vm796_vm5, %v807_v19, %v808_v24  ;;  %v811_v37 = vsel %vm796_vm5, %v808_v24, %v810_v25  ;;  %v577_v40 = vmax.f32 %v557_v26, 0.0  ;;  %v665_v45 = vsel %vm3414_vm4, %v576_v30, 0.0  ;;  %v2960_v26 = vld [vmem:[%s4070_s3 + $0x150] sm:$0xff]  }
  0x33   : > { %2744 = vmatpush3.bf16.msra.mxu1 %v2951_v51  ;;  %2484 = vmatprep.mubr.msk.bf16.mxu1 %vm3333_vm1, %v3407_v22  ;;  %v3447_v44 = vpack.c.bf16 %v811_v37, %v809_v35  ;;  %v866_v47 = vsel %vm853_vm10, %v864_v31, %v865_v32  ;;  %v868_v48 = vsel %vm853_vm10, %v865_v32, %v867_v33  ;;  %v709_v51 = vrot.slane %v665_v45, 7  ;;  %v2962_v31 = vld [vmem:[%s4070_s3 + $0x110] sm:$0xff]   ;;  %v2964_v37 = vld [vmem:[%s4070_s3 + $0x148] sm:$0xff]  }
  0x34   : > { %2745 = vmatprep.subr.bf16.mxu1 %v2953_v63  ;;  %v666_v50 = vsel %vm3414_vm4, %v577_v40, 0.0  ;;  %v559_v36 = vadd.f32 %v3249_v42, %v532_v15  ;;  %v578_v56 = vmax.f32 %v558_v41, 0.0  ;;  %v533_v57 = vmul.f32 %v3242_v39, %v506_v29  ;;  %v2963_v15 = vld [vmem:[%s4070_s3 + $0x1a0] sm:$0xff]   ;;  %v2965_v40 = vld [vmem:[%s4070_s3 + $0x1d8] sm:$0xff]  }
  0x35   : > { %2682 = vmatpush3.bf16.msra.mxu0 %v2947_v55  ;;  %v710_v54 = vrot.slane %v666_v50, 7  ;;  %v3472_v55 = vpack.c.bf16 %v868_v48, %v866_v47  ;;  %v763_v58 = vsel %vm699_vm2, 0.0, %v709_v51  ;;  %v534_v60 = vmul.f32 %v3242_v39, %v507_v49  ;;  %v510_v48 = vld [vmem:[%s3231_s15 + $0x60] sm:$0xff]  ;;  %v512_v47 = vld [vmem:[%s3231_s15 + $0x70] sm:$0xff] }
  0x36   : > { %2683 = vmatprep.subr.bf16.mxu0 %v2948_v11  ;;  %v579_v59 = vmax.f32 %v559_v36, 0.0  ;;  %v535_v63 = vmul.f32 %v3242_v39, %v508_v53  ;;  %v812_v6 = vrot.slane %v763_v58, 1  ;;  %v667_v7 = vsel %vm3426_vm6, %v578_v56, 0.0  ;;  %v2966_v56 = vld [vmem:[%s4070_s3 + $0x108] sm:$0xff]  }
  0x37   : > { %2746 = vmatpush3.bf16.msra.mxu1 %v2955_v16  ;;  %v711_v3 = vsel %vm699_vm2, %v709_v51, %v710_v54  ;;  %v773_v4 = vsel %vm699_vm2, %v710_v54, 0.0  ;;  %v712_v16 = vrot.slane %v667_v7, 7  ;;  %v869_v18 = vrot.slane %v763_v58, 2 }
  0x38   : > { %2452 = vmatmul.mubr.msk.bf16.gmra.mxu0 %vm3333_vm1, %v3340_v38  ;;  %v2956_v38 = vld [vmem:[%s4070_s3 + $0x158] sm:$0xff]   ;;  %2747 = vmatprep.subr.bf16.mxu1 %v2957_v43  ;;  %v3489_v10 = vpack.c.bf16 %v711_v3, %v709_v51  ;;  %v813_v11 = vrot.slane %v711_v3, 1  ;;  %v815_v13 = vrot.slane %v773_v4, 1  ;;  %v668_v14 = vsel %vm3426_vm6, %v579_v59, 0.0 }
  0x39   : > { %2684 = vmatpush3.bf16.msra.mxu0 %v2950_v21  ;;  %1693 = vmatmul.mubr.bf16.gmra.mxu1 %v3387_v12  ;;  %v713_v17 = vrot.slane %v668_v14, 7  ;;  %v870_v19 = vrot.slane %v711_v3, 2  ;;  %v872_v24 = vrot.slane %v773_v4, 2  ;;  %v560_v25 = vadd.f32 %v3249_v42, %v533_v57  ;;  %v2969_v14 = vld [vmem:[%s4070_s3 + $0x190] sm:$0xff]  }
  0x3a   : > { %1603 = vmatprep.mubr.bf16.mxu0 %v3447_v44  ;;  %2685 = vmatprep.subr.bf16.mxu0 %v2952_v28  ;;  %v814_v20 = vsel %vm796_vm5, %v812_v6, %v813_v11  ;;  %v816_v21 = vsel %vm796_vm5, %v813_v11, %v815_v13  ;;  %v764_v29 = vsel %vm699_vm2, 0.0, %v712_v16  ;;  %v536_v30 = vmul.f32 %v3242_v39, %v509_v8  ;;  %v2968_v6 = vld [vmem:[%s4070_s3 + $0x1d0] sm:$0xff]  }
  0x3b   : > { %2748 = vmatpush3.bf16.msra.mxu1 %v2959_v52  ;;  %2488 = vmatprep.mubr.msk.bf16.mxu1 %vm3333_vm1, %v3489_v10  ;;  %v3508_v27 = vpack.c.bf16 %v816_v21, %v814_v20  ;;  %v714_v28 = vsel %vm699_vm2, %v712_v16, %v713_v17  ;;  %v871_v33 = vsel %vm853_vm10, %v869_v18, %v870_v19  ;;  %v774_v46 = vsel %vm699_vm2, %v713_v17, 0.0  ;;  %v2970_v21 = vld [vmem:[%s4070_s3 + $0x140] sm:$0xff]  }
  0x3c   : > { %2749 = vmatprep.subr.bf16.mxu1 %v2961_v2  ;;  %v3516_v32 = vpack.c.bf16 %v714_v28, %v712_v16  ;;  %v817_v35 = vrot.slane %v764_v29, 1  ;;  %v873_v41 = vsel %vm853_vm10, %v870_v19, %v872_v24  ;;  %v820_v43 = vrot.slane %v774_v46, 1 }
  0x3d   : > { %2686 = vmatpush3.bf16.msra.mxu0 %v2954_v1  ;;  %v818_v1 = vrot.slane %v714_v28, 1  ;;  %v561_v45 = vadd.f32 %v3249_v42, %v534_v60  ;;  %v580_v49 = vmax.f32 %v560_v25, 0.0  ;;  %v874_v50 = vrot.slane %v764_v29, 2 }
  0x3e   : > { %2687 = vmatprep.subr.bf16.mxu0 %v2956_v38  ;;  %v875_v51 = vrot.slane %v714_v28, 2  ;;  %v877_v36 = vrot.slane %v774_v46, 2  ;;  %v511_v38 = vld [vmem:[%s3231_s15 + $0x68] sm:$0xff]  ;;  %v562_v54 = vadd.f32 %v3249_v42, %v535_v63  ;;  %v3549_v57 = vpack.c.bf16 %v873_v41, %v871_v33  ;;  %v2972_v33 = vld [vmem:[%s4070_s3 + $0x100] sm:$0xff]  }
  0x3f   : > { %2750 = vmatpush3.bf16.msra.mxu1 %v2963_v15  ;;  %v819_v52 = vsel %vm796_vm5, %v817_v35, %v818_v1  ;;  %v821_v53 = vsel %vm796_vm5, %v818_v1, %v820_v43  ;;  %v581_v9 = vmax.f32 %v561_v45, 0.0  ;;  %v669_v59 = vsel %vm3534_vm9, %v580_v49, 0.0 }
  0x40   : > { %2456 = vmatmul.mubr.msk.bf16.gmra.mxu0 %vm3333_vm1, %v3407_v22  ;;  %2751 = vmatprep.subr.bf16.mxu1 %v2965_v40  ;;  %v3551_v58 = vpack.c.bf16 %v821_v53, %v819_v52  ;;  %v876_v60 = vsel %vm853_vm10, %v874_v50, %v875_v51  ;;  %v715_v2 = vrot.slane %v669_v59, 7  ;;  %v878_v3 = vsel %vm853_vm10, %v875_v51, %v877_v36  ;;  %v2973_v51 = vld [vmem:[%s4070_s3 + $0x188] sm:$0xff]   ;;  %v2974_v36 = vld [vmem:[%s4070_s3 + $0x1c0] sm:$0xff]  }
  0x41   : > { %2688 = vmatpush3.bf16.msra.mxu0 %v2958_v62  ;;  %1701 = vmatmul.mubr.bf16.gmra.mxu1 %v3472_v55  ;;  %v2967_v62 = vld [vmem:[%s4070_s3 + $0x198] sm:$0xff]   ;;  %v670_v63 = vsel %vm3534_vm9, %v581_v9, 0.0  ;;  %v563_v4 = vadd.f32 %v3249_v42, %v536_v30  ;;  %v582_v8 = vmax.f32 %v562_v54, 0.0  ;;  %v2368_v11 = vadd.s32 4294967295, %v3287_v61 }
  0x42   : > { %1611 = vmatprep.mubr.bf16.mxu0 %v3508_v27  ;;  %2492 = vmatprep.mubr.msk.bf16.mxu1 %vm3333_vm1, %v3516_v32  ;;  %v716_v7 = vrot.slane %v670_v63, 7  ;;  %v537_v13 = vmul.f32 %v3242_v39, %v510_v48  ;;  %v765_v15 = vsel %vm699_vm2, 0.0, %v715_v2  ;;  %v538_v17 = vmul.f32 %v3242_v39, %v511_v38 }
  0x43   : > { %2689 = vmatprep.subr.bf16.mxu0 %v2960_v26  ;;  %2752 = vmatpush3.bf16.msra.mxu1 %v2967_v62  ;;  %v583_v16 = vmax.f32 %v563_v4, 0.0  ;;  %v3577_v18 = vadd.s32 4294967295, %v3298_v5  ;;  %v822_v20 = vrot.slane %v765_v15, 1  ;;  %vm615_vm11 = vcmp.ge.s32.totalorder %v2368_v11, 0  ;;  %v2971_v26 = vld [vmem:[%s4070_s3 + $0x1c8] sm:$0xff]   ;;  %v2975_v62 = vld [vmem:[%s4070_s3 + $0x180] sm:$0xff]  }
  0x44   : > { %2753 = vmatprep.subr.bf16.mxu1 %v2968_v6  ;;  %v717_v61 = vsel %vm699_vm2, %v715_v2, %v716_v7  ;;  %v775_v19 = vsel %vm699_vm2, %v716_v7, 0.0  ;;  %vm625_vm12 = vcmp.lt.s32.totalorder %v2368_v11, 16  ;;  %v879_v28 = vrot.slane %v765_v15, 2  ;;  %v3653_v11 = vld [vmem:[%s4070_s3 + $0x238] sm:$0xff]  }
  0x45   : > { %2690 = vmatpush3.bf16.msra.mxu0 %v2962_v31  ;;  %v3589_v5 = vpack.c.bf16 %v717_v61, %v715_v2  ;;  %v823_v24 = vrot.slane %v717_v61, 1  ;;  %v825_v25 = vrot.slane %v775_v19, 1  ;;  %vm635_vm13 = vmand %vm615_vm11, %vm625_vm12  ;;  %v880_v29 = vrot.slane %v717_v61, 2  ;;  %v513_v2 = vld [vmem:[%s3231_s15 + $0x78] sm:$0xff]  ;;  %s3659_s15 = sshll.u32 %s466_s12, 1 }
  0x46   : > { %2691 = vmatprep.subr.bf16.mxu0 %v2964_v37  ;;  %v882_v30 = vrot.slane %v775_v19, 2  ;;  %v564_v31 = vadd.f32 %v3249_v42, %v537_v13  ;;  %v671_v37 = vsel %vm635_vm13, %v582_v8, 0.0  ;;  %v672_v40 = vsel %vm635_vm13, %v583_v16, 0.0  ;;  %s469_s24 = sadd.s32 %s3659_s15, %s3178_s18  ;;  %s494_s15 = scalar_lea.vmem %s4075_s8, %s2359_s20 }
  0x47   : > { %2754 = vmatpush3.bf16.msra.mxu1 %v2969_v14  ;;  %v824_v46 = vsel %vm796_vm5, %v822_v20, %v823_v24  ;;  %v826_v35 = vsel %vm796_vm5, %v823_v24, %v825_v25  ;;  %v3603_v41 = vpack.c.bf16 %v878_v3, %v876_v60  ;;  %v718_v43 = vrot.slane %v671_v37, 7  ;;  %s2353_s23 = sshll.u32 %s469_s24, 3 }
  0x48   : > { %2460 = vmatmul.mubr.msk.bf16.gmra.mxu0 %vm3333_vm1, %v3489_v10  ;;  %2755 = vmatprep.subr.bf16.mxu1 %v2971_v26  ;;  %v3605_v1 = vpack.c.bf16 %v826_v35, %v824_v46  ;;  %v719_v45 = vrot.slane %v672_v40, 7  ;;  %v881_v48 = vsel %vm853_vm10, %v879_v28, %v880_v29  ;;  %v565_v49 = vadd.f32 %v3249_v42, %v538_v17  ;;  %s471_s21 = scalar_lea.vmem %s4069_s2, %s2353_s23 }
  0x49   : > { %1619 = vmatprep.mubr.bf16.mxu0 %v3551_v58  ;;  %2692 = vmatpush3.bf16.msra.mxu0 %v2966_v56  ;;  %v584_v50 = vmax.f32 %v564_v31, 0.0  ;;  %vm616_vm14 = vcmp.ge.s32.totalorder %v3577_v18, 0  ;;  %v883_v52 = vsel %vm853_vm10, %v880_v29, %v882_v30  ;;  %v3622_v53 = vsel %vm699_vm2, 0.0, %v718_v43 }
  0x4a   : > { %1709 = vmatmul.mubr.bf16.gmra.mxu1 %v3549_v57  ;;  %2693 = vmatprep.subr.bf16.mxu0 %v2970_v21  ;;  %v3618_v38 = vsel %vm699_vm2, %v718_v43, %v719_v45  ;;  %v3625_v9 = vsel %vm699_vm2, %v719_v45, 0.0  ;;  %v827_v56 = vrot.slane %v3622_v53, 1  ;;  %v585_v63 = vmax.f32 %v565_v49, 0.0 }
  0x4b   : > { %2496 = vmatprep.mubr.msk.bf16.mxu1 %vm3333_vm1, %v3589_v5  ;;  %v3631_v54 = vpack.c.bf16 %v3618_v38, %v718_v43  ;;  %v828_v59 = vrot.slane %v3618_v38, 1  ;;  %v830_v60 = vrot.slane %v3625_v9, 1  ;;  %2756 = vmatpush3.bf16.msra.mxu1 %v2973_v51  ;;  %vm626_vm15 = vcmp.lt.s32.totalorder %v3577_v18, 16 }
  0x4c   : > { %v598_v3 = vadd.s32 8, %v3193_v23  ;;  %2757 = vmatprep.subr.bf16.mxu1 %v2974_v36  ;;  %vm636_vm0 = vmand %vm616_vm14, %vm626_vm15  ;;  %v884_v7 = vrot.slane %v3622_v53, 2  ;;  %v539_v8 = vmul.f32 %v3242_v39, %v512_v47  ;;  %v3664_v13 = vpack.c.bf16 %v883_v52, %v881_v48  ;;  %v514_v36 = vld [vmem:[%s471_s21] sm:$0xff] }
  0x4d   : > { %2694 = vmatpush3.bf16.msra.mxu0 %v2972_v33  ;;  %v829_v4 = vsel %vm796_vm5, %v827_v56, %v828_v59  ;;  %v831_v6 = vsel %vm796_vm5, %v828_v59, %v830_v60  ;;  %v673_v14 = vsel %vm636_vm0, %v584_v50, 0.0  ;;  %v674_v15 = vsel %vm636_vm0, %v585_v63, 0.0 }
  0x4e   : > { %v721_v16 = vrot.slane %v673_v14, 7  ;;  %v722_v17 = vrot.slane %v674_v15, 7  ;;  %v885_v18 = vrot.slane %v3618_v38, 2  ;;  %v540_v61 = vmul.f32 %v3242_v39, %v513_v2  ;;  %2823 = vmatprep.subr.bf16.mxu0 %v3653_v11  ;;  %v515_v38 = vld [vmem:[%s471_s21 + $0x8] sm:$0xff] }
  0x4f   : > { %2758 = vmatpush3.bf16.msra.mxu1 %v2975_v62  ;;  %v3669_v19 = vpack.c.bf16 %v831_v6, %v829_v4  ;;  %v887_v20 = vrot.slane %v3625_v9, 2  ;;  %v566_v21 = vadd.f32 %v3249_v42, %v539_v8  ;;  %v2370_v24 = vadd.s32 4294967295, %v598_v3 }
  0x50   : > { %2464 = vmatmul.mubr.msk.bf16.gmra.mxu0 %vm3333_vm1, %v3516_v32  ;;  %2855 = vmatprep.subr.bf16.mxu1 %v3653_v11  ;;  %v723_v25 = vsel %vm699_vm2, %v721_v16, %v722_v17  ;;  %v767_v26 = vsel %vm699_vm2, 0.0, %v721_v16  ;;  %v777_v28 = vsel %vm699_vm2, %v722_v17, 0.0  ;;  %v567_v29 = vadd.f32 %v3249_v42, %v540_v61 }
  0x51   : > { %1627 = vmatprep.mubr.bf16.mxu0 %v3605_v1  ;;  %v3680_v30 = vpack.c.bf16 %v723_v25, %v721_v16  ;;  %v832_v31 = vrot.slane %v767_v26, 1  ;;  %v833_v33 = vrot.slane %v723_v25, 1  ;;  %v835_v46 = vrot.slane %v777_v28, 1 }
  0x52   : > { %1717 = vmatmul.mubr.bf16.gmra.mxu1 %v3603_v41  ;;  %v586_v35 = vmax.f32 %v566_v21, 0.0  ;;  %v587_v37 = vmax.f32 %v567_v29, 0.0  ;;  %vm617_vm3 = vcmp.ge.s32.totalorder %v2370_v24, 0  ;;  %vm627_vm4 = vcmp.lt.s32.totalorder %v2370_v24, 16 }
  0x53   : > { %2500 = vmatprep.mubr.msk.bf16.mxu1 %vm3333_vm1, %v3631_v54  ;;  %vm637_vm6 = vmand %vm617_vm3, %vm627_vm4  ;;  %v834_v40 = vsel %vm796_vm5, %v832_v31, %v833_v33  ;;  %v836_v43 = vsel %vm796_vm5, %v833_v33, %v835_v46  ;;  %v886_v48 = vsel %vm853_vm10, %v884_v7, %v885_v18  ;;  %v888_v49 = vsel %vm853_vm10, %v885_v18, %v887_v20 }
  0x54   : > { %v675_v45 = vsel %vm637_vm6, %v586_v35, 0.0  ;;  %v3689_v47 = vsel %vm637_vm6, %v587_v37, 0.0  ;;  %v541_v52 = vmul.f32 %v3242_v39, %v514_v36  ;;  %v542_v53 = vmul.f32 %v3242_v39, %v515_v38 }
  0x55   : > { %v3699_v50 = vrot.slane %v675_v45, 7  ;;  %v725_v51 = vrot.slane %v3689_v47, 7  ;;  %v599_v9 = vadd.s32 9, %v3193_v23  ;;  %v3705_v56 = vpack.c.bf16 %v836_v43, %v834_v40  ;;  %v2977_v45 = vld [vmem:[%s4070_s3 + $0x230] sm:$0xff]  }
  0x56   : > { %v3713_v60 = vpack.c.bf16 %v888_v49, %v886_v48  ;;  %v889_v62 = vrot.slane %v767_v26, 2  ;;  %v890_v2 = vrot.slane %v723_v25, 2  ;;  %v892_v3 = vrot.slane %v777_v28, 2  ;;  %v2978_v48 = vld [vmem:[%s4070_s3 + $0x228] sm:$0xff]  }
  0x57   : > { %v3711_v59 = vsel %vm699_vm2, %v3699_v50, %v725_v51  ;;  %v568_v39 = vadd.f32 %v3249_v42, %v541_v52  ;;  %v569_v23 = vadd.f32 %v3249_v42, %v542_v53  ;;  %v2371_v4 = vadd.s32 4294967295, %v599_v9 }
  0x58   : > { %2468 = vmatmul.mubr.msk.bf16.gmra.mxu0 %vm3333_vm1, %v3589_v5  ;;  %v3717_v63 = vpack.c.bf16 %v3711_v59, %v3699_v50  ;;  %v891_v8 = vsel %vm853_vm10, %v889_v62, %v890_v2  ;;  %v893_v14 = vsel %vm853_vm10, %v890_v2, %v892_v3  ;;  %v913_v49 = vrot.slane %v3711_v59, 1 }
  0x59   : > { %1635 = vmatprep.mubr.bf16.mxu0 %v3669_v19  ;;  %v588_v6 = vmax.f32 %v568_v39, 0.0  ;;  %v589_v7 = vmax.f32 %v569_v23, 0.0  ;;  %vm618_vm7 = vcmp.ge.s32.totalorder %v2371_v4, 0  ;;  %vm628_vm8 = vcmp.lt.s32.totalorder %v2371_v4, 16 }
  0x5a   : > { %1725 = vmatmul.mubr.bf16.gmra.mxu1 %v3664_v13  ;;  %vm638_vm9 = vmand %vm618_vm7, %vm628_vm8  ;;  %v3733_v18 = vpack.c.bf16 %v893_v14, %v891_v8  ;;  %v920_v36 = vrot.slane %v3711_v59, 2 }
  0x5b   : > { %2504 = vmatprep.mubr.msk.bf16.mxu1 %vm3333_vm1, %v3680_v30  ;;  %v677_v15 = vsel %vm638_vm9, %v588_v6, 0.0  ;;  %v678_v42 = vsel %vm638_vm9, %v589_v7, 0.0 }
  0x5c   : > { %v3731_v16 = vrot.slane %v677_v15, 7  ;;  %v728_v17 = vrot.slane %v678_v42, 7 }
  0x5e   : > { %v3737_v61 = vsel %vm699_vm2, %v3731_v16, %v728_v17  ;;  %v769_v20 = vsel %vm699_vm2, 0.0, %v3731_v16  ;;  %v779_v21 = vsel %vm699_vm2, %v728_v17, 0.0 }
  0x5f   : > { %v928_v24 = vrot.slane %v769_v20, 1  ;;  %v929_v25 = vrot.slane %v3737_v61, 1  ;;  %v931_v26 = vrot.slane %v779_v21, 1  ;;  %v2539_v28 = vpack.c.bf16 %v3737_v61, %v3731_v16 }
  0x60   : > { %2472 = vmatmul.mubr.msk.bf16.gmra.mxu0 %vm3333_vm1, %v3631_v54  ;;  %v935_v29 = vrot.slane %v769_v20, 2  ;;  %v936_v31 = vrot.slane %v3737_v61, 2  ;;  %v938_v33 = vrot.slane %v779_v21, 2 }
  0x61   : > { %1643 = vmatprep.mubr.bf16.mxu0 %v3705_v56  ;;  %v3752_v46 = vsel %vm796_vm5, %v928_v24, %v929_v25  ;;  %v3755_v35 = vsel %vm796_vm5, %v929_v25, %v931_v26 }
  0x62   : > { %1733 = vmatmul.mubr.bf16.gmra.mxu1 %v3713_v60  ;;  %v970_v37 = vpack.c.bf16 %v3755_v35, %v3752_v46  ;;  %v3761_v40 = vsel %vm853_vm10, %v935_v29, %v936_v31 }
  0x63   : > { %2508 = vmatprep.mubr.msk.bf16.mxu1 %vm3333_vm1, %v3717_v63 }
  0x68   : > { %2476 = vmatmul.mubr.msk.bf16.gmra.mxu0 %vm3333_vm1, %v3680_v30 }
  0x69   : > { %1781 = vmatprep.mubr.bf16.mxu0 %v3387_v12  ;;  %v3764_v12 = vsel %vm853_vm10, %v936_v31, %v938_v33 }
  0x6a   : > { %1741 = vmatmul.mubr.bf16.gmra.mxu1 %v3733_v18  ;;  %v971_v43 = vpack.c.bf16 %v3764_v12, %v3761_v40 }
  0x6b   : > { %1878 = vmatprep.mubr.bf16.mxu1 %v3447_v44 }
  0x70   : > { %1782 = vmatmul.mubr.bf16.vlgmr.msra.gmra.mxu0 %v3375_v0  ;;  %v2979_v0 = vld [vmem:[%s4070_s3 + $0x220] sm:$0xff]  }
  0x71   : > { %2824 = vmatpush3.bf16.msra.mxu0 %v3653_v11  ;;  %1789 = vmatprep.mubr.bf16.mxu0 %v3472_v55 }
  0x72   : > { %2512 = vmatmul.mubr.msk.bf16.vlgmr.msra.gmra.mxu1 %vm3333_vm1, %v3407_v22  ;;  %2825 = vmatprep.subr.bf16.mxu0 %v2977_v45  ;;  %v2980_v22 = vld [vmem:[%s4070_s3 + $0x218] sm:$0xff]  }
  0x73   : > { %1886 = vmatprep.mubr.bf16.mxu1 %v3508_v27  ;;  %2863 = vmatpush3.bf16.msra.mxu1 %v3653_v11 }
  0x74   : > { %2856 = vmatprep.subr.bf16.mxu1 %v2977_v45 }
  0x75   : > { %2826 = vmatpush3.bf16.msra.mxu0 %v2977_v45 }
  0x76   : > { %2827 = vmatprep.subr.bf16.mxu0 %v2978_v48 }
  0x77   : > { %2864 = vmatpush3.bf16.msra.mxu1 %v2977_v45 }
  0x78   : > { %1790 = vmatmul.mubr.bf16.gmra.mxu0 %v3447_v44  ;;  %2857 = vmatprep.subr.bf16.mxu1 %v2978_v48  ;;  %v2981_v44 = vld [vmem:[%s4070_s3 + $0x210] sm:$0xff]  }
  0x79   : > { %1797 = vmatprep.mubr.bf16.mxu0 %v3549_v57  ;;  %2828 = vmatpush3.bf16.msra.mxu0 %v2978_v48 }
  0x7a   : > { %2516 = vmatmul.mubr.msk.bf16.gmra.mxu1 %vm3333_vm1, %v3489_v10  ;;  %2829 = vmatprep.subr.bf16.mxu0 %v2979_v0  ;;  %v2982_v10 = vld [vmem:[%s4070_s3 + $0x208] sm:$0xff]  }
  0x7b   : > { %1894 = vmatprep.mubr.bf16.mxu1 %v3551_v58  ;;  %2865 = vmatpush3.bf16.msra.mxu1 %v2978_v48 }
  0x7c   : > { %2858 = vmatprep.subr.bf16.mxu1 %v2979_v0 }
  0x7d   : > { %2830 = vmatpush3.bf16.msra.mxu0 %v2979_v0 }
  0x7e   : > { %2831 = vmatprep.subr.bf16.mxu0 %v2980_v22 }
  0x7f   : > { %2866 = vmatpush3.bf16.msra.mxu1 %v2979_v0 }
  0x80   : > { %1798 = vmatmul.mubr.bf16.gmra.mxu0 %v3508_v27  ;;  %2859 = vmatprep.subr.bf16.mxu1 %v2980_v22  ;;  %v2983_v27 = vld [vmem:[%s4070_s3 + $0x200] sm:$0xff]  }
  0x81   : > { %1805 = vmatprep.mubr.bf16.mxu0 %v3603_v41  ;;  %2832 = vmatpush3.bf16.msra.mxu0 %v2980_v22 }
  0x82   : > { %2520 = vmatmul.mubr.msk.bf16.gmra.mxu1 %vm3333_vm1, %v3516_v32  ;;  %2833 = vmatprep.subr.bf16.mxu0 %v2981_v44  ;;  %v768_v32 = vsel %vm699_vm2, 0.0, %v3699_v50 }
  0x83   : > { %1902 = vmatprep.mubr.bf16.mxu1 %v3605_v1  ;;  %2867 = vmatpush3.bf16.msra.mxu1 %v2980_v22  ;;  %v912_v11 = vrot.slane %v768_v32, 1 }
  0x84   : > { %2860 = vmatprep.subr.bf16.mxu1 %v2981_v44 }
  0x85   : > { %2834 = vmatpush3.bf16.msra.mxu0 %v2981_v44  ;;  %v914_v47 = vsel %vm796_vm5, %v912_v11, %v913_v49 }
  0x86   : > { %2835 = vmatprep.subr.bf16.mxu0 %v2982_v10 }
  0x87   : > { %2868 = vmatpush3.bf16.msra.mxu1 %v2981_v44 }
  0x88   : > { %1806 = vmatmul.mubr.bf16.gmra.mxu0 %v3551_v58  ;;  %2861 = vmatprep.subr.bf16.mxu1 %v2982_v10  ;;  %v778_v58 = vsel %vm699_vm2, %v725_v51, 0.0  ;;  %v919_v51 = vrot.slane %v768_v32, 2 }
  0x89   : > { %1813 = vmatprep.mubr.bf16.mxu0 %v3664_v13  ;;  %2836 = vmatpush3.bf16.msra.mxu0 %v2982_v10 }
  0x8a   : > { %2524 = vmatmul.mubr.msk.bf16.gmra.mxu1 %vm3333_vm1, %v3589_v5  ;;  %2837 = vmatprep.subr.bf16.mxu0 %v2983_v27  ;;  %v915_v5 = vrot.slane %v778_v58, 1 }
  0x8b   : > { %1910 = vmatprep.mubr.bf16.mxu1 %v3669_v19  ;;  %2869 = vmatpush3.bf16.msra.mxu1 %v2982_v10 }
  0x8c   : > { %2862 = vmatprep.subr.bf16.mxu1 %v2983_v27  ;;  %v916_v50 = vsel %vm796_vm5, %v913_v49, %v915_v5 }
  0x8d   : > { %2838 = vmatpush3.bf16.msra.mxu0 %v2983_v27  ;;  %v967_v38 = vpack.c.bf16 %v916_v50, %v914_v47 }
  0x8f   : > { %2870 = vmatpush3.bf16.msra.mxu1 %v2983_v27 }
  0x90   : > { %1814 = vmatmul.mubr.bf16.gmra.mxu0 %v3605_v1  ;;  %v922_v1 = vrot.slane %v778_v58, 2 }
  0x91   : > { %1821 = vmatprep.mubr.bf16.mxu0 %v3713_v60 }
  0x92   : > { %2528 = vmatmul.mubr.msk.bf16.gmra.mxu1 %vm3333_vm1, %v3631_v54  ;;  %v921_v54 = vsel %vm853_vm10, %v919_v51, %v920_v36  ;;  %v923_v52 = vsel %vm853_vm10, %v920_v36, %v922_v1 }
  0x93   : > { %1918 = vmatprep.mubr.bf16.mxu1 %v3705_v56  ;;  %v968_v53 = vpack.c.bf16 %v923_v52, %v921_v54 }
  0x98   : > { %1822 = vmatmul.mubr.bf16.gmra.mxu0 %v3669_v19 }
  0x99   : > { %1829 = vmatprep.mubr.bf16.mxu0 %v3733_v18 }
  0x9a   : > { %2532 = vmatmul.mubr.msk.bf16.gmra.mxu1 %vm3333_vm1, %v3680_v30 }
  0x9b   : > { %1926 = vmatprep.mubr.bf16.mxu1 %v967_v38 }
  0xa0   : > { %1830 = vmatmul.mubr.bf16.gmra.mxu0 %v3705_v56 }
  0xa1   : > { %1837 = vmatprep.mubr.bf16.mxu0 %v968_v53 }
  0xa2   : > { %2536 = vmatmul.mubr.msk.bf16.gmra.mxu1 %vm3333_vm1, %v3717_v63 }
  0xa3   : > { %1934 = vmatprep.mubr.bf16.mxu1 %v970_v37 }
  0xa8   : > { %1838 = vmatmul.mubr.bf16.gmra.mxu0 %v967_v38 }
  0xa9   : > { %2839 = vmatprep.mubr.bf16.mxu0 %v3472_v55 }
  0xaa   : > { %2540 = vmatmul.mubr.msk.bf16.gmra.mxu1 %vm3333_vm1, %v2539_v28 }
  0xab   : > { %2847 = vmatprep.mubr.bf16.mxu1 %v3713_v60 }
  0xb0   : > { %2840 = vmatmul.mubr.bf16.vlgmr.msra.gmra.mxu0 %v3549_v57 }
  0xb1   : > { %2843 = vmatprep.mubr.bf16.mxu0 %v3603_v41 }
  0xb2   : > { %2848 = vmatmul.mubr.bf16.vlgmr.msra.gmra.mxu1 %v3733_v18 }
  0xb3   : > { %2851 = vmatprep.mubr.bf16.mxu1 %v968_v53 }
  0xb8   : > { %2844 = vmatmul.mubr.bf16.gmra.mxu0 %v3664_v13 }
  0xba   : > { %2852 = vmatmul.mubr.bf16.gmra.mxu1 %v971_v43 }
  0xf0   : > { %v2567_v55 = vpop.f32.mrf.mxu0 }
  0xf1   : > { %v2631_v19 = vpop.f32.mrf.mxu1 }
  0xf2   : > { %v2568_v30 = vpop.f32.mrf.mxu0 }
  0xf3   : > { %v2569_v57 = vadd.f32 %v2568_v30, %v2567_v55  ;;  %v2632_v9 = vpop.f32.mrf.mxu1 }
  0xf4   : > { %v2570_v41 = vpop.f32.mrf.mxu0  ;;  %v2633_v59 = vadd.f32 %v2632_v9, %v2631_v19 }
  0xf5   : > { %v1590_v56 = vadd.f32 %v2569_v57, %v3861_v34  ;;  %v2634_v60 = vpop.f32.mrf.mxu1 }
  0xf6   : > { %v2571_v13 = vpop.f32.mrf.mxu0 }
  0xf7   : > { %v3864_v62 = vadd.f32 %v2633_v59, %v1590_v56  ;;  %v2572_v63 = vadd.f32 %v2571_v13, %v2570_v41  ;;  %v2635_v2 = vpop.f32.mrf.mxu1 }
  0xf8   : > { %v2573_v3 = vpop.f32.mrf.mxu0  ;;  %v2636_v23 = vadd.f32 %v2635_v2, %v2634_v60 }
  0xf9   : > { %v1593_v39 = vadd.f32 %v2572_v63, %v3861_v34  ;;  %v2637_v4 = vpop.f32.mrf.mxu1 }
  0xfa   : > { %v2574_v6 = vpop.f32.mrf.mxu0 }
  0xfb   : > { %v3867_v7 = vadd.f32 %v2636_v23, %v1593_v39  ;;  %v2575_v8 = vadd.f32 %v2574_v6, %v2573_v3  ;;  %v2638_v14 = vpop.f32.mrf.mxu1 }
  0xfc   : > { %v2576_v15 = vpop.f32.mrf.mxu0  ;;  %v2639_v16 = vadd.f32 %v2638_v14, %v2637_v4 }
  0xfd   : > { %v1598_v42 = vadd.f32 %v2575_v8, %v3861_v34  ;;  %v2640_v17 = vpop.f32.mrf.mxu1 }
  0xfe   : > { %v2577_v18 = vpop.f32.mrf.mxu0 }
  0xff   : > { %v3870_v61 = vadd.f32 %v2639_v16, %v1598_v42  ;;  %v2578_v20 = vadd.f32 %v2577_v18, %v2576_v15  ;;  %v2641_v21 = vpop.f32.mrf.mxu1 }
 0x100   : > { %v2579_v24 = vpop.f32.mrf.mxu0  ;;  %v2642_v26 = vadd.f32 %v2641_v21, %v2640_v17 }
 0x101   : > { %v1601_v25 = vadd.f32 %v2578_v20, %v3861_v34  ;;  %v2643_v28 = vpop.f32.mrf.mxu1 }
 0x102   : > { %v2580_v29 = vpop.f32.mrf.mxu0 }
 0x103   : > { %v3873_v31 = vadd.f32 %v2642_v26, %v1601_v25  ;;  %v2581_v33 = vadd.f32 %v2580_v29, %v2579_v24  ;;  %v2644_v46 = vpop.f32.mrf.mxu1 }
 0x104   : > { %v2582_v35 = vpop.f32.mrf.mxu0  ;;  %v2645_v40 = vadd.f32 %v2644_v46, %v2643_v28 }
 0x105   : > { %v1606_v37 = vadd.f32 %v2581_v33, %v3861_v34  ;;  %v2646_v12 = vpop.f32.mrf.mxu1 }
 0x106   : > { %v2583_v43 = vpop.f32.mrf.mxu0 }
 0x107   : > { %v3876_v45 = vadd.f32 %v2645_v40, %v1606_v37  ;;  %v2584_v48 = vadd.f32 %v2583_v43, %v2582_v35  ;;  %v2647_v0 = vpop.f32.mrf.mxu1 }
 0x108   : > { %v2585_v22 = vpop.f32.mrf.mxu0  ;;  %v2648_v10 = vadd.f32 %v2647_v0, %v2646_v12 }
 0x109   : > { %v1609_v44 = vadd.f32 %v2584_v48, %v3861_v34 }
 0x10a   : > { %v2649_v27 = vpop.f32.mrf.mxu1  ;;  %v2586_v32 = vpop.f32.mrf.mxu0 }
 0x10b   : > { %v3879_v58 = vadd.f32 %v2648_v10, %v1609_v44  ;;  %v2587_v11 = vadd.f32 %v2586_v32, %v2585_v22 }
 0x10c   : > { %v2650_v49 = vpop.f32.mrf.mxu1  ;;  %v2588_v5 = vpop.f32.mrf.mxu0 }
 0x10d   : > { %4094 = vst [vmem:[#allocation3_spill] sm:$0xff] %v3879_v58  ;;  %v1614_v47 = vadd.f32 %v2587_v11, %v3861_v34  ;;  %v2651_v50 = vadd.f32 %v2650_v49, %v2649_v27 }
 0x10e   : > { %v2652_v51 = vpop.f32.mrf.mxu1  ;;  %v2589_v36 = vpop.f32.mrf.mxu0 }
 0x10f   : > { %v3882_v1 = vadd.f32 %v2651_v50, %v1614_v47  ;;  %v2590_v38 = vadd.f32 %v2589_v36, %v2588_v5 }
 0x110   : > { %v2653_v54 = vpop.f32.mrf.mxu1  ;;  %v2591_v52 = vpop.f32.mrf.mxu0 }
 0x111   : > { %4095 = vst [vmem:[#allocation4_spill] sm:$0xff] %v3882_v1  ;;  %v1617_v53 = vadd.f32 %v2590_v38, %v3861_v34  ;;  %v2654_v55 = vadd.f32 %v2653_v54, %v2652_v51 }
 0x112   : > { %v2655_v19 = vpop.f32.mrf.mxu1  ;;  %v2592_v30 = vpop.f32.mrf.mxu0 }
 0x113   : > { %v3885_v57 = vadd.f32 %v2654_v55, %v1617_v53  ;;  %v2593_v9 = vadd.f32 %v2592_v30, %v2591_v52 }
 0x114   : > { %v2656_v41 = vpop.f32.mrf.mxu1  ;;  %v2594_v56 = vpop.f32.mrf.mxu0 }
 0x115   : > { %4096 = vst [vmem:[#allocation5_spill] sm:$0xff] %v3885_v57  ;;  %v1622_v59 = vadd.f32 %v2593_v9, %v3861_v34  ;;  %v2657_v60 = vadd.f32 %v2656_v41, %v2655_v19 }
 0x116   : > { %v2658_v13 = vpop.f32.mrf.mxu1  ;;  %v2595_v63 = vpop.f32.mrf.mxu0 }
 0x117   : > { %v3888_v2 = vadd.f32 %v2657_v60, %v1622_v59  ;;  %v2596_v3 = vadd.f32 %v2595_v63, %v2594_v56 }
 0x118   : > { %v2659_v39 = vpop.f32.mrf.mxu1  ;;  %v2597_v23 = vpop.f32.mrf.mxu0 }
 0x119   : > { %v1625_v4 = vadd.f32 %v2596_v3, %v3861_v34  ;;  %v2660_v6 = vadd.f32 %v2659_v39, %v2658_v13 }
 0x11a   : > { %v2661_v8 = vpop.f32.mrf.mxu1  ;;  %v2598_v14 = vpop.f32.mrf.mxu0 }
 0x11b   : > { %v3891_v15 = vadd.f32 %v2660_v6, %v1625_v4  ;;  %v2599_v42 = vadd.f32 %v2598_v14, %v2597_v23 }
 0x11c   : > { %v2662_v16 = vpop.f32.mrf.mxu1  ;;  %v2600_v17 = vpop.f32.mrf.mxu0 }
 0x11d   : > { %4097 = vst [vmem:[#allocation6_spill] sm:$0xff] %v3891_v15  ;;  %v1630_v18 = vadd.f32 %v2599_v42, %v3861_v34  ;;  %v2663_v20 = vadd.f32 %v2662_v16, %v2661_v8 }
 0x11e   : > { %v2664_v21 = vpop.f32.mrf.mxu1  ;;  %v2601_v24 = vpop.f32.mrf.mxu0 }
 0x11f   : > { %v3894_v25 = vadd.f32 %v2663_v20, %v1630_v18  ;;  %v2602_v26 = vadd.f32 %v2601_v24, %v2600_v17 }
 0x120   : > { %v2665_v28 = vpop.f32.mrf.mxu1  ;;  %v2603_v29 = vpop.f32.mrf.mxu0 }
 0x121   : > { %v1633_v33 = vadd.f32 %v2602_v26, %v3861_v34  ;;  %v2666_v46 = vadd.f32 %v2665_v28, %v2664_v21 }
 0x122   : > { %v2667_v35 = vpop.f32.mrf.mxu1  ;;  %v2604_v37 = vpop.f32.mrf.mxu0 }
 0x123   : > { %v3897_v40 = vadd.f32 %v2666_v46, %v1633_v33  ;;  %v2605_v12 = vadd.f32 %v2604_v37, %v2603_v29 }
 0x124   : > { %v2668_v43 = vpop.f32.mrf.mxu1  ;;  %v2606_v48 = vpop.f32.mrf.mxu0 }
 0x125   : > { %v1638_v0 = vadd.f32 %v2605_v12, %v3861_v34  ;;  %v2669_v22 = vadd.f32 %v2668_v43, %v2667_v35 }
 0x126   : > { %v2670_v44 = vpop.f32.mrf.mxu1  ;;  %v2607_v10 = vpop.f32.mrf.mxu0 }
 0x127   : > { %v3900_v27 = vadd.f32 %v2669_v22, %v1638_v0  ;;  %v2608_v32 = vadd.f32 %v2607_v10, %v2606_v48 }
 0x128   : > { %v2671_v11 = vpop.f32.mrf.mxu1  ;;  %v2609_v49 = vpop.f32.mrf.mxu0 }
 0x129   : > { %4098 = vst [vmem:[#allocation7_spill] sm:$0xff] %v3900_v27  ;;  %v1641_v5 = vadd.f32 %v2608_v32, %v3861_v34  ;;  %v2672_v47 = vadd.f32 %v2671_v11, %v2670_v44 }
 0x12a   : > { %v2673_v50 = vpop.f32.mrf.mxu1  ;;  %v2610_v51 = vpop.f32.mrf.mxu0 }
 0x12b   : > { %v3903_v36 = vadd.f32 %v2672_v47, %v1641_v5  ;;  %v2611_v38 = vadd.f32 %v2610_v51, %v2609_v49 }
 0x12c   : > { %v2674_v54 = vpop.f32.mrf.mxu1  ;;  %v2612_v52 = vpop.f32.mrf.mxu0 }
 0x12d   : > { %4099 = vst [vmem:[#allocation8_spill] sm:$0xff] %v3903_v36  ;;  %v1646_v53 = vadd.f32 %v2611_v38, %v3861_v34  ;;  %v2675_v55 = vadd.f32 %v2674_v54, %v2673_v50 }
 0x12e   : > { %v2676_v19 = vpop.f32.mrf.mxu1  ;;  %v2613_v30 = vpop.f32.mrf.mxu0 }
 0x12f   : > { %v3906_v9 = vadd.f32 %v2675_v55, %v1646_v53  ;;  %v2614_v41 = vadd.f32 %v2613_v30, %v2612_v52 }
 0x130   : > { %v2677_v56 = vpop.f32.mrf.mxu1  ;;  %v2695_v59 = vpop.f32.mrf.mxu0 }
 0x131   : > { %4100 = vst [vmem:[#allocation9_spill] sm:$0xff] %v3906_v9  ;;  %v1649_v60 = vadd.f32 %v2614_v41, %v3861_v34  ;;  %v2678_v13 = vadd.f32 %v2677_v56, %v2676_v19 }
 0x132   : > { %v2759_v63 = vpop.f32.mrf.mxu1  ;;  %v2696_v3 = vpop.f32.mrf.mxu0 }
 0x133   : > { %v3909_v39 = vadd.f32 %v2678_v13, %v1649_v60  ;;  %v2697_v27 = vadd.f32 %v2696_v3, %v2695_v59 }
 0x134   : > { %v2760_v23 = vpop.f32.mrf.mxu1  ;;  %v2698_v4 = vpop.f32.mrf.mxu0 }
 0x135   : > { %4101 = vst [vmem:[#allocation10_spill] sm:$0xff] %v3909_v39 }
 0x136   : > { %v2762_v6 = vpop.f32.mrf.mxu1  ;;  %v2699_v8 = vpop.f32.mrf.mxu0 }
 0x138   : > { %v2763_v14 = vpop.f32.mrf.mxu1  ;;  %v2701_v42 = vpop.f32.mrf.mxu0 }
 0x13a   : > { %v2765_v16 = vpop.f32.mrf.mxu1  ;;  %v2702_v17 = vpop.f32.mrf.mxu0 }
 0x13c   : > { %v2766_v18 = vpop.f32.mrf.mxu1  ;;  %v2704_v20 = vpop.f32.mrf.mxu0 }
 0x13e   : > { %v2768_v21 = vpop.f32.mrf.mxu1  ;;  %v2705_v24 = vpop.f32.mrf.mxu0 }
 0x140   : > { %v2769_v26 = vpop.f32.mrf.mxu1  ;;  %v2707_v28 = vpop.f32.mrf.mxu0 }
 0x142   : > { %v3911_v34 = vpop.f32.mrf.mxu1  ;;  %v2708_v29 = vpop.f32.mrf.mxu0 }
 0x144   : > { %v3913_v33 = vpop.f32.mrf.mxu1  ;;  %v3915_v46 = vpop.f32.mrf.mxu0 }
 0x146   : > { %v3917_v35 = vpop.f32.mrf.mxu1  ;;  %v3919_v37 = vpop.f32.mrf.mxu0 }
 0x147   : > { %4102 = vst [vmem:[#allocation11_spill] sm:$0xff] %v3917_v35 }
 0x148   : > { %v3921_v12 = vpop.f32.mrf.mxu1  ;;  %v2713_v43 = vpop.f32.mrf.mxu0 }
 0x149   : > { %4103 = vst [vmem:[#allocation12_spill] sm:$0xff] %v3921_v12 }
 0x14a   : > { %v3923_v48 = vpop.f32.mrf.mxu1  ;;  %v2714_v0 = vpop.f32.mrf.mxu0 }
 0x14b   : > { %4104 = vst [vmem:[#allocation13_spill] sm:$0xff] %v3923_v48  ;;  %v2761_v48 = vadd.f32 %v2760_v23, %v2759_v63 }
 0x14c   : > { %v3925_v22 = vpop.f32.mrf.mxu1  ;;  %v3927_v44 = vpop.f32.mrf.mxu0 }
 0x14d   : > { %4105 = vst [vmem:[#allocation14_spill] sm:$0xff] %v3925_v22  ;;  %v1784_v22 = vadd.f32 %v2697_v27, %v3864_v62 }
 0x14e   : > { %v3929_v10 = vpop.f32.mrf.mxu1  ;;  %v3931_v32 = vpop.f32.mrf.mxu0 }
 0x14f   : > { %4106 = vst [vmem:[#allocation15_spill] sm:$0xff] %v3929_v10  ;;  %v2703_v10 = vadd.f32 %v2702_v17, %v2701_v42  ;;  %v2770_v17 = vadd.f32 %v2769_v26, %v2768_v21  ;;  %v1881_v23 = vadd.f32 %v2761_v48, %v1784_v22 }
 0x150   : > { %v3933_v11 = vpop.f32.mrf.mxu1  ;;  %v2719_v49 = vpop.f32.mrf.mxu0 }
 0x151   : > { %4107 = vst [vmem:[#allocation16_spill] sm:$0xff] %v3933_v11  ;;  %v2700_v11 = vadd.f32 %v2699_v8, %v2698_v4  ;;  %v2767_v8 = vadd.f32 %v2766_v18, %v2765_v16 }
 0x152   : > { %v2783_v5 = vpop.f32.mrf.mxu1  ;;  %v2720_v47 = vpop.f32.mrf.mxu0 }
 0x153   : > { %v1787_v1 = vadd.f32 %v2700_v11, %v3867_v7  ;;  %v2721_v59 = vadd.f32 %v2720_v47, %v2719_v49  ;;  %v2715_v7 = vadd.f32 %v2714_v0, %v2713_v43  ;;  %v4114_v43 = vld [vmem:[#allocation4_spill] sm:$0xff]  ;;  %v4115_v0 = vld [vmem:[#allocation13_spill] sm:$0xff] }
 0x154   : > { %v2784_v50 = vpop.f32.mrf.mxu1  ;;  %v2722_v51 = vpop.f32.mrf.mxu0 }
 0x155   : > { %v1808_v48 = vadd.f32 %v2715_v7, %v4114_v43 }
 0x156   : > { %v3935_v38 = vpop.f32.mrf.mxu1  ;;  %v2723_v54 = vpop.f32.mrf.mxu0 }
 0x157   : > { %4108 = vst [vmem:[#allocation17_spill] sm:$0xff] %v3935_v38 }
 0x158   : > { %v3937_v52 = vpop.f32.mrf.mxu1  ;;  %v2725_v53 = vpop.f32.mrf.mxu0 }
 0x159   : > { %4109 = vst [vmem:[#allocation18_spill] sm:$0xff] %v3937_v52  ;;  %v2706_v52 = vadd.f32 %v2705_v24, %v2704_v20  ;;  %v2709_v20 = vadd.f32 %v2708_v29, %v2707_v28 }
 0x15a   : > { %v2789_v55 = vpop.f32.mrf.mxu1  ;;  %v2726_v19 = vpop.f32.mrf.mxu0 }
 0x15b   : > { %v1795_v42 = vadd.f32 %v2706_v52, %v3873_v31  ;;  %v1800_v16 = vadd.f32 %v2709_v20, %v3876_v45  ;;  %v2724_v31 = vadd.f32 %v2723_v54, %v2722_v51  ;;  %v4120_v51 = vld [vmem:[#allocation9_spill] sm:$0xff] }
 0x15c   : > { %v2790_v30 = vpop.f32.mrf.mxu1  ;;  %v2728_v41 = vpop.f32.mrf.mxu0 }
 0x15d   : > { %v2791_v27 = vadd.f32 %v2790_v30, %v2789_v55  ;;  %v1892_v21 = vadd.f32 %v2770_v17, %v1795_v42 }
 0x15e   : > { %v2792_v56 = vpop.f32.mrf.mxu1  ;;  %v2729_v60 = vpop.f32.mrf.mxu0  ;;  %v4118_v49 = vld [vmem:[#allocation17_spill] sm:$0xff] }
 0x15f   : > { %v2730_v63 = vadd.f32 %v2729_v60, %v2728_v41 }
 0x160   : > { %v2793_v13 = vpop.f32.mrf.mxu1  ;;  %v2731_v36 = vpop.f32.mrf.mxu0 }
 0x161   : > { %v1827_v26 = vadd.f32 %v2730_v63, %v3897_v40  ;;  %v2794_v28 = vadd.f32 %v2793_v13, %v2792_v56  ;;  %v4122_v13 = vld [vmem:[#allocation15_spill] sm:$0xff] }
 0x162   : > { %v3939_v39 = vpop.f32.mrf.mxu1  ;;  %v2732_v12 = vpop.f32.mrf.mxu0 }
 0x163   : > { %4110 = vst [vmem:[#allocation19_spill] sm:$0xff] %v3939_v39  ;;  %v2727_v39 = vadd.f32 %v2726_v19, %v2725_v53  ;;  %v2733_v22 = vadd.f32 %v2732_v12, %v2731_v36  ;;  %v4121_v19 = vld [vmem:[#allocation5_spill] sm:$0xff]  ;;  %v1924_v60 = vadd.f32 %v2794_v28, %v1827_v26  ;;  %v4132_v28 = vld [vmem:[#allocation8_spill] sm:$0xff] }
 0x164   : > { %v3941_v35 = vpop.f32.mrf.mxu1  ;;  %v3943_v58 = vpop.f32.mrf.mxu0 }
 0x165   : > { %4111 = vst [vmem:[#allocation20_spill] sm:$0xff] %v3941_v35  ;;  %4112 = vst [vmem:[#allocation21_spill] sm:$0xff] %v3943_v58  ;;  %v2764_v35 = vadd.f32 %v2763_v14, %v2762_v6  ;;  %v1792_v58 = vadd.f32 %v2703_v10, %v3870_v61  ;;  %v1824_v62 = vadd.f32 %v2727_v39, %v3894_v25 }
 0x166   : > { %v3945_v57 = vpop.f32.mrf.mxu1  ;;  %v3947_v9 = vpop.f32.mrf.mxu0  ;;  %v1816_v6 = vadd.f32 %v2721_v59, %v3888_v2  ;;  %v2785_v61 = vadd.f32 %v2784_v50, %v2783_v5  ;;  %v2773_v25 = vadd.f32 %v3913_v33, %v3911_v34  ;;  %v2712_v2 = vadd.f32 %v3919_v37, %v3915_v46  ;;  %v4116_v34 = vld [vmem:[#allocation14_spill] sm:$0xff]  ;;  %v4123_v59 = vld [vmem:[#allocation16_spill] sm:$0xff] }
 0x167   : > { %v1884_v11 = vadd.f32 %v2764_v35, %v1787_v1  ;;  %v1889_v18 = vadd.f32 %v2767_v8, %v1792_v58  ;;  %v2718_v1 = vadd.f32 %v3931_v32, %v3927_v44  ;;  %v1921_v35 = vadd.f32 %v2791_v27, %v1824_v62  ;;  %v4119_v5 = vld [vmem:[#allocation18_spill] sm:$0xff] }
 0x168   : > { %v3949_v38 = vpop.f32.mrf.mxu1  ;;  %v2737_v15 = vpop.f32.mrf.mxu0  ;;  %v2779_v33 = vadd.f32 %v4116_v34, %v4115_v0  ;;  %v1913_v44 = vadd.f32 %v2785_v61, %v1816_v6  ;;  %v2788_v40 = vadd.f32 %v4119_v5, %v4118_v49  ;;  %v1897_v55 = vadd.f32 %v2773_v25, %v1800_v16  ;;  %v4128_v61 = vld [vmem:[#allocation3_spill] sm:$0xff] }
 0x169   : > { %4113 = vst [vmem:[#allocation22_spill] sm:$0xff] %v3949_v38  ;;  %v1811_v30 = vadd.f32 %v2718_v1, %v4121_v19  ;;  %v4129_v16 = vld [vmem:[#allocation11_spill] sm:$0xff] }
 0x16a   : > { %v2801_v3 = vpop.f32.mrf.mxu1  ;;  %v2738_v4 = vpop.f32.mrf.mxu0  ;;  %v4125_v8 = vld [vmem:[#allocation19_spill] sm:$0xff]  ;;  %v1905_v6 = vadd.f32 %v2779_v33, %v1808_v48 }
 0x16b   : > { %v2739_v45 = vadd.f32 %v2738_v4, %v2737_v15  ;;  %v4117_v15 = vld [vmem:[#allocation6_spill] sm:$0xff] }
 0x16c   : > { %v2802_v24 = vpop.f32.mrf.mxu1  ;;  %v2740_v38 = vpop.f32.mrf.mxu0  ;;  %v1819_v32 = vadd.f32 %v2724_v31, %v4117_v15  ;;  %v4126_v42 = vld [vmem:[#allocation20_spill] sm:$0xff]  ;;  %v4127_v20 = vld [vmem:[#allocation21_spill] sm:$0xff] }
 0x16d   : > { %v1840_v54 = vadd.f32 %v2739_v45, %v4120_v51  ;;  %v2803_v52 = vadd.f32 %v2802_v24, %v2801_v3  ;;  %v2782_v3 = vadd.f32 %v4123_v59, %v4122_v13  ;;  %v2797_v17 = vadd.f32 %v4126_v42, %v4125_v8  ;;  %v4130_v31 = vld [vmem:[#allocation12_spill] sm:$0xff] }
 0x16e   : > { %v2804_v14 = vpop.f32.mrf.mxu1  ;;  %v2741_v10 = vpop.f32.mrf.mxu0  ;;  %v2736_v24 = vadd.f32 %v3947_v9, %v4127_v20  ;;  %v1916_v7 = vadd.f32 %v2788_v40, %v1819_v32  ;;  %v4131_v9 = vld [vmem:[#allocation10_spill] sm:$0xff] }
 0x16f   : > { %v2742_v36 = vadd.f32 %v2741_v10, %v2740_v38  ;;  %v4124_v38 = vld [vmem:[#allocation7_spill] sm:$0xff]  ;;  %v1803_v10 = vadd.f32 %v2712_v2, %v4128_v61  ;;  %v1937_v45 = vadd.f32 %v2803_v52, %v1840_v54  ;;  %v1908_v34 = vadd.f32 %v2782_v3, %v1811_v30 }
 0x170   : > { %v2805_v39 = vpop.f32.mrf.mxu1  ;;  %v2841_v58 = vpop.f32.mrf.mxu0  ;;  %v1832_v4 = vadd.f32 %v2733_v22, %v4124_v38  ;;  %v4133_v33 = vld [vmem:[#allocation22_spill] sm:$0xff] }
 0x171   : > { %v3972_v29 = vadd.f32 %v2841_v58, %v1889_v18  ;;  %v2776_v18 = vadd.f32 %v4130_v31, %v4129_v16  ;;  %v2806_v58 = vadd.f32 %v2805_v39, %v2804_v14  ;;  %v2800_v14 = vadd.f32 %v4133_v33, %v3945_v57 }
 0x172   : > { %v2849_v46 = vpop.f32.mrf.mxu1  ;;  %v1977_v37 = vpop.f32.mrf.mxu0  ;;  %v1929_v0 = vadd.f32 %v2797_v17, %v1832_v4 }
 0x173   : > { %2042 = vst [vmem:[%s3963_s14 + $0x10] sm:$0xff] %v3972_v29  ;;  %v3982_v47 = vadd.f32 %v2849_v46, %v1921_v35  ;;  %v3984_v50 = vadd.f32 %v1977_v37, %v1881_v23  ;;  %v1835_v35 = vadd.f32 %v2736_v24, %v4132_v28  ;;  %v1900_v15 = vadd.f32 %v2776_v18, %v1803_v10 }
 0x174   : > { %v2009_v12 = vpop.f32.mrf.mxu1  ;;  %v2842_v53 = vpop.f32.mrf.mxu0 }
 0x175   : > { %2050 = vst [vmem:[%s3963_s14 + $0x50] sm:$0xff] %v3982_v47  ;;  %2040 = vst [vmem:[%s3963_s14] sm:$0xff] %v3984_v50  ;;  %v3992_v41 = vadd.f32 %v2009_v12, %v1913_v44  ;;  %v3994_v56 = vadd.f32 %v2842_v53, %v1892_v21  ;;  %v1843_v21 = vadd.f32 %v2742_v36, %v4131_v9 }
 0x176   : > { %v2850_v62 = vpop.f32.mrf.mxu1  ;;  %v1980_v27 = vpop.f32.mrf.mxu0  ;;  %v1932_v12 = vadd.f32 %v2800_v14, %v1835_v35 }
 0x177   : > { %2048 = vst [vmem:[%s3963_s14 + $0x40] sm:$0xff] %v3992_v41  ;;  %2043 = vst [vmem:[%s3963_s14 + $0x18] sm:$0xff] %v3994_v56  ;;  %v4007_v63 = vadd.f32 %v2850_v62, %v1924_v60  ;;  %v4009_v23 = vadd.f32 %v1980_v27, %v1884_v11  ;;  %v1940_v57 = vadd.f32 %v2806_v58, %v1843_v21 }
 0x178   : > { %v2012_v25 = vpop.f32.mrf.mxu1  ;;  %v2845_v1 = vpop.f32.mrf.mxu0 }
 0x179   : > { %2051 = vst [vmem:[%s3963_s14 + $0x58] sm:$0xff] %v4007_v63  ;;  %2041 = vst [vmem:[%s3963_s14 + $0x8] sm:$0xff] %v4009_v23  ;;  %v2056_v11 = vadd.f32 %v4009_v23, %v3984_v50  ;;  %v2013_v26 = vadd.f32 %v2012_v25, %v1916_v7  ;;  %v2002_v2 = vadd.f32 %v2845_v1, %v1905_v6 }
 0x17a   : > { %v2853_v43 = vpop.f32.mrf.mxu1  ;;  %v1993_v48 = vpop.f32.mrf.mxu0 }
 0x17b   : > { %v2057_v39 = vadd.f32 %v2056_v11, %v3972_v29  ;;  %2049 = vst [vmem:[%s3963_s14 + $0x48] sm:$0xff] %v2013_v26  ;;  %2046 = vst [vmem:[%s3963_s14 + $0x30] sm:$0xff] %v2002_v2  ;;  %v2034_v22 = vadd.f32 %v2853_v43, %v1937_v45  ;;  %v1994_v46 = vadd.f32 %v1993_v48, %v1897_v55 }
 0x17c   : > { %v2025_v37 = vpop.f32.mrf.mxu1  ;;  %v2846_v44 = vpop.f32.mrf.mxu0 }
 0x17d   : > { %2054 = vst [vmem:[%s3963_s14 + $0x70] sm:$0xff] %v2034_v22  ;;  %2044 = vst [vmem:[%s3963_s14 + $0x20] sm:$0xff] %v1994_v46  ;;  %v2058_v32 = vadd.f32 %v2057_v39, %v3994_v56  ;;  %v2026_v49 = vadd.f32 %v2025_v37, %v1929_v0  ;;  %v2005_v5 = vadd.f32 %v2846_v44, %v1908_v34 }
 0x17e   : > { %v2854_v40 = vpop.f32.mrf.mxu1  ;;  %v1996_v51 = vpop.f32.mrf.mxu0 }
 0x17f   : > { %v2059_v54 = vadd.f32 %v2058_v32, %v1994_v46  ;;  %2052 = vst [vmem:[%s3963_s14 + $0x60] sm:$0xff] %v2026_v49  ;;  %2047 = vst [vmem:[%s3963_s14 + $0x38] sm:$0xff] %v2005_v5  ;;  %v2037_v52 = vadd.f32 %v2854_v40, %v1940_v57  ;;  %v1997_v36 = vadd.f32 %v1996_v51, %v1900_v15 }
 0x180   : > { %v2028_v53 = vpop.f32.mrf.mxu1 }
 0x181   : > { %2055 = vst [vmem:[%s3963_s14 + $0x78] sm:$0xff] %v2037_v52  ;;  %2045 = vst [vmem:[%s3963_s14 + $0x28] sm:$0xff] %v1997_v36  ;;  %v2060_v55 = vadd.f32 %v2059_v54, %v1997_v36  ;;  %v2029_v19 = vadd.f32 %v2028_v53, %v1932_v12 }
 0x183   : > { %v2061_v30 = vadd.f32 %v2060_v55, %v2002_v2  ;;  %2053 = vst [vmem:[%s3963_s14 + $0x68] sm:$0xff] %v2029_v19 }
 0x185   : > { %v2062_v60 = vadd.f32 %v2061_v30, %v2005_v5 }
 0x187   : > { %v2063_v13 = vadd.f32 %v2062_v60, %v3992_v41 }
 0x189   : > { %v2064_v59 = vadd.f32 %v2063_v13, %v2013_v26 }
 0x18b   : > { %v2065_v3 = vadd.f32 %v2064_v59, %v3982_v47 }
 0x18d   : > { %v2066_v38 = vadd.f32 %v2065_v3, %v4007_v63 }
 0x18f   : > { %v2067_v4 = vadd.f32 %v2066_v38, %v2026_v49 }
 0x191   : > { %v2068_v8 = vadd.f32 %v2067_v4, %v2029_v19 }
 0x193   : > { %v2069_v42 = vadd.f32 %v2068_v8, %v2034_v22 }
 0x195   : > { %v2070_v17 = vadd.f32 %v2069_v42, %v2037_v52 }
 0x197   : > { %v2071_v20 = vrot.slane %v2070_v17, 4 }
 0x199   : > { %v2072_v24 = vadd.f32 %v2071_v20, %v2070_v17 }
 0x19b   : > { %v2073_v62 = vrot.slane %v2072_v24, 2 }
 0x19d   : > { %v2074_v27 = vadd.f32 %v2073_v62, %v2072_v24 }
 0x19f   : > { %v2075_v7 = vrot.slane %v2074_v27, 1 }
 0x1a1   : > { %v2076_v6 = vadd.f32 %v2075_v7, %v2074_v27 }
 0x1a3   : > { %v2078_v61 = vmul.f32 0.0078125, %v2076_v6 }
 0x1a5   : > { %v2079_v10 = vsub.f32 %v3984_v50, %v2078_v61  ;;  %v2080_v16 = vsub.f32 %v4009_v23, %v2078_v61  ;;  %v2081_v31 = vsub.f32 %v3972_v29, %v2078_v61  ;;  %v2082_v18 = vsub.f32 %v3994_v56, %v2078_v61 }
 0x1a6   : > { %v2083_v9 = vsub.f32 %v1994_v46, %v2078_v61  ;;  %v2084_v21 = vsub.f32 %v1997_v36, %v2078_v61  ;;  %v2085_v25 = vsub.f32 %v2002_v2, %v2078_v61  ;;  %v2086_v1 = vsub.f32 %v2005_v5, %v2078_v61 }
 0x1a7   : > { %v2087_v45 = vsub.f32 %v3992_v41, %v2078_v61  ;;  %v2088_v58 = vsub.f32 %v2013_v26, %v2078_v61  ;;  %v2089_v11 = vsub.f32 %v3982_v47, %v2078_v61  ;;  %v2090_v28 = vsub.f32 %v4007_v63, %v2078_v61 }
 0x1a8   : > { %v2091_v35 = vsub.f32 %v2026_v49, %v2078_v61  ;;  %v2092_v43 = vsub.f32 %v2029_v19, %v2078_v61  ;;  %v2093_v50 = vsub.f32 %v2034_v22, %v2078_v61  ;;  %v2094_v48 = vsub.f32 %v2037_v52, %v2078_v61 }
 0x1a9   : > { %v2095_v23 = vmul.f32 %v2079_v10, %v2079_v10  ;;  %v2096_v0 = vmul.f32 %v2080_v16, %v2080_v16  ;;  %v2097_v29 = vmul.f32 %v2081_v31, %v2081_v31  ;;  %v2098_v56 = vmul.f32 %v2082_v18, %v2082_v18 }
 0x1aa   : > { %v2099_v14 = vmul.f32 %v2083_v9, %v2083_v9  ;;  %v2100_v39 = vmul.f32 %v2084_v21, %v2084_v21  ;;  %v2101_v41 = vmul.f32 %v2085_v25, %v2085_v25  ;;  %v2102_v37 = vmul.f32 %v2086_v1, %v2086_v1 }
 0x1ab   : > { %v2111_v34 = vadd.f32 %v2096_v0, %v2095_v23  ;;  %v2103_v63 = vmul.f32 %v2087_v45, %v2087_v45  ;;  %v2104_v15 = vmul.f32 %v2088_v58, %v2088_v58  ;;  %v2105_v32 = vmul.f32 %v2089_v11, %v2089_v11 }
 0x1ac   : > { %v2106_v5 = vmul.f32 %v2090_v28, %v2090_v28  ;;  %v2107_v40 = vmul.f32 %v2091_v35, %v2091_v35  ;;  %v2108_v54 = vmul.f32 %v2092_v43, %v2092_v43  ;;  %v2109_v36 = vmul.f32 %v2093_v50, %v2093_v50 }
 0x1ad   : > { %v2112_v33 = vadd.f32 %v2111_v34, %v2097_v29  ;;  %v2110_v53 = vmul.f32 %v2094_v48, %v2094_v48 }
 0x1af   : > { %v2113_v2 = vadd.f32 %v2112_v33, %v2098_v56 }
 0x1b1   : > { %v2114_v46 = vadd.f32 %v2113_v2, %v2099_v14 }
 0x1b3   : > { %v2115_v26 = vadd.f32 %v2114_v46, %v2100_v39 }
 0x1b5   : > { %v2116_v47 = vadd.f32 %v2115_v26, %v2101_v41 }
 0x1b7   : > { %v2117_v44 = vadd.f32 %v2116_v47, %v2102_v37 }
 0x1b9   : > { %v2118_v22 = vadd.f32 %v2117_v44, %v2103_v63 }
 0x1bb   : > { %v2119_v49 = vadd.f32 %v2118_v22, %v2104_v15 }
 0x1bd   : > { %v2120_v57 = vadd.f32 %v2119_v49, %v2105_v32 }
 0x1bf   : > { %v2121_v51 = vadd.f32 %v2120_v57, %v2106_v5 }
 0x1c1   : > { %v2122_v52 = vadd.f32 %v2121_v51, %v2107_v40 }
 0x1c3   : > { %v2123_v12 = vadd.f32 %v2122_v52, %v2108_v54 }
 0x1c5   : > { %v2124_v55 = vadd.f32 %v2123_v12, %v2109_v36 }
 0x1c7   : > { %v2125_v19 = vadd.f32 %v2124_v55, %v2110_v53 }
 0x1c9   : > { %v2126_v30 = vrot.slane %v2125_v19, 4 }
 0x1cb   : > { %v2127_v60 = vadd.f32 %v2126_v30, %v2125_v19 }
 0x1cd   : > { %v2128_v13 = vrot.slane %v2127_v60, 2 }
 0x1cf   : > { %v2129_v59 = vadd.f32 %v2128_v13, %v2127_v60 }
 0x1d1   : > { %v2130_v3 = vrot.slane %v2129_v59, 1 }
 0x1d3   : > { %v2131_v38 = vadd.f32 %v2130_v3, %v2129_v59 }
 0x1d5   : > { %v2132_v4 = vsel %vm699_vm2, %v2076_v6, %v2131_v38 }
 0x1d6   : > { %2133 = vst [vmem:[%s494_s15] sm:$0x3] %v2132_v4 }
 0x1d7 PF: > { %s19_s9 = sadd.s32 1, %s3022_s9   ;;  %s4134_s24 = sld [smem:[#allocation2_spill]] }
 0x1d8   : > { %p16_p11 = scmp.ge.s32.totalorder %s19_s9, 6   ;;  %s4135_s27 = smov %s3014_s29 }
 0x1d9   : > { %s4136_s28 = smov %s3018_s30  ;;  %s4137_s29 = smov %s4140_s10 }
 0x1da   :  { %18 = sbr.rel (!%p16_p11) target bundleno = 3 (0x3), region = 96 }
 0x1dd   : > { %s4138_s30 = smov %s4134_s24 }

</bundles_post_ra>
